<compile_context>
chip_gen: v7x
topology: tpu7x:2x2x1
jax: 0.10.0
libtpu: 0.0.40
codegen_flags: <defaults>
</compile_context>

<pallas_src>
import math
from functools import partial

import jax
import jax.numpy as jnp
from jax.experimental import pallas as pl
from jax.experimental.pallas import tpu as pltpu

LANE = 128                         # lane width
SUB = 8                            # sublane width
BBLK_CAP = 128                     # max batch rows per block (MXU row fill vs. VMEM/regs)
TT_REC = 8                         # unrolled time steps per recurrence grid block
MATMUL_DTYPE = jnp.bfloat16        # MXU operand dtype (accumulation stays f32)
SEQ_DTYPE = jnp.bfloat16           # HBM dtype for g / h sequence intermediates
VMEM_LIMIT = 32 * 1024 * 1024      # explicit scoped-VMEM limit (fits v7x's 64 MiB physical)
PROJ_BLOCK_BUDGET = 5 * 1024 * 1024  # per-block (x + out) bytes budget for projections


def _rup(n, m):
    return ((n + m - 1) // m) * m


def _choose_bblk(batch):
    """Batch block: as large as possible (<= BBLK_CAP), minimal padding, multiple of 8."""
    b8 = _rup(batch, SUB)
    nblk = -(-b8 // BBLK_CAP)                # ceil
    bblk = _rup(-(-b8 // nblk), SUB)
    return bblk, bblk * nblk                 # (bblk, padded batch Bp)


def _choose_tt_proj(tp, bblk, row_bytes, budget=PROJ_BLOCK_BUDGET):
    """Largest divisor of Tp whose (x + out) block fits the VMEM budget."""
    best = 1
    for tt in range(1, tp + 1):
        if tp % tt == 0 and bblk * tt * row_bytes <= budget:
            best = tt
    return best


# ---------------------------------------------------------------------------
# Kernel 1: sequence-level projection GEMM (time-major blocks), optionally fused
# with the gLN of its input:
#   out[t, b, :] = (x[t, b, :] * scale[b, :] + shift[b, :]) @ W + bias
# Grid: (batch blocks, time blocks), both "parallel" (rows are independent).
# ---------------------------------------------------------------------------
def _proj_kernel(x_ref, w_ref, b_ref, o_ref):
    tt, bb, cp = x_ref.shape
    x = x_ref[...].reshape(tt * bb, cp).astype(MATMUL_DTYPE)
    acc = jnp.dot(x, w_ref[...], preferred_element_type=jnp.float32) + b_ref[...]
    o_ref[...] = acc.reshape(tt, bb, -1).astype(o_ref.dtype)


def _proj_norm_kernel(x_ref, scale_ref, shift_ref, w_ref, b_ref, o_ref):
    tt, bb, cp = x_ref.shape
    xn = (x_ref[...].astype(jnp.float32) * scale_ref[...][None, :, :]
          + shift_ref[...][None, :, :]).astype(MATMUL_DTYPE)
    xn = xn.reshape(tt * bb, cp)
    acc = jnp.dot(xn, w_ref[...], preferred_element_type=jnp.float32) + b_ref[...]
    o_ref[...] = acc.reshape(tt, bb, -1).astype(o_ref.dtype)


def _project(x, w, bias, scale=None, shift=None, *, bblk, tt, out_dtype):
    """x: [Tp, Bp, Cp] ; w: [Cp, Gp] bf16 ; bias: [1, Gp] f32 -> [Tp, Bp, Gp] out_dtype."""
    Tp, Bp, Cp = x.shape
    Gp = w.shape[1]
    nb, nt = Bp // bblk, Tp // tt

    # TODO(synk): for v7x, single-buffer the constant W / bias operands with
    # pipeline_mode=pl.Buffered(1) once buffer_count=1 is universally supported.
    x_spec = pl.BlockSpec((tt, bblk, Cp), lambda b, t: (t, b, 0))
    w_spec = pl.BlockSpec((Cp, Gp), lambda b, t: (0, 0))
    b_spec = pl.BlockSpec((1, Gp), lambda b, t: (0, 0))
    o_spec = pl.BlockSpec((tt, bblk, Gp), lambda b, t: (t, b, 0))

    if scale is None:
        kernel = _proj_kernel
        in_specs = [x_spec, w_spec, b_spec]
        args = (x, w, bias)
    else:
        kernel = _proj_norm_kernel
        s_spec = pl.BlockSpec((bblk, Cp), lambda b, t: (b, 0))
        in_specs = [x_spec, s_spec, s_spec, w_spec, b_spec]
        args = (x, scale, shift, w, bias)

    return pl.pallas_call(
        kernel,
        out_shape=jax.ShapeDtypeStruct((Tp, Bp, Gp), out_dtype),
        grid_spec=pltpu.PrefetchScalarGridSpec(
            num_scalar_prefetch=0,
            grid=(nb, nt),
            in_specs=in_specs,
            out_specs=o_spec,
        ),
        compiler_params=pltpu.CompilerParams(
            dimension_semantics=("parallel", "parallel"),
            vmem_limit_bytes=VMEM_LIMIT,
        ),
    )(*args)


# ---------------------------------------------------------------------------
# Kernel 2: LSTM recurrence.  g = x @ W_ih + b is precomputed; each grid step
# covers TT_REC time steps (statically unrolled).  h/c live in VMEM scratch in
# f32; gLN sum / sum-of-squares are accumulated locally over the unroll and
# flushed once per block into resident accumulator outputs.  Gate order i,f,g,o.
# ---------------------------------------------------------------------------
def _lstm_rec_kernel(g_ref, w_hh_ref, h_ref, sum_ref, sq_ref, h_scr, c_scr,
                     *, tt, t_real, hp):
    tb = pl.program_id(1)                       # time-block index ("arbitrary" axis)

    @pl.when(tb == 0)
    def _():
        h_scr[...] = jnp.zeros(h_scr.shape, h_scr.dtype)
        c_scr[...] = jnp.zeros(c_scr.shape, c_scr.dtype)
        sum_ref[...] = jnp.zeros(sum_ref.shape, sum_ref.dtype)
        sq_ref[...] = jnp.zeros(sq_ref.shape, sq_ref.dtype)

    # TODO(synk): hold W_hh in MXU weight registers across the unroll via
    # pltpu.matmul_push_rhs / matmul_acc_lhs / matmul_pop; the large batch block
    # already amortizes the per-step weight feed substantially.
    w_hh = w_hh_ref[...]                        # (hp, 4*hp) bf16, loaded once per block

    h = h_scr[...]
    c = c_scr[...]
    s_acc = jnp.zeros(sum_ref.shape, jnp.float32)
    q_acc = jnp.zeros(sq_ref.shape, jnp.float32)

    for it in range(tt):                        # static unroll over the time block
        # dense leading-dim read: (bblk, 4*hp)
        gates = (g_ref[it].astype(jnp.float32)
                 + jnp.dot(h.astype(MATMUL_DTYPE), w_hh,
                           preferred_element_type=jnp.float32))
        # each gate occupies its own 128-aligned lane slot -> aligned slices
        i_g = jax.nn.sigmoid(gates[:, 0 * hp:1 * hp])
        f_g = jax.nn.sigmoid(gates[:, 1 * hp:2 * hp])
        g_g = jnp.tanh(gates[:, 2 * hp:3 * hp])
        o_g = jax.nn.sigmoid(gates[:, 3 * hp:4 * hp])

        c = f_g * c + i_g * g_g
        h = o_g * jnp.tanh(c)

        h_ref[it] = h.astype(h_ref.dtype)       # dense, unmasked store (full sublanes)

        # gLN statistics, masking padded time steps (padded channels are exactly 0)
        valid = (tb * tt + it < t_real).astype(jnp.float32)
        s_acc = s_acc + valid * h
        q_acc = q_acc + valid * (h * h)

    h_scr[...] = h
    c_scr[...] = c
    sum_ref[...] += s_acc                        # one RMW per block, not per step
    sq_ref[...] += q_acc


def _lstm_recurrence(g, w_hh, *, hp, bblk, t_real):
    """g: [Tp, Bp, 4*hp] bf16 ; w_hh: [hp, 4*hp] bf16 -> (h [Tp,Bp,hp] bf16, sum, sumsq)."""
    Tp, Bp, g4 = g.shape
    nb, nt = Bp // bblk, Tp // TT_REC
    kernel = partial(_lstm_rec_kernel, tt=TT_REC, t_real=t_real, hp=hp)

    return pl.pallas_call(
        kernel,
        out_shape=(
            jax.ShapeDtypeStruct((Tp, Bp, hp), SEQ_DTYPE),     # hidden sequence (bf16)
            jax.ShapeDtypeStruct((Bp, hp), jnp.float32),       # per-(b, c) sum over t
            jax.ShapeDtypeStruct((Bp, hp), jnp.float32),       # per-(b, c) sum of squares
        ),
        grid_spec=pltpu.PrefetchScalarGridSpec(
            num_scalar_prefetch=0,
            grid=(nb, nt),
            in_specs=[
                pl.BlockSpec((TT_REC, bblk, g4), lambda b, t: (t, b, 0)),
                pl.BlockSpec((hp, g4), lambda b, t: (0, 0)),
            ],
            out_specs=[
                pl.BlockSpec((TT_REC, bblk, hp), lambda b, t: (t, b, 0)),
                pl.BlockSpec((bblk, hp), lambda b, t: (b, 0)),  # resident accumulators
                pl.BlockSpec((bblk, hp), lambda b, t: (b, 0)),
            ],
            scratch_shapes=[
                pltpu.VMEM((bblk, hp), jnp.float32),            # h_t (f32 carry)
                pltpu.VMEM((bblk, hp), jnp.float32),            # c_t (f32 carry)
            ],
        ),
        compiler_params=pltpu.CompilerParams(
            dimension_semantics=("parallel", "arbitrary"),      # batch parallel, time serial
            vmem_limit_bytes=VMEM_LIMIT,
        ),
    )(g, w_hh)


# ---------------------------------------------------------------------------
# gLN: turn the in-kernel (sum, sumsq) statistics into a per-(batch, channel)
# affine scale/shift that the next GEMM kernel applies.  Tiny O(B*H) JAX ops.
# ---------------------------------------------------------------------------
def _gln_affine(sum_c, sq_c, gamma, beta, t_real, hp):
    c_real = gamma.shape[0]
    n = float(t_real * c_real)
    s = jnp.sum(sum_c, axis=1)                      # padded channels contribute exact 0
    ss = jnp.sum(sq_c, axis=1)
    mean = s / n
    var = jnp.maximum(ss / n - mean * mean, 0.0)
    inv = jax.lax.rsqrt(var + 1e-7)
    gamma_p = jnp.zeros((hp,), jnp.float32).at[:c_real].set(gamma)
    beta_p = jnp.zeros((hp,), jnp.float32).at[:c_real].set(beta)
    scale = inv[:, None] * gamma_p[None, :]         # [Bp, hp]
    shift = beta_p[None, :] - mean[:, None] * scale
    return scale, shift


# ---------------------------------------------------------------------------
# Parameter init (PyTorch-style uniform bounds; gamma=1, beta=0).  Weights are
# stored pre-padded: 128-aligned per-gate column slots, bf16 for MXU operands.
# ---------------------------------------------------------------------------
def _pad_gates(w, hp):
    """[C, 4*H] -> [C, 4*hp]: each gate (i,f,g,o) block starts at a 128-aligned column."""
    c, four_h = w.shape
    h = four_h // 4
    out = jnp.zeros((c, 4 * hp), w.dtype)
    for g in range(4):
        out = out.at[:, g * hp:g * hp + h].set(w[:, g * h:(g + 1) * h])
    return out


def _pad_rows(w, rows):
    return jnp.pad(w, ((0, rows - w.shape[0]), (0, 0)))


def init_params(key, input_size, output_size, hidden):
    H1, H2 = hidden
    Dp = _rup(input_size, LANE)
    Hp1 = _rup(H1, LANE)
    Hp2 = _rup(H2, LANE)
    Op = _rup(output_size, LANE)

    ks = jax.random.split(key, 10)

    def u(k, shape, bound):
        return jax.random.uniform(k, shape, jnp.float32, -bound, bound)

    k1 = 1.0 / math.sqrt(H1)
    k2 = 1.0 / math.sqrt(H2)

    # LSTM 1: input_size -> H1 (weights stored transposed [in, 4H], gate order i,f,g,o)
    w_ih1 = _pad_rows(_pad_gates(u(ks[0], (input_size, 4 * H1), k1), Hp1), Dp)
    w_hh1 = _pad_rows(_pad_gates(u(ks[1], (H1, 4 * H1), k1), Hp1), Hp1)
    b1 = _pad_gates(u(ks[2], (1, 4 * H1), k1) + u(ks[3], (1, 4 * H1), k1), Hp1)

    # LSTM 2: H1 -> H2
    w_ih2 = _pad_rows(_pad_gates(u(ks[4], (H1, 4 * H2), k2), Hp2), Hp1)
    w_hh2 = _pad_rows(_pad_gates(u(ks[5], (H2, 4 * H2), k2), Hp2), Hp2)
    b2 = _pad_gates(u(ks[6], (1, 4 * H2), k2) + u(ks[7], (1, 4 * H2), k2), Hp2)

    # Linear: H2 -> output_size
    w_lin = _pad_rows(jnp.pad(u(ks[8], (H2, output_size), k2),
                              ((0, 0), (0, Op - output_size))), Hp2)
    b_lin = jnp.pad(u(ks[9], (1, output_size), k2), ((0, 0), (0, Op - output_size)))

    return dict(
        w_ih1=w_ih1.astype(MATMUL_DTYPE), w_hh1=w_hh1.astype(MATMUL_DTYPE), b1=b1,
        gamma1=jnp.ones((H1,), jnp.float32), beta1=jnp.zeros((H1,), jnp.float32),
        w_ih2=w_ih2.astype(MATMUL_DTYPE), w_hh2=w_hh2.astype(MATMUL_DTYPE), b2=b2,
        gamma2=jnp.ones((H2,), jnp.float32), beta2=jnp.zeros((H2,), jnp.float32),
        w_lin=w_lin.astype(MATMUL_DTYPE), b_lin=b_lin,
    )


# ---------------------------------------------------------------------------
# Forward:  proj1 -> LSTM1(+gLN1 stats) -> [gLN1 fused] proj2 -> LSTM2(+gLN2 stats)
#           -> [gLN2 fused] Linear.      (no dropout, no activation: module defaults)
# All inter-kernel sequences are time-major [Tp, Bp, C]; only the model input and
# the final output are transposed (small, done by XLA).
# ---------------------------------------------------------------------------
@partial(jax.jit, static_argnums=(2,))
def blstm2_fc1_forward(x, params, output_size):
    B, T, D = x.shape
    Dp = params["w_ih1"].shape[0]
    Hp1 = params["w_hh1"].shape[0]
    Hp2 = params["w_hh2"].shape[0]
    G1 = params["w_ih1"].shape[1]
    G2 = params["w_ih2"].shape[1]
    Op = params["w_lin"].shape[1]

    bblk, Bp = _choose_bblk(B)
    Tp = _rup(T, TT_REC)

    # time-major, padded input: [Tp, Bp, Dp]
    x_tm = jnp.transpose(x.astype(jnp.float32), (1, 0, 2))
    x_tm = jnp.pad(x_tm, ((0, Tp - T), (0, Bp - B), (0, Dp - D)))

    # Layer 1: hoisted input GEMM over the whole sequence, then the recurrence.
    tt1 = _choose_tt_proj(Tp, bblk, 4 * Dp + 2 * G1)
    g1 = _project(x_tm, params["w_ih1"], params["b1"],
                  bblk=bblk, tt=tt1, out_dtype=SEQ_DTYPE)
    h1, s1, q1 = _lstm_recurrence(g1, params["w_hh1"], hp=Hp1, bblk=bblk, t_real=T)
    scale1, shift1 = _gln_affine(s1, q1, params["gamma1"], params["beta1"], T, Hp1)

    # Layer 2: gLN1 fused into its input projection GEMM.
    tt2 = _choose_tt_proj(Tp, bblk, 2 * Hp1 + 2 * G2)
    g2 = _project(h1, params["w_ih2"], params["b2"], scale1, shift1,
                  bblk=bblk, tt=tt2, out_dtype=SEQ_DTYPE)
    h2, s2, q2 = _lstm_recurrence(g2, params["w_hh2"], hp=Hp2, bblk=bblk, t_real=T)
    scale2, shift2 = _gln_affine(s2, q2, params["gamma2"], params["beta2"], T, Hp2)

    # Final Linear with gLN2 fused (output stays f32).
    tt3 = _choose_tt_proj(Tp, bblk, 2 * Hp2 + 4 * Op)
    y_tm = _project(h2, params["w_lin"], params["b_lin"], scale2, shift2,
                    bblk=bblk, tt=tt3, out_dtype=jnp.float32)

    return jnp.transpose(y_tm, (1, 0, 2))[:B, :T, :output_size]


if __name__ == "__main__":
    B, T = 2, 8
    input_size, output_size = 16, 8
    hidden = (32, 16)

    key = jax.random.PRNGKey(0)
    k_x, k_p = jax.random.split(key)
    params = init_params(k_p, input_size, output_size, hidden)
    x = jax.random.normal(k_x, (B, T, input_size), jnp.float32)

    y = blstm2_fc1_forward(x, params, output_size)
    y = jax.block_until_ready(y)

    assert y.shape == (B, T, output_size), y.shape
    assert bool(jnp.all(jnp.isfinite(y)))
    print("KERNEL_OK")
</pallas_src>

<mosaic_0001>
module attributes {stable_mosaic.version = 11 : i64} {
  func.func @_proj_kernel(%arg0: i32, %arg1: i32, %arg2: memref<8x8x128xf32, #tpu.memory_space<vmem>>, %arg3: memref<128x512xbf16, #tpu.memory_space<vmem>>, %arg4: memref<1x512xf32, #tpu.memory_space<vmem>>, %arg5: memref<8x8x512xbf16, #tpu.memory_space<vmem>>) attributes {dimension_semantics = [#tpu.dimension_semantics<parallel>, #tpu.dimension_semantics<parallel>], iteration_bounds = array<i64: 1, 1>, scalar_prefetch = 0 : i64, scratch_operands = 0 : i64, tpu.core_type = #tpu.core_type<tc>, window_params = [{transform_indices = @transform_0, window_bounds = array<i64: 8, 8, 128>}, {pipeline_mode = #tpu.pipeline_mode<synchronous>, transform_indices = @transform_1, window_bounds = array<i64: 128, 512>}, {pipeline_mode = #tpu.pipeline_mode<synchronous>, transform_indices = @transform_2, window_bounds = array<i64: 1, 512>}, {transform_indices = @transform_3, window_bounds = array<i64: 8, 8, 512>}]} {
    %c0 = arith.constant 0 : index
    %c0_0 = arith.constant 0 : index
    %c0_1 = arith.constant 0 : index
    %0 = vector.load %arg2[%c0, %c0_0, %c0_1] : memref<8x8x128xf32, #tpu.memory_space<vmem>>, vector<8x8x128xf32>
    %1 = vector.shape_cast %0 : vector<8x8x128xf32> to vector<64x128xf32>
    %2 = arith.truncf %1 : vector<64x128xf32> to vector<64x128xbf16>
    %c0_2 = arith.constant 0 : index
    %c0_3 = arith.constant 0 : index
    %3 = vector.load %arg3[%c0_2, %c0_3] : memref<128x512xbf16, #tpu.memory_space<vmem>>, vector<128x512xbf16>
    %cst = arith.constant dense<0.000000e+00> : vector<64x512xf32>
    %4 = tpu.matmul %2, %3, %cst {dimension_numbers = #tpu.dot_dimension_numbers<[1], [0], [0], [1], [0, 0, 1, 1], [], []>} : vector<64x128xbf16>, vector<128x512xbf16>, vector<64x512xf32> -> vector<64x512xf32>
    %c0_4 = arith.constant 0 : index
    %c0_5 = arith.constant 0 : index
    %5 = vector.load %arg4[%c0_4, %c0_5] : memref<1x512xf32, #tpu.memory_space<vmem>>, vector<1x512xf32>
    %6 = vector.broadcast %5 : vector<1x512xf32> to vector<64x512xf32>
    %7 = arith.addf %4, %6 : vector<64x512xf32>
    %8 = vector.shape_cast %7 : vector<64x512xf32> to vector<8x8x512xf32>
    %9 = arith.truncf %8 : vector<8x8x512xf32> to vector<8x8x512xbf16>
    %c0_6 = arith.constant 0 : index
    %c0_7 = arith.constant 0 : index
    %c0_8 = arith.constant 0 : index
    %10 = vector.load %arg5[%c0_6, %c0_7, %c0_8] : memref<8x8x512xbf16, #tpu.memory_space<vmem>>, vector<8x8x512xbf16>
    tpu.vector_store %arg5[%c0_6, %c0_7, %c0_8], %9 {strides = array<i32>} : memref<8x8x512xbf16, #tpu.memory_space<vmem>>, vector<8x8x512xbf16>,
    return
  }
  func.func @transform_0(%arg0: i32, %arg1: i32) -> (i32, i32, i32) {
    %c0_i32 = arith.constant 0 : i32
    %c0_i32_0 = arith.constant 0 : i32
    return %arg1, %arg0, %c0_i32 : i32, i32, i32
  }
  func.func @transform_1(%arg0: i32, %arg1: i32) -> (i32, i32) {
    %c0_i32 = arith.constant 0 : i32
    %c0_i32_0 = arith.constant 0 : i32
    %c0_i32_1 = arith.constant 0 : i32
    return %c0_i32, %c0_i32_0 : i32, i32
  }
  func.func @transform_2(%arg0: i32, %arg1: i32) -> (i32, i32) {
    %c0_i32 = arith.constant 0 : i32
    %c0_i32_0 = arith.constant 0 : i32
    %c0_i32_1 = arith.constant 0 : i32
    return %c0_i32, %c0_i32_0 : i32, i32
  }
  func.func @transform_3(%arg0: i32, %arg1: i32) -> (i32, i32, i32) {
    %c0_i32 = arith.constant 0 : i32
    %c0_i32_0 = arith.constant 0 : i32
    return %arg1, %arg0, %c0_i32 : i32, i32, i32
  }
}

module attributes {stable_mosaic.version = 11 : i64} {
  func.func @_lstm_rec_kernel(%arg0: i32, %arg1: i32, %arg2: memref<8x8x512xbf16, #tpu.memory_space<vmem>>, %arg3: memref<128x512xbf16, #tpu.memory_space<vmem>>, %arg4: memref<8x8x128xbf16, #tpu.memory_space<vmem>>, %arg5: memref<8x128xf32, #tpu.memory_space<vmem>>, %arg6: memref<8x128xf32, #tpu.memory_space<vmem>>, %arg7: memref<8x128xf32, #tpu.memory_space<vmem>>, %arg8: memref<8x128xf32, #tpu.memory_space<vmem>>) attributes {dimension_semantics = [#tpu.dimension_semantics<parallel>, #tpu.dimension_semantics<arbitrary>], iteration_bounds = array<i64: 1, 1>, scalar_prefetch = 0 : i64, scratch_operands = 2 : i64, tpu.core_type = #tpu.core_type<tc>, window_params = [{transform_indices = @transform_0, window_bounds = array<i64: 8, 8, 512>}, {pipeline_mode = #tpu.pipeline_mode<synchronous>, transform_indices = @transform_1, window_bounds = array<i64: 128, 512>}, {transform_indices = @transform_2, window_bounds = array<i64: 8, 8, 128>}, {transform_indices = @transform_3, window_bounds = array<i64: 8, 128>}, {transform_indices = @transform_4, window_bounds = array<i64: 8, 128>}]} {
    %c0_i32 = arith.constant 0 : i32
    %0 = arith.cmpi eq, %arg1, %c0_i32 : i32
    %1 = arith.extui %0 : i1 to i32
    %c0_i32_0 = arith.constant 0 : i32
    %2 = arith.cmpi ne, %1, %c0_i32_0 : i32
    scf.if %2 {
      %cst_108 = arith.constant 0.000000e+00 : f32
      %392 = vector.broadcast %cst_108 : f32 to vector<8x128xf32>
      %c0_109 = arith.constant 0 : index
      %c0_110 = arith.constant 0 : index
      %393 = vector.load %arg7[%c0_109, %c0_110] : memref<8x128xf32, #tpu.memory_space<vmem>>, vector<8x128xf32>
      tpu.vector_store %arg7[%c0_109, %c0_110], %392 {strides = array<i32>} : memref<8x128xf32, #tpu.memory_space<vmem>>, vector<8x128xf32>,
      %cst_111 = arith.constant 0.000000e+00 : f32
      %394 = vector.broadcast %cst_111 : f32 to vector<8x128xf32>
      %c0_112 = arith.constant 0 : index
      %c0_113 = arith.constant 0 : index
      %395 = vector.load %arg8[%c0_112, %c0_113] : memref<8x128xf32, #tpu.memory_space<vmem>>, vector<8x128xf32>
      tpu.vector_store %arg8[%c0_112, %c0_113], %394 {strides = array<i32>} : memref<8x128xf32, #tpu.memory_space<vmem>>, vector<8x128xf32>,
      %cst_114 = arith.constant 0.000000e+00 : f32
      %396 = vector.broadcast %cst_114 : f32 to vector<8x128xf32>
      %c0_115 = arith.constant 0 : index
      %c0_116 = arith.constant 0 : index
      %397 = vector.load %arg5[%c0_115, %c0_116] : memref<8x128xf32, #tpu.memory_space<vmem>>, vector<8x128xf32>
      tpu.vector_store %arg5[%c0_115, %c0_116], %396 {strides = array<i32>} : memref<8x128xf32, #tpu.memory_space<vmem>>, vector<8x128xf32>,
      %cst_117 = arith.constant 0.000000e+00 : f32
      %398 = vector.broadcast %cst_117 : f32 to vector<8x128xf32>
      %c0_118 = arith.constant 0 : index
      %c0_119 = arith.constant 0 : index
      %399 = vector.load %arg6[%c0_118, %c0_119] : memref<8x128xf32, #tpu.memory_space<vmem>>, vector<8x128xf32>
      tpu.vector_store %arg6[%c0_118, %c0_119], %398 {strides = array<i32>} : memref<8x128xf32, #tpu.memory_space<vmem>>, vector<8x128xf32>,
    } else {
    }
    %c0 = arith.constant 0 : index
    %c0_1 = arith.constant 0 : index
    %3 = vector.load %arg3[%c0, %c0_1] : memref<128x512xbf16, #tpu.memory_space<vmem>>, vector<128x512xbf16>
    %c0_2 = arith.constant 0 : index
    %c0_3 = arith.constant 0 : index
    %4 = vector.load %arg7[%c0_2, %c0_3] : memref<8x128xf32, #tpu.memory_space<vmem>>, vector<8x128xf32>
    %c0_4 = arith.constant 0 : index
    %c0_5 = arith.constant 0 : index
    %5 = vector.load %arg8[%c0_4, %c0_5] : memref<8x128xf32, #tpu.memory_space<vmem>>, vector<8x128xf32>
    %cst = arith.constant 0.000000e+00 : f32
    %6 = vector.broadcast %cst : f32 to vector<8x128xf32>
    %cst_6 = arith.constant 0.000000e+00 : f32
    %7 = vector.broadcast %cst_6 : f32 to vector<8x128xf32>
    %c0_7 = arith.constant 0 : index
    %c0_8 = arith.constant 0 : index
    %c0_9 = arith.constant 0 : index
    %8 = vector.load %arg2[%c0_7, %c0_8, %c0_9] : memref<8x8x512xbf16, #tpu.memory_space<vmem>>, vector<1x8x512xbf16>
    %9 = vector.shape_cast %8 : vector<1x8x512xbf16> to vector<8x512xbf16>
    %10 = arith.extf %9 : vector<8x512xbf16> to vector<8x512xf32>
    %11 = arith.truncf %4 : vector<8x128xf32> to vector<8x128xbf16>
    %cst_10 = arith.constant dense<0.000000e+00> : vector<8x512xf32>
    %12 = tpu.matmul %11, %3, %cst_10 {dimension_numbers = #tpu.dot_dimension_numbers<[1], [0], [0], [1], [0, 0, 1, 1], [], []>} : vector<8x128xbf16>, vector<128x512xbf16>, vector<8x512xf32> -> vector<8x512xf32>
    %13 = arith.addf %10, %12 : vector<8x512xf32>
    %14 = vector.extract_strided_slice %13 {offsets = [0, 0], sizes = [8, 128], strides = [1, 1]} : vector<8x512xf32> to vector<8x128xf32>
    %15 = arith.negf %14 : vector<8x128xf32>
    %16 = math.exp %15 : vector<8x128xf32>
    %cst_11 = arith.constant 1.000000e+00 : f32
    %17 = vector.broadcast %cst_11 : f32 to vector<8x128xf32>
    %18 = arith.addf %17, %16 : vector<8x128xf32>
    %19 = arith.divf %17, %18 : vector<8x128xf32>
    %20 = vector.extract_strided_slice %13 {offsets = [0, 128], sizes = [8, 128], strides = [1, 1]} : vector<8x512xf32> to vector<8x128xf32>
    %21 = arith.negf %20 : vector<8x128xf32>
    %22 = math.exp %21 : vector<8x128xf32>
    %cst_12 = arith.constant 1.000000e+00 : f32
    %23 = vector.broadcast %cst_12 : f32 to vector<8x128xf32>
    %24 = arith.addf %23, %22 : vector<8x128xf32>
    %25 = arith.divf %23, %24 : vector<8x128xf32>
    %26 = vector.extract_strided_slice %13 {offsets = [0, 256], sizes = [8, 128], strides = [1, 1]} : vector<8x512xf32> to vector<8x128xf32>
    %27 = math.tanh %26 : vector<8x128xf32>
    %28 = vector.extract_strided_slice %13 {offsets = [0, 384], sizes = [8, 128], strides = [1, 1]} : vector<8x512xf32> to vector<8x128xf32>
    %29 = arith.negf %28 : vector<8x128xf32>
    %30 = math.exp %29 : vector<8x128xf32>
    %cst_13 = arith.constant 1.000000e+00 : f32
    %31 = vector.broadcast %cst_13 : f32 to vector<8x128xf32>
    %32 = arith.addf %31, %30 : vector<8x128xf32>
    %33 = arith.divf %31, %32 : vector<8x128xf32>
    %34 = arith.mulf %25, %5 : vector<8x128xf32>
    %35 = arith.mulf %19, %27 : vector<8x128xf32>
    %36 = arith.addf %34, %35 : vector<8x128xf32>
    %37 = math.tanh %36 : vector<8x128xf32>
    %38 = arith.mulf %33, %37 : vector<8x128xf32>
    %39 = arith.truncf %38 : vector<8x128xf32> to vector<8x128xbf16>
    %c0_14 = arith.constant 0 : index
    %c0_15 = arith.constant 0 : index
    %c0_16 = arith.constant 0 : index
    %40 = vector.load %arg4[%c0_14, %c0_15, %c0_16] : memref<8x8x128xbf16, #tpu.memory_space<vmem>>, vector<1x8x128xbf16>
    %41 = vector.shape_cast %40 : vector<1x8x128xbf16> to vector<8x128xbf16>
    %42 = vector.shape_cast %39 : vector<8x128xbf16> to vector<1x8x128xbf16>
    tpu.vector_store %arg4[%c0_14, %c0_15, %c0_16], %42 {strides = array<i32>} : memref<8x8x128xbf16, #tpu.memory_space<vmem>>, vector<1x8x128xbf16>,
    %c8_i32 = arith.constant 8 : i32
    %43 = arith.muli %arg1, %c8_i32 : i32
    %c0_i32_17 = arith.constant 0 : i32
    %44 = arith.addi %43, %c0_i32_17 : i32
    %c8_i32_18 = arith.constant 8 : i32
    %45 = arith.cmpi slt, %44, %c8_i32_18 : i32
    %46 = arith.extui %45 : i1 to i32
    %47 = arith.sitofp %46 : i32 to f32
    %48 = vector.broadcast %47 : f32 to vector<8x128xf32>
    %49 = arith.mulf %48, %38 : vector<8x128xf32>
    %50 = arith.addf %6, %49 : vector<8x128xf32>
    %51 = arith.mulf %38, %38 : vector<8x128xf32>
    %52 = vector.broadcast %47 : f32 to vector<8x128xf32>
    %53 = arith.mulf %52, %51 : vector<8x128xf32>
    %54 = arith.addf %7, %53 : vector<8x128xf32>
    %c1 = arith.constant 1 : index
    %c0_19 = arith.constant 0 : index
    %c0_20 = arith.constant 0 : index
    %55 = vector.load %arg2[%c1, %c0_19, %c0_20] : memref<8x8x512xbf16, #tpu.memory_space<vmem>>, vector<1x8x512xbf16>
    %56 = vector.shape_cast %55 : vector<1x8x512xbf16> to vector<8x512xbf16>
    %57 = arith.extf %56 : vector<8x512xbf16> to vector<8x512xf32>
    %58 = arith.truncf %38 : vector<8x128xf32> to vector<8x128xbf16>
    %cst_21 = arith.constant dense<0.000000e+00> : vector<8x512xf32>
    %59 = tpu.matmul %58, %3, %cst_21 {dimension_numbers = #tpu.dot_dimension_numbers<[1], [0], [0], [1], [0, 0, 1, 1], [], []>} : vector<8x128xbf16>, vector<128x512xbf16>, vector<8x512xf32> -> vector<8x512xf32>
    %60 = arith.addf %57, %59 : vector<8x512xf32>
    %61 = vector.extract_strided_slice %60 {offsets = [0, 0], sizes = [8, 128], strides = [1, 1]} : vector<8x512xf32> to vector<8x128xf32>
    %62 = arith.negf %61 : vector<8x128xf32>
    %63 = math.exp %62 : vector<8x128xf32>
    %cst_22 = arith.constant 1.000000e+00 : f32
    %64 = vector.broadcast %cst_22 : f32 to vector<8x128xf32>
    %65 = arith.addf %64, %63 : vector<8x128xf32>
    %66 = arith.divf %64, %65 : vector<8x128xf32>
    %67 = vector.extract_strided_slice %60 {offsets = [0, 128], sizes = [8, 128], strides = [1, 1]} : vector<8x512xf32> to vector<8x128xf32>
    %68 = arith.negf %67 : vector<8x128xf32>
    %69 = math.exp %68 : vector<8x128xf32>
    %cst_23 = arith.constant 1.000000e+00 : f32
    %70 = vector.broadcast %cst_23 : f32 to vector<8x128xf32>
    %71 = arith.addf %70, %69 : vector<8x128xf32>
    %72 = arith.divf %70, %71 : vector<8x128xf32>
    %73 = vector.extract_strided_slice %60 {offsets = [0, 256], sizes = [8, 128], strides = [1, 1]} : vector<8x512xf32> to vector<8x128xf32>
    %74 = math.tanh %73 : vector<8x128xf32>
    %75 = vector.extract_strided_slice %60 {offsets = [0, 384], sizes = [8, 128], strides = [1, 1]} : vector<8x512xf32> to vector<8x128xf32>
    %76 = arith.negf %75 : vector<8x128xf32>
    %77 = math.exp %76 : vector<8x128xf32>
    %cst_24 = arith.constant 1.000000e+00 : f32
    %78 = vector.broadcast %cst_24 : f32 to vector<8x128xf32>
    %79 = arith.addf %78, %77 : vector<8x128xf32>
    %80 = arith.divf %78, %79 : vector<8x128xf32>
    %81 = arith.mulf %72, %36 : vector<8x128xf32>
    %82 = arith.mulf %66, %74 : vector<8x128xf32>
    %83 = arith.addf %81, %82 : vector<8x128xf32>
    %84 = math.tanh %83 : vector<8x128xf32>
    %85 = arith.mulf %80, %84 : vector<8x128xf32>
    %86 = arith.truncf %85 : vector<8x128xf32> to vector<8x128xbf16>
    %c1_25 = arith.constant 1 : index
    %c0_26 = arith.constant 0 : index
    %c0_27 = arith.constant 0 : index
    %87 = vector.load %arg4[%c1_25, %c0_26, %c0_27] : memref<8x8x128xbf16, #tpu.memory_space<vmem>>, vector<1x8x128xbf16>
    %88 = vector.shape_cast %87 : vector<1x8x128xbf16> to vector<8x128xbf16>
    %89 = vector.shape_cast %86 : vector<8x128xbf16> to vector<1x8x128xbf16>
    tpu.vector_store %arg4[%c1_25, %c0_26, %c0_27], %89 {strides = array<i32>} : memref<8x8x128xbf16, #tpu.memory_space<vmem>>, vector<1x8x128xbf16>,
    %c8_i32_28 = arith.constant 8 : i32
    %90 = arith.muli %arg1, %c8_i32_28 : i32
    %c1_i32 = arith.constant 1 : i32
    %91 = arith.addi %90, %c1_i32 : i32
    %c8_i32_29 = arith.constant 8 : i32
    %92 = arith.cmpi slt, %91, %c8_i32_29 : i32
    %93 = arith.extui %92 : i1 to i32
    %94 = arith.sitofp %93 : i32 to f32
    %95 = vector.broadcast %94 : f32 to vector<8x128xf32>
    %96 = arith.mulf %95, %85 : vector<8x128xf32>
    %97 = arith.addf %50, %96 : vector<8x128xf32>
    %98 = arith.mulf %85, %85 : vector<8x128xf32>
    %99 = vector.broadcast %94 : f32 to vector<8x128xf32>
    %100 = arith.mulf %99, %98 : vector<8x128xf32>
    %101 = arith.addf %54, %100 : vector<8x128xf32>
    %c2 = arith.constant 2 : index
    %c0_30 = arith.constant 0 : index
    %c0_31 = arith.constant 0 : index
    %102 = vector.load %arg2[%c2, %c0_30, %c0_31] : memref<8x8x512xbf16, #tpu.memory_space<vmem>>, vector<1x8x512xbf16>
    %103 = vector.shape_cast %102 : vector<1x8x512xbf16> to vector<8x512xbf16>
    %104 = arith.extf %103 : vector<8x512xbf16> to vector<8x512xf32>
    %105 = arith.truncf %85 : vector<8x128xf32> to vector<8x128xbf16>
    %cst_32 = arith.constant dense<0.000000e+00> : vector<8x512xf32>
    %106 = tpu.matmul %105, %3, %cst_32 {dimension_numbers = #tpu.dot_dimension_numbers<[1], [0], [0], [1], [0, 0, 1, 1], [], []>} : vector<8x128xbf16>, vector<128x512xbf16>, vector<8x512xf32> -> vector<8x512xf32>
    %107 = arith.addf %104, %106 : vector<8x512xf32>
    %108 = vector.extract_strided_slice %107 {offsets = [0, 0], sizes = [8, 128], strides = [1, 1]} : vector<8x512xf32> to vector<8x128xf32>
    %109 = arith.negf %108 : vector<8x128xf32>
    %110 = math.exp %109 : vector<8x128xf32>
    %cst_33 = arith.constant 1.000000e+00 : f32
    %111 = vector.broadcast %cst_33 : f32 to vector<8x128xf32>
    %112 = arith.addf %111, %110 : vector<8x128xf32>
    %113 = arith.divf %111, %112 : vector<8x128xf32>
    %114 = vector.extract_strided_slice %107 {offsets = [0, 128], sizes = [8, 128], strides = [1, 1]} : vector<8x512xf32> to vector<8x128xf32>
    %115 = arith.negf %114 : vector<8x128xf32>
    %116 = math.exp %115 : vector<8x128xf32>
    %cst_34 = arith.constant 1.000000e+00 : f32
    %117 = vector.broadcast %cst_34 : f32 to vector<8x128xf32>
    %118 = arith.addf %117, %116 : vector<8x128xf32>
    %119 = arith.divf %117, %118 : vector<8x128xf32>
    %120 = vector.extract_strided_slice %107 {offsets = [0, 256], sizes = [8, 128], strides = [1, 1]} : vector<8x512xf32> to vector<8x128xf32>
    %121 = math.tanh %120 : vector<8x128xf32>
    %122 = vector.extract_strided_slice %107 {offsets = [0, 384], sizes = [8, 128], strides = [1, 1]} : vector<8x512xf32> to vector<8x128xf32>
    %123 = arith.negf %122 : vector<8x128xf32>
    %124 = math.exp %123 : vector<8x128xf32>
    %cst_35 = arith.constant 1.000000e+00 : f32
    %125 = vector.broadcast %cst_35 : f32 to vector<8x128xf32>
    %126 = arith.addf %125, %124 : vector<8x128xf32>
    %127 = arith.divf %125, %126 : vector<8x128xf32>
    %128 = arith.mulf %119, %83 : vector<8x128xf32>
    %129 = arith.mulf %113, %121 : vector<8x128xf32>
    %130 = arith.addf %128, %129 : vector<8x128xf32>
    %131 = math.tanh %130 : vector<8x128xf32>
    %132 = arith.mulf %127, %131 : vector<8x128xf32>
    %133 = arith.truncf %132 : vector<8x128xf32> to vector<8x128xbf16>
    %c2_36 = arith.constant 2 : index
    %c0_37 = arith.constant 0 : index
    %c0_38 = arith.constant 0 : index
    %134 = vector.load %arg4[%c2_36, %c0_37, %c0_38] : memref<8x8x128xbf16, #tpu.memory_space<vmem>>, vector<1x8x128xbf16>
    %135 = vector.shape_cast %134 : vector<1x8x128xbf16> to vector<8x128xbf16>
    %136 = vector.shape_cast %133 : vector<8x128xbf16> to vector<1x8x128xbf16>
    tpu.vector_store %arg4[%c2_36, %c0_37, %c0_38], %136 {strides = array<i32>} : memref<8x8x128xbf16, #tpu.memory_space<vmem>>, vector<1x8x128xbf16>,
    %c8_i32_39 = arith.constant 8 : i32
    %137 = arith.muli %arg1, %c8_i32_39 : i32
    %c2_i32 = arith.constant 2 : i32
    %138 = arith.addi %137, %c2_i32 : i32
    %c8_i32_40 = arith.constant 8 : i32
    %139 = arith.cmpi slt, %138, %c8_i32_40 : i32
    %140 = arith.extui %139 : i1 to i32
    %141 = arith.sitofp %140 : i32 to f32
    %142 = vector.broadcast %141 : f32 to vector<8x128xf32>
    %143 = arith.mulf %142, %132 : vector<8x128xf32>
    %144 = arith.addf %97, %143 : vector<8x128xf32>
    %145 = arith.mulf %132, %132 : vector<8x128xf32>
    %146 = vector.broadcast %141 : f32 to vector<8x128xf32>
    %147 = arith.mulf %146, %145 : vector<8x128xf32>
    %148 = arith.addf %101, %147 : vector<8x128xf32>
    %c3 = arith.constant 3 : index
    %c0_41 = arith.constant 0 : index
    %c0_42 = arith.constant 0 : index
    %149 = vector.load %arg2[%c3, %c0_41, %c0_42] : memref<8x8x512xbf16, #tpu.memory_space<vmem>>, vector<1x8x512xbf16>
    %150 = vector.shape_cast %149 : vector<1x8x512xbf16> to vector<8x512xbf16>
    %151 = arith.extf %150 : vector<8x512xbf16> to vector<8x512xf32>
    %152 = arith.truncf %132 : vector<8x128xf32> to vector<8x128xbf16>
    %cst_43 = arith.constant dense<0.000000e+00> : vector<8x512xf32>
    %153 = tpu.matmul %152, %3, %cst_43 {dimension_numbers = #tpu.dot_dimension_numbers<[1], [0], [0], [1], [0, 0, 1, 1], [], []>} : vector<8x128xbf16>, vector<128x512xbf16>, vector<8x512xf32> -> vector<8x512xf32>
    %154 = arith.addf %151, %153 : vector<8x512xf32>
    %155 = vector.extract_strided_slice %154 {offsets = [0, 0], sizes = [8, 128], strides = [1, 1]} : vector<8x512xf32> to vector<8x128xf32>
    %156 = arith.negf %155 : vector<8x128xf32>
    %157 = math.exp %156 : vector<8x128xf32>
    %cst_44 = arith.constant 1.000000e+00 : f32
    %158 = vector.broadcast %cst_44 : f32 to vector<8x128xf32>
    %159 = arith.addf %158, %157 : vector<8x128xf32>
    %160 = arith.divf %158, %159 : vector<8x128xf32>
    %161 = vector.extract_strided_slice %154 {offsets = [0, 128], sizes = [8, 128], strides = [1, 1]} : vector<8x512xf32> to vector<8x128xf32>
    %162 = arith.negf %161 : vector<8x128xf32>
    %163 = math.exp %162 : vector<8x128xf32>
    %cst_45 = arith.constant 1.000000e+00 : f32
    %164 = vector.broadcast %cst_45 : f32 to vector<8x128xf32>
    %165 = arith.addf %164, %163 : vector<8x128xf32>
    %166 = arith.divf %164, %165 : vector<8x128xf32>
    %167 = vector.extract_strided_slice %154 {offsets = [0, 256], sizes = [8, 128], strides = [1, 1]} : vector<8x512xf32> to vector<8x128xf32>
    %168 = math.tanh %167 : vector<8x128xf32>
    %169 = vector.extract_strided_slice %154 {offsets = [0, 384], sizes = [8, 128], strides = [1, 1]} : vector<8x512xf32> to vector<8x128xf32>
    %170 = arith.negf %169 : vector<8x128xf32>
    %171 = math.exp %170 : vector<8x128xf32>
    %cst_46 = arith.constant 1.000000e+00 : f32
    %172 = vector.broadcast %cst_46 : f32 to vector<8x128xf32>
    %173 = arith.addf %172, %171 : vector<8x128xf32>
    %174 = arith.divf %172, %173 : vector<8x128xf32>
    %175 = arith.mulf %166, %130 : vector<8x128xf32>
    %176 = arith.mulf %160, %168 : vector<8x128xf32>
    %177 = arith.addf %175, %176 : vector<8x128xf32>
    %178 = math.tanh %177 : vector<8x128xf32>
    %179 = arith.mulf %174, %178 : vector<8x128xf32>
    %180 = arith.truncf %179 : vector<8x128xf32> to vector<8x128xbf16>
    %c3_47 = arith.constant 3 : index
    %c0_48 = arith.constant 0 : index
    %c0_49 = arith.constant 0 : index
    %181 = vector.load %arg4[%c3_47, %c0_48, %c0_49] : memref<8x8x128xbf16, #tpu.memory_space<vmem>>, vector<1x8x128xbf16>
    %182 = vector.shape_cast %181 : vector<1x8x128xbf16> to vector<8x128xbf16>
    %183 = vector.shape_cast %180 : vector<8x128xbf16> to vector<1x8x128xbf16>
    tpu.vector_store %arg4[%c3_47, %c0_48, %c0_49], %183 {strides = array<i32>} : memref<8x8x128xbf16, #tpu.memory_space<vmem>>, vector<1x8x128xbf16>,
    %c8_i32_50 = arith.constant 8 : i32
    %184 = arith.muli %arg1, %c8_i32_50 : i32
    %c3_i32 = arith.constant 3 : i32
    %185 = arith.addi %184, %c3_i32 : i32
    %c8_i32_51 = arith.constant 8 : i32
    %186 = arith.cmpi slt, %185, %c8_i32_51 : i32
    %187 = arith.extui %186 : i1 to i32
    %188 = arith.sitofp %187 : i32 to f32
    %189 = vector.broadcast %188 : f32 to vector<8x128xf32>
    %190 = arith.mulf %189, %179 : vector<8x128xf32>
    %191 = arith.addf %144, %190 : vector<8x128xf32>
    %192 = arith.mulf %179, %179 : vector<8x128xf32>
    %193 = vector.broadcast %188 : f32 to vector<8x128xf32>
    %194 = arith.mulf %193, %192 : vector<8x128xf32>
    %195 = arith.addf %148, %194 : vector<8x128xf32>
    %c4 = arith.constant 4 : index
    %c0_52 = arith.constant 0 : index
    %c0_53 = arith.constant 0 : index
    %196 = vector.load %arg2[%c4, %c0_52, %c0_53] : memref<8x8x512xbf16, #tpu.memory_space<vmem>>, vector<1x8x512xbf16>
    %197 = vector.shape_cast %196 : vector<1x8x512xbf16> to vector<8x512xbf16>
    %198 = arith.extf %197 : vector<8x512xbf16> to vector<8x512xf32>
    %199 = arith.truncf %179 : vector<8x128xf32> to vector<8x128xbf16>
    %cst_54 = arith.constant dense<0.000000e+00> : vector<8x512xf32>
    %200 = tpu.matmul %199, %3, %cst_54 {dimension_numbers = #tpu.dot_dimension_numbers<[1], [0], [0], [1], [0, 0, 1, 1], [], []>} : vector<8x128xbf16>, vector<128x512xbf16>, vector<8x512xf32> -> vector<8x512xf32>
    %201 = arith.addf %198, %200 : vector<8x512xf32>
    %202 = vector.extract_strided_slice %201 {offsets = [0, 0], sizes = [8, 128], strides = [1, 1]} : vector<8x512xf32> to vector<8x128xf32>
    %203 = arith.negf %202 : vector<8x128xf32>
    %204 = math.exp %203 : vector<8x128xf32>
    %cst_55 = arith.constant 1.000000e+00 : f32
    %205 = vector.broadcast %cst_55 : f32 to vector<8x128xf32>
    %206 = arith.addf %205, %204 : vector<8x128xf32>
    %207 = arith.divf %205, %206 : vector<8x128xf32>
    %208 = vector.extract_strided_slice %201 {offsets = [0, 128], sizes = [8, 128], strides = [1, 1]} : vector<8x512xf32> to vector<8x128xf32>
    %209 = arith.negf %208 : vector<8x128xf32>
    %210 = math.exp %209 : vector<8x128xf32>
    %cst_56 = arith.constant 1.000000e+00 : f32
    %211 = vector.broadcast %cst_56 : f32 to vector<8x128xf32>
    %212 = arith.addf %211, %210 : vector<8x128xf32>
    %213 = arith.divf %211, %212 : vector<8x128xf32>
    %214 = vector.extract_strided_slice %201 {offsets = [0, 256], sizes = [8, 128], strides = [1, 1]} : vector<8x512xf32> to vector<8x128xf32>
    %215 = math.tanh %214 : vector<8x128xf32>
    %216 = vector.extract_strided_slice %201 {offsets = [0, 384], sizes = [8, 128], strides = [1, 1]} : vector<8x512xf32> to vector<8x128xf32>
    %217 = arith.negf %216 : vector<8x128xf32>
    %218 = math.exp %217 : vector<8x128xf32>
    %cst_57 = arith.constant 1.000000e+00 : f32
    %219 = vector.broadcast %cst_57 : f32 to vector<8x128xf32>
    %220 = arith.addf %219, %218 : vector<8x128xf32>
    %221 = arith.divf %219, %220 : vector<8x128xf32>
    %222 = arith.mulf %213, %177 : vector<8x128xf32>
    %223 = arith.mulf %207, %215 : vector<8x128xf32>
    %224 = arith.addf %222, %223 : vector<8x128xf32>
    %225 = math.tanh %224 : vector<8x128xf32>
    %226 = arith.mulf %221, %225 : vector<8x128xf32>
    %227 = arith.truncf %226 : vector<8x128xf32> to vector<8x128xbf16>
    %c4_58 = arith.constant 4 : index
    %c0_59 = arith.constant 0 : index
    %c0_60 = arith.constant 0 : index
    %228 = vector.load %arg4[%c4_58, %c0_59, %c0_60] : memref<8x8x128xbf16, #tpu.memory_space<vmem>>, vector<1x8x128xbf16>
    %229 = vector.shape_cast %228 : vector<1x8x128xbf16> to vector<8x128xbf16>
    %230 = vector.shape_cast %227 : vector<8x128xbf16> to vector<1x8x128xbf16>
    tpu.vector_store %arg4[%c4_58, %c0_59, %c0_60], %230 {strides = array<i32>} : memref<8x8x128xbf16, #tpu.memory_space<vmem>>, vector<1x8x128xbf16>,
    %c8_i32_61 = arith.constant 8 : i32
    %231 = arith.muli %arg1, %c8_i32_61 : i32
    %c4_i32 = arith.constant 4 : i32
    %232 = arith.addi %231, %c4_i32 : i32
    %c8_i32_62 = arith.constant 8 : i32
    %233 = arith.cmpi slt, %232, %c8_i32_62 : i32
    %234 = arith.extui %233 : i1 to i32
    %235 = arith.sitofp %234 : i32 to f32
    %236 = vector.broadcast %235 : f32 to vector<8x128xf32>
    %237 = arith.mulf %236, %226 : vector<8x128xf32>
    %238 = arith.addf %191, %237 : vector<8x128xf32>
    %239 = arith.mulf %226, %226 : vector<8x128xf32>
    %240 = vector.broadcast %235 : f32 to vector<8x128xf32>
    %241 = arith.mulf %240, %239 : vector<8x128xf32>
    %242 = arith.addf %195, %241 : vector<8x128xf32>
    %c5 = arith.constant 5 : index
    %c0_63 = arith.constant 0 : index
    %c0_64 = arith.constant 0 : index
    %243 = vector.load %arg2[%c5, %c0_63, %c0_64] : memref<8x8x512xbf16, #tpu.memory_space<vmem>>, vector<1x8x512xbf16>
    %244 = vector.shape_cast %243 : vector<1x8x512xbf16> to vector<8x512xbf16>
    %245 = arith.extf %244 : vector<8x512xbf16> to vector<8x512xf32>
    %246 = arith.truncf %226 : vector<8x128xf32> to vector<8x128xbf16>
    %cst_65 = arith.constant dense<0.000000e+00> : vector<8x512xf32>
    %247 = tpu.matmul %246, %3, %cst_65 {dimension_numbers = #tpu.dot_dimension_numbers<[1], [0], [0], [1], [0, 0, 1, 1], [], []>} : vector<8x128xbf16>, vector<128x512xbf16>, vector<8x512xf32> -> vector<8x512xf32>
    %248 = arith.addf %245, %247 : vector<8x512xf32>
    %249 = vector.extract_strided_slice %248 {offsets = [0, 0], sizes = [8, 128], strides = [1, 1]} : vector<8x512xf32> to vector<8x128xf32>
    %250 = arith.negf %249 : vector<8x128xf32>
    %251 = math.exp %250 : vector<8x128xf32>
    %cst_66 = arith.constant 1.000000e+00 : f32
    %252 = vector.broadcast %cst_66 : f32 to vector<8x128xf32>
    %253 = arith.addf %252, %251 : vector<8x128xf32>
    %254 = arith.divf %252, %253 : vector<8x128xf32>
    %255 = vector.extract_strided_slice %248 {offsets = [0, 128], sizes = [8, 128], strides = [1, 1]} : vector<8x512xf32> to vector<8x128xf32>
    %256 = arith.negf %255 : vector<8x128xf32>
    %257 = math.exp %256 : vector<8x128xf32>
    %cst_67 = arith.constant 1.000000e+00 : f32
    %258 = vector.broadcast %cst_67 : f32 to vector<8x128xf32>
    %259 = arith.addf %258, %257 : vector<8x128xf32>
    %260 = arith.divf %258, %259 : vector<8x128xf32>
    %261 = vector.extract_strided_slice %248 {offsets = [0, 256], sizes = [8, 128], strides = [1, 1]} : vector<8x512xf32> to vector<8x128xf32>
    %262 = math.tanh %261 : vector<8x128xf32>
    %263 = vector.extract_strided_slice %248 {offsets = [0, 384], sizes = [8, 128], strides = [1, 1]} : vector<8x512xf32> to vector<8x128xf32>
    %264 = arith.negf %263 : vector<8x128xf32>
    %265 = math.exp %264 : vector<8x128xf32>
    %cst_68 = arith.constant 1.000000e+00 : f32
    %266 = vector.broadcast %cst_68 : f32 to vector<8x128xf32>
    %267 = arith.addf %266, %265 : vector<8x128xf32>
    %268 = arith.divf %266, %267 : vector<8x128xf32>
    %269 = arith.mulf %260, %224 : vector<8x128xf32>
    %270 = arith.mulf %254, %262 : vector<8x128xf32>
    %271 = arith.addf %269, %270 : vector<8x128xf32>
    %272 = math.tanh %271 : vector<8x128xf32>
    %273 = arith.mulf %268, %272 : vector<8x128xf32>
    %274 = arith.truncf %273 : vector<8x128xf32> to vector<8x128xbf16>
    %c5_69 = arith.constant 5 : index
    %c0_70 = arith.constant 0 : index
    %c0_71 = arith.constant 0 : index
    %275 = vector.load %arg4[%c5_69, %c0_70, %c0_71] : memref<8x8x128xbf16, #tpu.memory_space<vmem>>, vector<1x8x128xbf16>
    %276 = vector.shape_cast %275 : vector<1x8x128xbf16> to vector<8x128xbf16>
    %277 = vector.shape_cast %274 : vector<8x128xbf16> to vector<1x8x128xbf16>
    tpu.vector_store %arg4[%c5_69, %c0_70, %c0_71], %277 {strides = array<i32>} : memref<8x8x128xbf16, #tpu.memory_space<vmem>>, vector<1x8x128xbf16>,
    %c8_i32_72 = arith.constant 8 : i32
    %278 = arith.muli %arg1, %c8_i32_72 : i32
    %c5_i32 = arith.constant 5 : i32
    %279 = arith.addi %278, %c5_i32 : i32
    %c8_i32_73 = arith.constant 8 : i32
    %280 = arith.cmpi slt, %279, %c8_i32_73 : i32
    %281 = arith.extui %280 : i1 to i32
    %282 = arith.sitofp %281 : i32 to f32
    %283 = vector.broadcast %282 : f32 to vector<8x128xf32>
    %284 = arith.mulf %283, %273 : vector<8x128xf32>
    %285 = arith.addf %238, %284 : vector<8x128xf32>
    %286 = arith.mulf %273, %273 : vector<8x128xf32>
    %287 = vector.broadcast %282 : f32 to vector<8x128xf32>
    %288 = arith.mulf %287, %286 : vector<8x128xf32>
    %289 = arith.addf %242, %288 : vector<8x128xf32>
    %c6 = arith.constant 6 : index
    %c0_74 = arith.constant 0 : index
    %c0_75 = arith.constant 0 : index
    %290 = vector.load %arg2[%c6, %c0_74, %c0_75] : memref<8x8x512xbf16, #tpu.memory_space<vmem>>, vector<1x8x512xbf16>
    %291 = vector.shape_cast %290 : vector<1x8x512xbf16> to vector<8x512xbf16>
    %292 = arith.extf %291 : vector<8x512xbf16> to vector<8x512xf32>
    %293 = arith.truncf %273 : vector<8x128xf32> to vector<8x128xbf16>
    %cst_76 = arith.constant dense<0.000000e+00> : vector<8x512xf32>
    %294 = tpu.matmul %293, %3, %cst_76 {dimension_numbers = #tpu.dot_dimension_numbers<[1], [0], [0], [1], [0, 0, 1, 1], [], []>} : vector<8x128xbf16>, vector<128x512xbf16>, vector<8x512xf32> -> vector<8x512xf32>
    %295 = arith.addf %292, %294 : vector<8x512xf32>
    %296 = vector.extract_strided_slice %295 {offsets = [0, 0], sizes = [8, 128], strides = [1, 1]} : vector<8x512xf32> to vector<8x128xf32>
    %297 = arith.negf %296 : vector<8x128xf32>
    %298 = math.exp %297 : vector<8x128xf32>
    %cst_77 = arith.constant 1.000000e+00 : f32
    %299 = vector.broadcast %cst_77 : f32 to vector<8x128xf32>
    %300 = arith.addf %299, %298 : vector<8x128xf32>
    %301 = arith.divf %299, %300 : vector<8x128xf32>
    %302 = vector.extract_strided_slice %295 {offsets = [0, 128], sizes = [8, 128], strides = [1, 1]} : vector<8x512xf32> to vector<8x128xf32>
    %303 = arith.negf %302 : vector<8x128xf32>
    %304 = math.exp %303 : vector<8x128xf32>
    %cst_78 = arith.constant 1.000000e+00 : f32
    %305 = vector.broadcast %cst_78 : f32 to vector<8x128xf32>
    %306 = arith.addf %305, %304 : vector<8x128xf32>
    %307 = arith.divf %305, %306 : vector<8x128xf32>
    %308 = vector.extract_strided_slice %295 {offsets = [0, 256], sizes = [8, 128], strides = [1, 1]} : vector<8x512xf32> to vector<8x128xf32>
    %309 = math.tanh %308 : vector<8x128xf32>
    %310 = vector.extract_strided_slice %295 {offsets = [0, 384], sizes = [8, 128], strides = [1, 1]} : vector<8x512xf32> to vector<8x128xf32>
    %311 = arith.negf %310 : vector<8x128xf32>
    %312 = math.exp %311 : vector<8x128xf32>
    %cst_79 = arith.constant 1.000000e+00 : f32
    %313 = vector.broadcast %cst_79 : f32 to vector<8x128xf32>
    %314 = arith.addf %313, %312 : vector<8x128xf32>
    %315 = arith.divf %313, %314 : vector<8x128xf32>
    %316 = arith.mulf %307, %271 : vector<8x128xf32>
    %317 = arith.mulf %301, %309 : vector<8x128xf32>
    %318 = arith.addf %316, %317 : vector<8x128xf32>
    %319 = math.tanh %318 : vector<8x128xf32>
    %320 = arith.mulf %315, %319 : vector<8x128xf32>
    %321 = arith.truncf %320 : vector<8x128xf32> to vector<8x128xbf16>
    %c6_80 = arith.constant 6 : index
    %c0_81 = arith.constant 0 : index
    %c0_82 = arith.constant 0 : index
    %322 = vector.load %arg4[%c6_80, %c0_81, %c0_82] : memref<8x8x128xbf16, #tpu.memory_space<vmem>>, vector<1x8x128xbf16>
    %323 = vector.shape_cast %322 : vector<1x8x128xbf16> to vector<8x128xbf16>
    %324 = vector.shape_cast %321 : vector<8x128xbf16> to vector<1x8x128xbf16>
    tpu.vector_store %arg4[%c6_80, %c0_81, %c0_82], %324 {strides = array<i32>} : memref<8x8x128xbf16, #tpu.memory_space<vmem>>, vector<1x8x128xbf16>,
    %c8_i32_83 = arith.constant 8 : i32
    %325 = arith.muli %arg1, %c8_i32_83 : i32
    %c6_i32 = arith.constant 6 : i32
    %326 = arith.addi %325, %c6_i32 : i32
    %c8_i32_84 = arith.constant 8 : i32
    %327 = arith.cmpi slt, %326, %c8_i32_84 : i32
    %328 = arith.extui %327 : i1 to i32
    %329 = arith.sitofp %328 : i32 to f32
    %330 = vector.broadcast %329 : f32 to vector<8x128xf32>
    %331 = arith.mulf %330, %320 : vector<8x128xf32>
    %332 = arith.addf %285, %331 : vector<8x128xf32>
    %333 = arith.mulf %320, %320 : vector<8x128xf32>
    %334 = vector.broadcast %329 : f32 to vector<8x128xf32>
    %335 = arith.mulf %334, %333 : vector<8x128xf32>
    %336 = arith.addf %289, %335 : vector<8x128xf32>
    %c7 = arith.constant 7 : index
    %c0_85 = arith.constant 0 : index
    %c0_86 = arith.constant 0 : index
    %337 = vector.load %arg2[%c7, %c0_85, %c0_86] : memref<8x8x512xbf16, #tpu.memory_space<vmem>>, vector<1x8x512xbf16>
    %338 = vector.shape_cast %337 : vector<1x8x512xbf16> to vector<8x512xbf16>
    %339 = arith.extf %338 : vector<8x512xbf16> to vector<8x512xf32>
    %340 = arith.truncf %320 : vector<8x128xf32> to vector<8x128xbf16>
    %cst_87 = arith.constant dense<0.000000e+00> : vector<8x512xf32>
    %341 = tpu.matmul %340, %3, %cst_87 {dimension_numbers = #tpu.dot_dimension_numbers<[1], [0], [0], [1], [0, 0, 1, 1], [], []>} : vector<8x128xbf16>, vector<128x512xbf16>, vector<8x512xf32> -> vector<8x512xf32>
    %342 = arith.addf %339, %341 : vector<8x512xf32>
    %343 = vector.extract_strided_slice %342 {offsets = [0, 0], sizes = [8, 128], strides = [1, 1]} : vector<8x512xf32> to vector<8x128xf32>
    %344 = arith.negf %343 : vector<8x128xf32>
    %345 = math.exp %344 : vector<8x128xf32>
    %cst_88 = arith.constant 1.000000e+00 : f32
    %346 = vector.broadcast %cst_88 : f32 to vector<8x128xf32>
    %347 = arith.addf %346, %345 : vector<8x128xf32>
    %348 = arith.divf %346, %347 : vector<8x128xf32>
    %349 = vector.extract_strided_slice %342 {offsets = [0, 128], sizes = [8, 128], strides = [1, 1]} : vector<8x512xf32> to vector<8x128xf32>
    %350 = arith.negf %349 : vector<8x128xf32>
    %351 = math.exp %350 : vector<8x128xf32>
    %cst_89 = arith.constant 1.000000e+00 : f32
    %352 = vector.broadcast %cst_89 : f32 to vector<8x128xf32>
    %353 = arith.addf %352, %351 : vector<8x128xf32>
    %354 = arith.divf %352, %353 : vector<8x128xf32>
    %355 = vector.extract_strided_slice %342 {offsets = [0, 256], sizes = [8, 128], strides = [1, 1]} : vector<8x512xf32> to vector<8x128xf32>
    %356 = math.tanh %355 : vector<8x128xf32>
    %357 = vector.extract_strided_slice %342 {offsets = [0, 384], sizes = [8, 128], strides = [1, 1]} : vector<8x512xf32> to vector<8x128xf32>
    %358 = arith.negf %357 : vector<8x128xf32>
    %359 = math.exp %358 : vector<8x128xf32>
    %cst_90 = arith.constant 1.000000e+00 : f32
    %360 = vector.broadcast %cst_90 : f32 to vector<8x128xf32>
    %361 = arith.addf %360, %359 : vector<8x128xf32>
    %362 = arith.divf %360, %361 : vector<8x128xf32>
    %363 = arith.mulf %354, %318 : vector<8x128xf32>
    %364 = arith.mulf %348, %356 : vector<8x128xf32>
    %365 = arith.addf %363, %364 : vector<8x128xf32>
    %366 = math.tanh %365 : vector<8x128xf32>
    %367 = arith.mulf %362, %366 : vector<8x128xf32>
    %368 = arith.truncf %367 : vector<8x128xf32> to vector<8x128xbf16>
    %c7_91 = arith.constant 7 : index
    %c0_92 = arith.constant 0 : index
    %c0_93 = arith.constant 0 : index
    %369 = vector.load %arg4[%c7_91, %c0_92, %c0_93] : memref<8x8x128xbf16, #tpu.memory_space<vmem>>, vector<1x8x128xbf16>
    %370 = vector.shape_cast %369 : vector<1x8x128xbf16> to vector<8x128xbf16>
    %371 = vector.shape_cast %368 : vector<8x128xbf16> to vector<1x8x128xbf16>
    tpu.vector_store %arg4[%c7_91, %c0_92, %c0_93], %371 {strides = array<i32>} : memref<8x8x128xbf16, #tpu.memory_space<vmem>>, vector<1x8x128xbf16>,
    %c8_i32_94 = arith.constant 8 : i32
    %372 = arith.muli %arg1, %c8_i32_94 : i32
    %c7_i32 = arith.constant 7 : i32
    %373 = arith.addi %372, %c7_i32 : i32
    %c8_i32_95 = arith.constant 8 : i32
    %374 = arith.cmpi slt, %373, %c8_i32_95 : i32
    %375 = arith.extui %374 : i1 to i32
    %376 = arith.sitofp %375 : i32 to f32
    %377 = vector.broadcast %376 : f32 to vector<8x128xf32>
    %378 = arith.mulf %377, %367 : vector<8x128xf32>
    %379 = arith.addf %332, %378 : vector<8x128xf32>
    %380 = arith.mulf %367, %367 : vector<8x128xf32>
    %381 = vector.broadcast %376 : f32 to vector<8x128xf32>
    %382 = arith.mulf %381, %380 : vector<8x128xf32>
    %383 = arith.addf %336, %382 : vector<8x128xf32>
    %c0_96 = arith.constant 0 : index
    %c0_97 = arith.constant 0 : index
    %384 = vector.load %arg7[%c0_96, %c0_97] : memref<8x128xf32, #tpu.memory_space<vmem>>, vector<8x128xf32>
    tpu.vector_store %arg7[%c0_96, %c0_97], %367 {strides = array<i32>} : memref<8x128xf32, #tpu.memory_space<vmem>>, vector<8x128xf32>,
    %c0_98 = arith.constant 0 : index
    %c0_99 = arith.constant 0 : index
    %385 = vector.load %arg8[%c0_98, %c0_99] : memref<8x128xf32, #tpu.memory_space<vmem>>, vector<8x128xf32>
    tpu.vector_store %arg8[%c0_98, %c0_99], %365 {strides = array<i32>} : memref<8x128xf32, #tpu.memory_space<vmem>>, vector<8x128xf32>,
    %c0_100 = arith.constant 0 : index
    %c0_101 = arith.constant 0 : index
    %386 = vector.load %arg5[%c0_100, %c0_101] : memref<8x128xf32, #tpu.memory_space<vmem>>, vector<8x128xf32>
    %387 = arith.addf %386, %379 : vector<8x128xf32>
    %c0_102 = arith.constant 0 : index
    %c0_103 = arith.constant 0 : index
    %388 = vector.load %arg5[%c0_102, %c0_103] : memref<8x128xf32, #tpu.memory_space<vmem>>, vector<8x128xf32>
    tpu.vector_store %arg5[%c0_102, %c0_103], %387 {strides = array<i32>} : memref<8x128xf32, #tpu.memory_space<vmem>>, vector<8x128xf32>,
    %c0_104 = arith.constant 0 : index
    %c0_105 = arith.constant 0 : index
    %389 = vector.load %arg6[%c0_104, %c0_105] : memref<8x128xf32, #tpu.memory_space<vmem>>, vector<8x128xf32>
    %390 = arith.addf %389, %383 : vector<8x128xf32>
    %c0_106 = arith.constant 0 : index
    %c0_107 = arith.constant 0 : index
    %391 = vector.load %arg6[%c0_106, %c0_107] : memref<8x128xf32, #tpu.memory_space<vmem>>, vector<8x128xf32>
    tpu.vector_store %arg6[%c0_106, %c0_107], %390 {strides = array<i32>} : memref<8x128xf32, #tpu.memory_space<vmem>>, vector<8x128xf32>,
    return
  }
  func.func @transform_0(%arg0: i32, %arg1: i32) -> (i32, i32, i32) {
    %c0_i32 = arith.constant 0 : i32
    %c0_i32_0 = arith.constant 0 : i32
    return %arg1, %arg0, %c0_i32 : i32, i32, i32
  }
  func.func @transform_1(%arg0: i32, %arg1: i32) -> (i32, i32) {
    %c0_i32 = arith.constant 0 : i32
    %c0_i32_0 = arith.constant 0 : i32
    %c0_i32_1 = arith.constant 0 : i32
    return %c0_i32, %c0_i32_0 : i32, i32
  }
  func.func @transform_2(%arg0: i32, %arg1: i32) -> (i32, i32, i32) {
    %c0_i32 = arith.constant 0 : i32
    %c0_i32_0 = arith.constant 0 : i32
    return %arg1, %arg0, %c0_i32 : i32, i32, i32
  }
  func.func @transform_3(%arg0: i32, %arg1: i32) -> (i32, i32) {
    %c0_i32 = arith.constant 0 : i32
    %c0_i32_0 = arith.constant 0 : i32
    return %arg0, %c0_i32 : i32, i32
  }
  func.func @transform_4(%arg0: i32, %arg1: i32) -> (i32, i32) {
    %c0_i32 = arith.constant 0 : i32
    %c0_i32_0 = arith.constant 0 : i32
    return %arg0, %c0_i32 : i32, i32
  }
}

module attributes {stable_mosaic.version = 11 : i64} {
  func.func @_proj_norm_kernel(%arg0: i32, %arg1: i32, %arg2: memref<8x8x128xbf16, #tpu.memory_space<vmem>>, %arg3: memref<8x128xf32, #tpu.memory_space<vmem>>, %arg4: memref<8x128xf32, #tpu.memory_space<vmem>>, %arg5: memref<128x512xbf16, #tpu.memory_space<vmem>>, %arg6: memref<1x512xf32, #tpu.memory_space<vmem>>, %arg7: memref<8x8x512xbf16, #tpu.memory_space<vmem>>) attributes {dimension_semantics = [#tpu.dimension_semantics<parallel>, #tpu.dimension_semantics<parallel>], iteration_bounds = array<i64: 1, 1>, scalar_prefetch = 0 : i64, scratch_operands = 0 : i64, tpu.core_type = #tpu.core_type<tc>, window_params = [{transform_indices = @transform_0, window_bounds = array<i64: 8, 8, 128>}, {transform_indices = @transform_1, window_bounds = array<i64: 8, 128>}, {transform_indices = @transform_2, window_bounds = array<i64: 8, 128>}, {pipeline_mode = #tpu.pipeline_mode<synchronous>, transform_indices = @transform_3, window_bounds = array<i64: 128, 512>}, {pipeline_mode = #tpu.pipeline_mode<synchronous>, transform_indices = @transform_4, window_bounds = array<i64: 1, 512>}, {transform_indices = @transform_5, window_bounds = array<i64: 8, 8, 512>}]} {
    %c0 = arith.constant 0 : index
    %c0_0 = arith.constant 0 : index
    %c0_1 = arith.constant 0 : index
    %0 = vector.load %arg2[%c0, %c0_0, %c0_1] : memref<8x8x128xbf16, #tpu.memory_space<vmem>>, vector<8x8x128xbf16>
    %1 = arith.extf %0 : vector<8x8x128xbf16> to vector<8x8x128xf32>
    %c0_2 = arith.constant 0 : index
    %c0_3 = arith.constant 0 : index
    %2 = vector.load %arg3[%c0_2, %c0_3] : memref<8x128xf32, #tpu.memory_space<vmem>>, vector<8x128xf32>
    %3 = vector.shape_cast %2 : vector<8x128xf32> to vector<1x8x128xf32>
    %4 = vector.broadcast %3 : vector<1x8x128xf32> to vector<8x8x128xf32>
    %5 = arith.mulf %1, %4 : vector<8x8x128xf32>
    %c0_4 = arith.constant 0 : index
    %c0_5 = arith.constant 0 : index
    %6 = vector.load %arg4[%c0_4, %c0_5] : memref<8x128xf32, #tpu.memory_space<vmem>>, vector<8x128xf32>
    %7 = vector.shape_cast %6 : vector<8x128xf32> to vector<1x8x128xf32>
    %8 = vector.broadcast %7 : vector<1x8x128xf32> to vector<8x8x128xf32>
    %9 = arith.addf %5, %8 : vector<8x8x128xf32>
    %10 = arith.truncf %9 : vector<8x8x128xf32> to vector<8x8x128xbf16>
    %11 = vector.shape_cast %10 : vector<8x8x128xbf16> to vector<64x128xbf16>
    %c0_6 = arith.constant 0 : index
    %c0_7 = arith.constant 0 : index
    %12 = vector.load %arg5[%c0_6, %c0_7] : memref<128x512xbf16, #tpu.memory_space<vmem>>, vector<128x512xbf16>
    %cst = arith.constant dense<0.000000e+00> : vector<64x512xf32>
    %13 = tpu.matmul %11, %12, %cst {dimension_numbers = #tpu.dot_dimension_numbers<[1], [0], [0], [1], [0, 0, 1, 1], [], []>} : vector<64x128xbf16>, vector<128x512xbf16>, vector<64x512xf32> -> vector<64x512xf32>
    %c0_8 = arith.constant 0 : index
    %c0_9 = arith.constant 0 : index
    %14 = vector.load %arg6[%c0_8, %c0_9] : memref<1x512xf32, #tpu.memory_space<vmem>>, vector<1x512xf32>
    %15 = vector.broadcast %14 : vector<1x512xf32> to vector<64x512xf32>
    %16 = arith.addf %13, %15 : vector<64x512xf32>
    %17 = vector.shape_cast %16 : vector<64x512xf32> to vector<8x8x512xf32>
    %18 = arith.truncf %17 : vector<8x8x512xf32> to vector<8x8x512xbf16>
    %c0_10 = arith.constant 0 : index
    %c0_11 = arith.constant 0 : index
    %c0_12 = arith.constant 0 : index
    %19 = vector.load %arg7[%c0_10, %c0_11, %c0_12] : memref<8x8x512xbf16, #tpu.memory_space<vmem>>, vector<8x8x512xbf16>
    tpu.vector_store %arg7[%c0_10, %c0_11, %c0_12], %18 {strides = array<i32>} : memref<8x8x512xbf16, #tpu.memory_space<vmem>>, vector<8x8x512xbf16>,
    return
  }
  func.func @transform_0(%arg0: i32, %arg1: i32) -> (i32, i32, i32) {
    %c0_i32 = arith.constant 0 : i32
    %c0_i32_0 = arith.constant 0 : i32
    return %arg1, %arg0, %c0_i32 : i32, i32, i32
  }
  func.func @transform_1(%arg0: i32, %arg1: i32) -> (i32, i32) {
    %c0_i32 = arith.constant 0 : i32
    %c0_i32_0 = arith.constant 0 : i32
    return %arg0, %c0_i32 : i32, i32
  }
  func.func @transform_2(%arg0: i32, %arg1: i32) -> (i32, i32) {
    %c0_i32 = arith.constant 0 : i32
    %c0_i32_0 = arith.constant 0 : i32
    return %arg0, %c0_i32 : i32, i32
  }
  func.func @transform_3(%arg0: i32, %arg1: i32) -> (i32, i32) {
    %c0_i32 = arith.constant 0 : i32
    %c0_i32_0 = arith.constant 0 : i32
    %c0_i32_1 = arith.constant 0 : i32
    return %c0_i32, %c0_i32_0 : i32, i32
  }
  func.func @transform_4(%arg0: i32, %arg1: i32) -> (i32, i32) {
    %c0_i32 = arith.constant 0 : i32
    %c0_i32_0 = arith.constant 0 : i32
    %c0_i32_1 = arith.constant 0 : i32
    return %c0_i32, %c0_i32_0 : i32, i32
  }
  func.func @transform_5(%arg0: i32, %arg1: i32) -> (i32, i32, i32) {
    %c0_i32 = arith.constant 0 : i32
    %c0_i32_0 = arith.constant 0 : i32
    return %arg1, %arg0, %c0_i32 : i32, i32, i32
  }
}

module attributes {stable_mosaic.version = 11 : i64} {
  func.func @_proj_norm_kernel(%arg0: i32, %arg1: i32, %arg2: memref<8x8x128xbf16, #tpu.memory_space<vmem>>, %arg3: memref<8x128xf32, #tpu.memory_space<vmem>>, %arg4: memref<8x128xf32, #tpu.memory_space<vmem>>, %arg5: memref<128x128xbf16, #tpu.memory_space<vmem>>, %arg6: memref<1x128xf32, #tpu.memory_space<vmem>>, %arg7: memref<8x8x128xf32, #tpu.memory_space<vmem>>) attributes {dimension_semantics = [#tpu.dimension_semantics<parallel>, #tpu.dimension_semantics<parallel>], iteration_bounds = array<i64: 1, 1>, scalar_prefetch = 0 : i64, scratch_operands = 0 : i64, tpu.core_type = #tpu.core_type<tc>, window_params = [{transform_indices = @transform_0, window_bounds = array<i64: 8, 8, 128>}, {transform_indices = @transform_1, window_bounds = array<i64: 8, 128>}, {transform_indices = @transform_2, window_bounds = array<i64: 8, 128>}, {pipeline_mode = #tpu.pipeline_mode<synchronous>, transform_indices = @transform_3, window_bounds = array<i64: 128, 128>}, {pipeline_mode = #tpu.pipeline_mode<synchronous>, transform_indices = @transform_4, window_bounds = array<i64: 1, 128>}, {transform_indices = @transform_5, window_bounds = array<i64: 8, 8, 128>}]} {
    %c0 = arith.constant 0 : index
    %c0_0 = arith.constant 0 : index
    %c0_1 = arith.constant 0 : index
    %0 = vector.load %arg2[%c0, %c0_0, %c0_1] : memref<8x8x128xbf16, #tpu.memory_space<vmem>>, vector<8x8x128xbf16>
    %1 = arith.extf %0 : vector<8x8x128xbf16> to vector<8x8x128xf32>
    %c0_2 = arith.constant 0 : index
    %c0_3 = arith.constant 0 : index
    %2 = vector.load %arg3[%c0_2, %c0_3] : memref<8x128xf32, #tpu.memory_space<vmem>>, vector<8x128xf32>
    %3 = vector.shape_cast %2 : vector<8x128xf32> to vector<1x8x128xf32>
    %4 = vector.broadcast %3 : vector<1x8x128xf32> to vector<8x8x128xf32>
    %5 = arith.mulf %1, %4 : vector<8x8x128xf32>
    %c0_4 = arith.constant 0 : index
    %c0_5 = arith.constant 0 : index
    %6 = vector.load %arg4[%c0_4, %c0_5] : memref<8x128xf32, #tpu.memory_space<vmem>>, vector<8x128xf32>
    %7 = vector.shape_cast %6 : vector<8x128xf32> to vector<1x8x128xf32>
    %8 = vector.broadcast %7 : vector<1x8x128xf32> to vector<8x8x128xf32>
    %9 = arith.addf %5, %8 : vector<8x8x128xf32>
    %10 = arith.truncf %9 : vector<8x8x128xf32> to vector<8x8x128xbf16>
    %11 = vector.shape_cast %10 : vector<8x8x128xbf16> to vector<64x128xbf16>
    %c0_6 = arith.constant 0 : index
    %c0_7 = arith.constant 0 : index
    %12 = vector.load %arg5[%c0_6, %c0_7] : memref<128x128xbf16, #tpu.memory_space<vmem>>, vector<128x128xbf16>
    %cst = arith.constant dense<0.000000e+00> : vector<64x128xf32>
    %13 = tpu.matmul %11, %12, %cst {dimension_numbers = #tpu.dot_dimension_numbers<[1], [0], [0], [1], [0, 0, 1, 1], [], []>} : vector<64x128xbf16>, vector<128x128xbf16>, vector<64x128xf32> -> vector<64x128xf32>
    %c0_8 = arith.constant 0 : index
    %c0_9 = arith.constant 0 : index
    %14 = vector.load %arg6[%c0_8, %c0_9] : memref<1x128xf32, #tpu.memory_space<vmem>>, vector<1x128xf32>
    %15 = vector.broadcast %14 : vector<1x128xf32> to vector<64x128xf32>
    %16 = arith.addf %13, %15 : vector<64x128xf32>
    %17 = vector.shape_cast %16 : vector<64x128xf32> to vector<8x8x128xf32>
    %c0_10 = arith.constant 0 : index
    %c0_11 = arith.constant 0 : index
    %c0_12 = arith.constant 0 : index
    %18 = vector.load %arg7[%c0_10, %c0_11, %c0_12] : memref<8x8x128xf32, #tpu.memory_space<vmem>>, vector<8x8x128xf32>
    tpu.vector_store %arg7[%c0_10, %c0_11, %c0_12], %17 {strides = array<i32>} : memref<8x8x128xf32, #tpu.memory_space<vmem>>, vector<8x8x128xf32>,
    return
  }
  func.func @transform_0(%arg0: i32, %arg1: i32) -> (i32, i32, i32) {
    %c0_i32 = arith.constant 0 : i32
    %c0_i32_0 = arith.constant 0 : i32
    return %arg1, %arg0, %c0_i32 : i32, i32, i32
  }
  func.func @transform_1(%arg0: i32, %arg1: i32) -> (i32, i32) {
    %c0_i32 = arith.constant 0 : i32
    %c0_i32_0 = arith.constant 0 : i32
    return %arg0, %c0_i32 : i32, i32
  }
  func.func @transform_2(%arg0: i32, %arg1: i32) -> (i32, i32) {
    %c0_i32 = arith.constant 0 : i32
    %c0_i32_0 = arith.constant 0 : i32
    return %arg0, %c0_i32 : i32, i32
  }
  func.func @transform_3(%arg0: i32, %arg1: i32) -> (i32, i32) {
    %c0_i32 = arith.constant 0 : i32
    %c0_i32_0 = arith.constant 0 : i32
    %c0_i32_1 = arith.constant 0 : i32
    return %c0_i32, %c0_i32_0 : i32, i32
  }
  func.func @transform_4(%arg0: i32, %arg1: i32) -> (i32, i32) {
    %c0_i32 = arith.constant 0 : i32
    %c0_i32_0 = arith.constant 0 : i32
    %c0_i32_1 = arith.constant 0 : i32
    return %c0_i32, %c0_i32_0 : i32, i32
  }
  func.func @transform_5(%arg0: i32, %arg1: i32) -> (i32, i32, i32) {
    %c0_i32 = arith.constant 0 : i32
    %c0_i32_0 = arith.constant 0 : i32
    return %arg1, %arg0, %c0_i32 : i32, i32, i32
  }
}

</mosaic_0001>

<bundles_post_ra>
// kernel: blstm2_fc1_forward.5
= control target key start
LH: loop header
LB: loop body
LE: loop exit
PB: predicated region body
PF: predicated region fallthrough
CT: control target
= control target key end

     0   :  { %8 = vsyncpa [#allocation3], 0  ;;  %s690_s12 = smov [#allocation2]   ;;  %s849_s0 = inlined_call_operand.vmem [shape: f32[8,8,128], index: 0, kind: input, shape index: {}]   ;;  %s850_s1 = inlined_call_operand.hbm [shape: bf16[128,512], index: 1, kind: input, shape index: {}]   ;;  %s851_s2 = inlined_call_operand.vmem [shape: f32[1,512], index: 2, kind: input, shape index: {}]   ;;  %s852_s3 = inlined_call_operand.vmem [shape: bf16[8,8,512], index: 3, kind: output, shape index: {}]  }
   0x1   :  { %s16_s13 = sshll.u32 %s690_s12, 4  ;;  %s666_s16 = scalar_lea.hbm %s850_s1, 4096  ;;  %s17_s13 = int_to_ptr.vmem [resolvable:$true] %s16_s13 }
   0x2   :  { %p667_p0 = scmp.ne.s32.totalorder %s850_s1, %s666_s16  ;;  %p670_p1 = scmp.lt.u32.totalorder %s666_s16, %s850_s1 }
   0x4   :  { %p672_p2 = pnand %p670_p1, %p667_p0 }
   0x6   :  { %675 = shalt.err (!%p672_p2)
}
   0x7   :  { %s676_s21 = scalar_lea.vmem %s17_s13, 4096  ;;  %p681_p4 = scmp.lt.s32.totalorder %s17_s13, %s17_s13 }
   0x8   :  { %p677_p3 = scmp.ne.s32.totalorder %s17_s13, %s676_s21  ;;  %p682_p5 = scmp.lt.s32.totalorder %s676_s21, %s676_s21 }
   0xa   :  { %p683_p6 = por %p682_p5, %p681_p4 }
   0xc   :  { %p684_p7 = pnand %p683_p6, %p677_p3 }
   0xe   :  { %687 = shalt.err (!%p684_p7)
}
   0xf   :  { %s691_s22 = smov 256   ;;  %s692_s23 = smov 16  }
  0x10   :  { %22 = dma.hbm_to_vmem [thread:$0]  %s850_s1, 4096, %s17_s13, [#allocation3], %s691_s22, %s691_s22, %s692_s23  }
  0x11   :  { %688 = dma.done.wait [#allocation3], 4096  }
  0x12   :  { %689 = vsyncadd [#allocation3], 4294963200  ;;  %v693_v0 = vmov 0   ;;  %v618_v1 = vld [vmem:[#allocation2 + $0x4] ss:$16 sps:$4 sm:$0xff]   ;;  %v30_v34 = vld [vmem:[%s849_s0 + $0x8] sm:$0xff]  ;;  %v75_v45 = vlaneseq }
  0x13   :  { %287 = vmatprep.mubr.bf16.mxu0 %v693_v0  ;;  %360 = vmatprep.mubr.bf16.mxu1 %v693_v0  ;;  %v620_v2 = vld [vmem:[#allocation2 + $0xc] ss:$16 sps:$4 sm:$0xff]   ;;  %v622_v3 = vld [vmem:[#allocation2] ss:$16 sps:$4 sm:$0xff]   ;;  %v623_v4 = vld [vmem:[#allocation2 + $0x8] ss:$16 sps:$4 sm:$0xff]  }
  0x14   :  { %255 = vmatprep.subr.bf16.mxu0 %v618_v1  ;;  %328 = vmatprep.subr.bf16.mxu1 %v620_v2  ;;  %v624_v5 = vld [vmem:[#allocation2 + $0x24] ss:$16 sps:$4 sm:$0xff]   ;;  %v626_v6 = vld [vmem:[#allocation2 + $0x2c] ss:$16 sps:$4 sm:$0xff]   ;;  %v628_v7 = vld [vmem:[#allocation2 + $0x20] ss:$16 sps:$4 sm:$0xff]  }
  0x15   :  { %256 = vmatpush1.bf16.msra.mxu0 %v622_v3  ;;  %329 = vmatpush1.bf16.msra.mxu1 %v623_v4  ;;  %v629_v8 = vld [vmem:[#allocation2 + $0x28] ss:$16 sps:$4 sm:$0xff]   ;;  %v630_v9 = vld [vmem:[#allocation2 + $0x44] ss:$16 sps:$4 sm:$0xff]   ;;  %v632_v10 = vld [vmem:[#allocation2 + $0x4c] ss:$16 sps:$4 sm:$0xff]  }
  0x16   :  { %257 = vmatprep.subr.bf16.mxu0 %v624_v5  ;;  %330 = vmatprep.subr.bf16.mxu1 %v626_v6  ;;  %v634_v11 = vld [vmem:[#allocation2 + $0x40] ss:$16 sps:$4 sm:$0xff]   ;;  %v635_v12 = vld [vmem:[#allocation2 + $0x48] ss:$16 sps:$4 sm:$0xff]   ;;  %v636_v13 = vld [vmem:[#allocation2 + $0x64] ss:$16 sps:$4 sm:$0xff]  }
  0x17   :  { %v638_v14 = vld [vmem:[#allocation2 + $0x6c] ss:$16 sps:$4 sm:$0xff]   ;;  %v640_v15 = vld [vmem:[#allocation2 + $0x60] ss:$16 sps:$4 sm:$0xff]   ;;  %v641_v16 = vld [vmem:[#allocation2 + $0x68] ss:$16 sps:$4 sm:$0xff]  }
  0x18   :  { %v642_v17 = vld [vmem:[#allocation2 + $0x84] ss:$16 sps:$4 sm:$0xff]   ;;  %v644_v18 = vld [vmem:[#allocation2 + $0x8c] ss:$16 sps:$4 sm:$0xff]   ;;  %v646_v19 = vld [vmem:[#allocation2 + $0x80] ss:$16 sps:$4 sm:$0xff]  }
  0x19   :  { %258 = vmatpush1.bf16.msra.mxu0 %v628_v7  ;;  %331 = vmatpush1.bf16.msra.mxu1 %v629_v8  ;;  %v647_v20 = vld [vmem:[#allocation2 + $0x88] ss:$16 sps:$4 sm:$0xff]   ;;  %v648_v21 = vld [vmem:[#allocation2 + $0xa4] ss:$16 sps:$4 sm:$0xff]   ;;  %v650_v22 = vld [vmem:[#allocation2 + $0xac] ss:$16 sps:$4 sm:$0xff]  }
  0x1a   :  { %259 = vmatprep.subr.bf16.mxu0 %v630_v9  ;;  %332 = vmatprep.subr.bf16.mxu1 %v632_v10  ;;  %v652_v23 = vld [vmem:[#allocation2 + $0xa0] ss:$16 sps:$4 sm:$0xff]   ;;  %v653_v24 = vld [vmem:[#allocation2 + $0xa8] ss:$16 sps:$4 sm:$0xff]   ;;  %v654_v25 = vld [vmem:[#allocation2 + $0xc4] ss:$16 sps:$4 sm:$0xff]  }
  0x1b   :  { %v656_v26 = vld [vmem:[#allocation2 + $0xcc] ss:$16 sps:$4 sm:$0xff]   ;;  %v658_v27 = vld [vmem:[#allocation2 + $0xc0] ss:$16 sps:$4 sm:$0xff]   ;;  %v659_v28 = vld [vmem:[#allocation2 + $0xc8] ss:$16 sps:$4 sm:$0xff]  }
  0x1c   :  { %v660_v29 = vld [vmem:[#allocation2 + $0xe4] ss:$16 sps:$4 sm:$0xff]   ;;  %v662_v30 = vld [vmem:[#allocation2 + $0xec] ss:$16 sps:$4 sm:$0xff]   ;;  %v664_v31 = vld [vmem:[#allocation2 + $0xe0] ss:$16 sps:$4 sm:$0xff]  }
  0x1d   :  { %260 = vmatpush1.bf16.msra.mxu0 %v634_v11  ;;  %333 = vmatpush1.bf16.msra.mxu1 %v635_v12  ;;  %v665_v32 = vld [vmem:[#allocation2 + $0xe8] ss:$16 sps:$4 sm:$0xff]   ;;  %v29_v33 = vld [vmem:[%s849_s0] sm:$0xff]  ;;  %v31_v36 = vld [vmem:[%s849_s0 + $0x10] sm:$0xff]  ;;  %v76_v46 = vshrl.u32 %v75_v45, 7 }
  0x1e   :  { %261 = vmatprep.subr.bf16.mxu0 %v636_v13  ;;  %334 = vmatprep.subr.bf16.mxu1 %v638_v14  ;;  %v37_v35 = vpack.c.bf16 %v30_v34, %v29_v33  ;;  %v32_v37 = vld [vmem:[%s849_s0 + $0x18] sm:$0xff]  ;;  %v33_v39 = vld [vmem:[%s849_s0 + $0x20] sm:$0xff]  ;;  %v34_v40 = vld [vmem:[%s849_s0 + $0x28] sm:$0xff] }
  0x1f   :  { %v38_v38 = vpack.c.bf16 %v32_v37, %v31_v36  ;;  %v39_v41 = vpack.c.bf16 %v34_v40, %v33_v39  ;;  %v35_v42 = vld [vmem:[%s849_s0 + $0x30] sm:$0xff]  ;;  %v36_v43 = vld [vmem:[%s849_s0 + $0x38] sm:$0xff]  ;;  %v77_v47 = vsub.s32 0, %v76_v46  ;;  %v85_v48 = vsub.s32 2, %v76_v46  ;;  %v73_v49 = vld [vmem:[%s851_s2] sm:$0xf] }
  0x20   :  { %v40_v44 = vpack.c.bf16 %v36_v43, %v35_v42  ;;  %v81_v50 = vsub.s32 1, %v76_v46  ;;  %v89_v51 = vsub.s32 3, %v76_v46 }
  0x21   :  { %262 = vmatpush1.bf16.msra.mxu0 %v640_v15  ;;  %335 = vmatpush1.bf16.msra.mxu1 %v641_v16  ;;  %v761_v52 = vrot.slane %v73_v49, %v77_v47  ;;  %v763_v53 = vrot.slane %v73_v49, %v85_v48 }
  0x22   :  { %263 = vmatprep.subr.bf16.mxu0 %v642_v17  ;;  %336 = vmatprep.subr.bf16.mxu1 %v644_v18  ;;  %v765_v54 = vrot.slane %v73_v49, %v81_v50  ;;  %v767_v55 = vrot.slane %v73_v49, %v89_v51 }
  0x25   :  { %264 = vmatpush1.bf16.msra.mxu0 %v646_v19  ;;  %337 = vmatpush1.bf16.msra.mxu1 %v647_v20 }
  0x26   :  { %265 = vmatprep.subr.bf16.mxu0 %v648_v21  ;;  %338 = vmatprep.subr.bf16.mxu1 %v650_v22 }
  0x29   :  { %266 = vmatpush1.bf16.msra.mxu0 %v652_v23  ;;  %339 = vmatpush1.bf16.msra.mxu1 %v653_v24 }
  0x2a   :  { %267 = vmatprep.subr.bf16.mxu0 %v654_v25  ;;  %340 = vmatprep.subr.bf16.mxu1 %v656_v26 }
  0x2d   :  { %268 = vmatpush1.bf16.msra.mxu0 %v658_v27  ;;  %341 = vmatpush1.bf16.msra.mxu1 %v659_v28 }
  0x2e   :  { %269 = vmatprep.subr.bf16.mxu0 %v660_v29  ;;  %342 = vmatprep.subr.bf16.mxu1 %v662_v30 }
  0x31   :  { %270 = vmatpush1.bf16.msra.mxu0 %v664_v31  ;;  %343 = vmatpush1.bf16.msra.mxu1 %v665_v32 }
  0x34   :  { %288 = vmatmul.mubr.bf16.vlgmr.msra.gmra.mrb[0].mxu0 %v37_v35  ;;  %361 = vmatmul.mubr.bf16.vlgmr.msra.gmra.mrb[0].mxu1 %v37_v35 }
  0x35   :  { %297 = vmatprep.mubr.bf16.mxu0 %v693_v0  ;;  %370 = vmatprep.mubr.bf16.mxu1 %v693_v0 }
  0x3c   :  { %298 = vmatmul.mubr.bf16.gmra.mrb[4].mxu0 %v38_v38  ;;  %371 = vmatmul.mubr.bf16.gmra.mrb[4].mxu1 %v38_v38 }
  0x3d   :  { %307 = vmatprep.mubr.bf16.mxu0 %v693_v0  ;;  %380 = vmatprep.mubr.bf16.mxu1 %v693_v0 }
  0x44   :  { %308 = vmatmul.mubr.bf16.gmra.mrb[8].mxu0 %v39_v41  ;;  %381 = vmatmul.mubr.bf16.gmra.mrb[8].mxu1 %v39_v41 }
  0x45   :  { %317 = vmatprep.mubr.bf16.mxu0 %v693_v0  ;;  %390 = vmatprep.mubr.bf16.mxu1 %v693_v0 }
  0x4c   :  { %318 = vmatmul.mubr.bf16.gmra.mrb[12].mxu0 %v40_v44  ;;  %391 = vmatmul.mubr.bf16.gmra.mrb[12].mxu1 %v40_v44 }
 0x107   :  { %v289_v56 = vpop.f32.mrb[0].mxu0  ;;  %v362_v57 = vpop.f32.mrb[0].mxu1 }
 0x108   :  { %v290_v58 = vadd.f32 %v289_v56, %v761_v52  ;;  %v363_v59 = vadd.f32 %v362_v57, %v763_v53  ;;  %v291_v60 = vpop.f32.mrb[1].mxu0  ;;  %v364_v61 = vpop.f32.mrb[1].mxu1 }
 0x109   :  { %v292_v62 = vadd.f32 %v291_v60, %v765_v54  ;;  %v365_v63 = vadd.f32 %v364_v61, %v767_v55  ;;  %v293_v0 = vpop.f32.mrb[2].mxu0  ;;  %v366_v1 = vpop.f32.mrb[2].mxu1 }
 0x10a   :  { %v294_v2 = vadd.f32 %v293_v0, %v761_v52  ;;  %v367_v3 = vadd.f32 %v366_v1, %v763_v53  ;;  %v295_v4 = vpop.f32.mrb[3].mxu0  ;;  %v368_v5 = vpop.f32.mrb[3].mxu1 }
 0x10b   :  { %v598_v6 = vpack.c.bf16 %v292_v62, %v290_v58  ;;  %v599_v7 = vpack.c.bf16 %v365_v63, %v363_v59  ;;  %v296_v8 = vadd.f32 %v295_v4, %v765_v54  ;;  %v369_v9 = vadd.f32 %v368_v5, %v767_v55 }
 0x10d   :  { %529 = vst [vmem:[%s852_s3] sm:$0xff] %v598_v6  ;;  %530 = vst [vmem:[%s852_s3 + $0x8] sm:$0xff] %v599_v7  ;;  %v600_v10 = vpack.c.bf16 %v296_v8, %v294_v2  ;;  %v601_v11 = vpack.c.bf16 %v369_v9, %v367_v3 }
 0x10f   :  { %531 = vst [vmem:[%s852_s3 + $0x10] sm:$0xff] %v600_v10  ;;  %532 = vst [vmem:[%s852_s3 + $0x18] sm:$0xff] %v601_v11  ;;  %v299_v12 = vpop.f32.mrb[4].mxu0  ;;  %v372_v13 = vpop.f32.mrb[4].mxu1 }
 0x110   :  { %v300_v14 = vadd.f32 %v299_v12, %v761_v52  ;;  %v373_v15 = vadd.f32 %v372_v13, %v763_v53  ;;  %v301_v16 = vpop.f32.mrb[5].mxu0  ;;  %v374_v17 = vpop.f32.mrb[5].mxu1 }
 0x111   :  { %v302_v18 = vadd.f32 %v301_v16, %v765_v54  ;;  %v375_v19 = vadd.f32 %v374_v17, %v767_v55  ;;  %v303_v20 = vpop.f32.mrb[6].mxu0  ;;  %v376_v21 = vpop.f32.mrb[6].mxu1 }
 0x112   :  { %v304_v22 = vadd.f32 %v303_v20, %v761_v52  ;;  %v377_v23 = vadd.f32 %v376_v21, %v763_v53  ;;  %v305_v24 = vpop.f32.mrb[7].mxu0  ;;  %v378_v25 = vpop.f32.mrb[7].mxu1 }
 0x113   :  { %v602_v26 = vpack.c.bf16 %v302_v18, %v300_v14  ;;  %v603_v27 = vpack.c.bf16 %v375_v19, %v373_v15  ;;  %v306_v28 = vadd.f32 %v305_v24, %v765_v54  ;;  %v379_v29 = vadd.f32 %v378_v25, %v767_v55 }
 0x115   :  { %533 = vst [vmem:[%s852_s3 + $0x20] sm:$0xff] %v602_v26  ;;  %534 = vst [vmem:[%s852_s3 + $0x28] sm:$0xff] %v603_v27  ;;  %v604_v30 = vpack.c.bf16 %v306_v28, %v304_v22  ;;  %v605_v31 = vpack.c.bf16 %v379_v29, %v377_v23 }
 0x117   :  { %535 = vst [vmem:[%s852_s3 + $0x30] sm:$0xff] %v604_v30  ;;  %536 = vst [vmem:[%s852_s3 + $0x38] sm:$0xff] %v605_v31  ;;  %v309_v32 = vpop.f32.mrb[8].mxu0  ;;  %v382_v33 = vpop.f32.mrb[8].mxu1 }
 0x118   :  { %v310_v34 = vadd.f32 %v309_v32, %v761_v52  ;;  %v383_v35 = vadd.f32 %v382_v33, %v763_v53  ;;  %v311_v36 = vpop.f32.mrb[9].mxu0  ;;  %v384_v37 = vpop.f32.mrb[9].mxu1 }
 0x119   :  { %v312_v38 = vadd.f32 %v311_v36, %v765_v54  ;;  %v385_v39 = vadd.f32 %v384_v37, %v767_v55  ;;  %v313_v40 = vpop.f32.mrb[10].mxu0  ;;  %v386_v41 = vpop.f32.mrb[10].mxu1 }
 0x11a   :  { %v314_v42 = vadd.f32 %v313_v40, %v761_v52  ;;  %v387_v43 = vadd.f32 %v386_v41, %v763_v53  ;;  %v315_v44 = vpop.f32.mrb[11].mxu0  ;;  %v388_v45 = vpop.f32.mrb[11].mxu1 }
 0x11b   :  { %v606_v46 = vpack.c.bf16 %v312_v38, %v310_v34  ;;  %v607_v47 = vpack.c.bf16 %v385_v39, %v383_v35  ;;  %v316_v48 = vadd.f32 %v315_v44, %v765_v54  ;;  %v389_v49 = vadd.f32 %v388_v45, %v767_v55 }
 0x11d   :  { %537 = vst [vmem:[%s852_s3 + $0x40] sm:$0xff] %v606_v46  ;;  %538 = vst [vmem:[%s852_s3 + $0x48] sm:$0xff] %v607_v47  ;;  %v608_v50 = vpack.c.bf16 %v316_v48, %v314_v42  ;;  %v609_v51 = vpack.c.bf16 %v389_v49, %v387_v43 }
 0x11f   :  { %539 = vst [vmem:[%s852_s3 + $0x50] sm:$0xff] %v608_v50  ;;  %540 = vst [vmem:[%s852_s3 + $0x58] sm:$0xff] %v609_v51  ;;  %v319_v56 = vpop.f32.mrb[12].mxu0  ;;  %v392_v57 = vpop.f32.mrb[12].mxu1 }
 0x120   :  { %v320_v58 = vadd.f32 %v319_v56, %v761_v52  ;;  %v393_v59 = vadd.f32 %v392_v57, %v763_v53  ;;  %v321_v60 = vpop.f32.mrb[13].mxu0  ;;  %v394_v61 = vpop.f32.mrb[13].mxu1 }
 0x121   :  { %v322_v62 = vadd.f32 %v321_v60, %v765_v54  ;;  %v395_v63 = vadd.f32 %v394_v61, %v767_v55  ;;  %v323_v0 = vpop.f32.mrb[14].mxu0  ;;  %v396_v1 = vpop.f32.mrb[14].mxu1 }
 0x122   :  { %v324_v2 = vadd.f32 %v323_v0, %v761_v52  ;;  %v397_v3 = vadd.f32 %v396_v1, %v763_v53  ;;  %v325_v4 = vpop.f32.mrb[15].mxu0  ;;  %v398_v5 = vpop.f32.mrb[15].mxu1 }
 0x123   :  { %v610_v6 = vpack.c.bf16 %v322_v62, %v320_v58  ;;  %v611_v7 = vpack.c.bf16 %v395_v63, %v393_v59  ;;  %v326_v8 = vadd.f32 %v325_v4, %v765_v54  ;;  %v399_v9 = vadd.f32 %v398_v5, %v767_v55 }
 0x125   :  { %541 = vst [vmem:[%s852_s3 + $0x60] sm:$0xff] %v610_v6  ;;  %542 = vst [vmem:[%s852_s3 + $0x68] sm:$0xff] %v611_v7  ;;  %v612_v10 = vpack.c.bf16 %v326_v8, %v324_v2  ;;  %v613_v52 = vpack.c.bf16 %v399_v9, %v397_v3 }
 0x127   :  { %543 = vst [vmem:[%s852_s3 + $0x70] sm:$0xff] %v612_v10  ;;  %544 = vst [vmem:[%s852_s3 + $0x78] sm:$0xff] %v613_v52 }
 0x128   :  { %549 = vsyncpa [#allocation3], 1 }

// kernel: blstm2_fc1_forward.9
= control target key start
LH: loop header
LB: loop body
LE: loop exit
PB: predicated region body
PF: predicated region fallthrough
CT: control target
= control target key end

     0   :  { %s430_s3 = inlined_call_operand.vmem [shape: bf16[128,128], index: 3, kind: input, shape index: {}]   ;;  %s431_s0 = inlined_call_operand.vmem [shape: bf16[8,8,128], index: 0, kind: input, shape index: {}]   ;;  %s432_s1 = inlined_call_operand.vmem [shape: f32[8,128], index: 1, kind: input, shape index: {}]   ;;  %s433_s2 = inlined_call_operand.vmem [shape: f32[8,128], index: 2, kind: input, shape index: {}]   ;;  %s434_s4 = inlined_call_operand.vmem [shape: f32[1,128], index: 4, kind: input, shape index: {}]   ;;  %s435_s5 = inlined_call_operand.vmem [shape: f32[8,8,128], index: 5, kind: output, shape index: {}]  }
   0x1   :  { %v323_v0 = vld [vmem:[%s430_s3] sm:$0xff]   ;;  %v324_v1 = vld [vmem:[%s430_s3 + $0x8] sm:$0xff]   ;;  %v325_v2 = vld [vmem:[%s430_s3 + $0x10] sm:$0xff]  }
   0x2   :  { %283 = vmatprep.subr.bf16.mxu0 %v323_v0  ;;  %307 = vmatprep.subr.bf16.mxu1 %v323_v0  ;;  %v326_v3 = vld [vmem:[%s430_s3 + $0x18] sm:$0xff]   ;;  %v253_v4 = vld [vmem:[%s431_s0] sm:$0xff]   ;;  %v269_v8 = vld [vmem:[%s431_s0 + $0x10] sm:$0xff]  }
   0x3   :  { %284 = vmatpush3.bf16.msra.mxu0 %v323_v0  ;;  %315 = vmatpush3.bf16.msra.mxu1 %v323_v0  ;;  %v37_v5 = vld [vmem:[%s432_s1] sm:$0xff]  ;;  %v254_v6 = vunpack.c.l.bf16 %v253_v4  ;;  %v255_v7 = vunpack.c.h.bf16 %v253_v4  ;;  %v262_v10 = vunpack.c.l.bf16 %v269_v8  ;;  %v263_v11 = vunpack.c.h.bf16 %v269_v8  ;;  %v268_v22 = vld [vmem:[%s431_s0 + $0x8] sm:$0xff]   ;;  %v270_v23 = vld [vmem:[%s431_s0 + $0x18] sm:$0xff]  }
   0x4   :  { %285 = vmatprep.subr.bf16.mxu0 %v324_v1  ;;  %308 = vmatprep.subr.bf16.mxu1 %v324_v1  ;;  %v46_v9 = vld [vmem:[%s433_s2] sm:$0xff]  ;;  %v328_v24 = vld [vmem:[%s430_s3 + $0x28] sm:$0xff]   ;;  %v258_v26 = vunpack.c.l.bf16 %v268_v22  ;;  %v259_v27 = vunpack.c.h.bf16 %v268_v22  ;;  %v266_v28 = vunpack.c.l.bf16 %v270_v23  ;;  %v267_v29 = vunpack.c.h.bf16 %v270_v23  ;;  %v329_v30 = vld [vmem:[%s430_s3 + $0x30] sm:$0xff]  }
   0x5   :  { %v38_v12 = vmul.f32 %v254_v6, %v37_v5  ;;  %v39_v13 = vmul.f32 %v255_v7, %v37_v5  ;;  %v327_v14 = vld [vmem:[%s430_s3 + $0x20] sm:$0xff]   ;;  %v42_v15 = vmul.f32 %v262_v10, %v37_v5  ;;  %v43_v16 = vmul.f32 %v263_v11, %v37_v5  ;;  %v330_v35 = vld [vmem:[%s430_s3 + $0x38] sm:$0xff]  }
   0x6   :  { %v40_v31 = vmul.f32 %v258_v26, %v37_v5  ;;  %v41_v32 = vmul.f32 %v259_v27, %v37_v5  ;;  %v44_v33 = vmul.f32 %v266_v28, %v37_v5  ;;  %v45_v34 = vmul.f32 %v267_v29, %v37_v5  ;;  %v235_v42 = vld [vmem:[%s434_s4] ss:$0 sm:$0xff] }
   0x7   :  { %286 = vmatpush3.bf16.msra.mxu0 %v324_v1  ;;  %316 = vmatpush3.bf16.msra.mxu1 %v324_v1  ;;  %v47_v17 = vadd.f32 %v46_v9, %v38_v12  ;;  %v48_v18 = vadd.f32 %v46_v9, %v39_v13  ;;  %v51_v19 = vadd.f32 %v46_v9, %v42_v15 }
   0x8   :  { %287 = vmatprep.subr.bf16.mxu0 %v325_v2  ;;  %309 = vmatprep.subr.bf16.mxu1 %v325_v2  ;;  %v52_v20 = vadd.f32 %v46_v9, %v43_v16  ;;  %v49_v36 = vadd.f32 %v46_v9, %v40_v31  ;;  %v50_v37 = vadd.f32 %v46_v9, %v41_v32 }
   0x9   :  { %v248_v21 = vpack.c.bf16 %v48_v18, %v47_v17  ;;  %v53_v38 = vadd.f32 %v46_v9, %v44_v33  ;;  %v54_v39 = vadd.f32 %v46_v9, %v45_v34 }
   0xa   :  { %v250_v25 = vpack.c.bf16 %v52_v20, %v51_v19  ;;  %v249_v40 = vpack.c.bf16 %v50_v37, %v49_v36 }
   0xb   :  { %288 = vmatpush3.bf16.msra.mxu0 %v325_v2  ;;  %317 = vmatpush3.bf16.msra.mxu1 %v325_v2  ;;  %v251_v41 = vpack.c.bf16 %v54_v39, %v53_v38 }
   0xc   :  { %289 = vmatprep.subr.bf16.mxu0 %v326_v3  ;;  %310 = vmatprep.subr.bf16.mxu1 %v326_v3 }
   0xd   :  { %299 = vmatprep.mubr.bf16.mxu0 %v248_v21  ;;  %303 = vmatprep.mubr.bf16.mxu1 %v250_v25 }
   0xf   :  { %290 = vmatpush3.bf16.msra.mxu0 %v326_v3  ;;  %318 = vmatpush3.bf16.msra.mxu1 %v326_v3 }
  0x10   :  { %291 = vmatprep.subr.bf16.mxu0 %v327_v14  ;;  %311 = vmatprep.subr.bf16.mxu1 %v327_v14 }
  0x13   :  { %292 = vmatpush3.bf16.msra.mxu0 %v327_v14  ;;  %319 = vmatpush3.bf16.msra.mxu1 %v327_v14 }
  0x14   :  { %293 = vmatprep.subr.bf16.mxu0 %v328_v24  ;;  %312 = vmatprep.subr.bf16.mxu1 %v328_v24 }
  0x17   :  { %294 = vmatpush3.bf16.msra.mxu0 %v328_v24  ;;  %320 = vmatpush3.bf16.msra.mxu1 %v328_v24 }
  0x18   :  { %295 = vmatprep.subr.bf16.mxu0 %v329_v30  ;;  %313 = vmatprep.subr.bf16.mxu1 %v329_v30 }
  0x1b   :  { %296 = vmatpush3.bf16.msra.mxu0 %v329_v30  ;;  %321 = vmatpush3.bf16.msra.mxu1 %v329_v30 }
  0x1c   :  { %297 = vmatprep.subr.bf16.mxu0 %v330_v35  ;;  %314 = vmatprep.subr.bf16.mxu1 %v330_v35 }
  0x1f   :  { %298 = vmatpush3.bf16.msra.mxu0 %v330_v35  ;;  %322 = vmatpush3.bf16.msra.mxu1 %v330_v35 }
  0x22   :  { %300 = vmatmul.mubr.bf16.vlgmr.msra.gmra.mrb[0].mxu0 %v249_v40  ;;  %304 = vmatmul.mubr.bf16.vlgmr.msra.gmra.mrb[0].mxu1 %v251_v41 }
  0xf5   :  { %v301_v43 = vpop.f32.mrb[0].mxu0  ;;  %v305_v44 = vpop.f32.mrb[0].mxu1 }
  0xf6   :  { %v201_v45 = vadd.f32 %v301_v43, %v235_v42  ;;  %v217_v46 = vadd.f32 %v305_v44, %v235_v42  ;;  %v192_v47 = vpop.f32.mrb[1].mxu0  ;;  %v208_v48 = vpop.f32.mrb[1].mxu1 }
  0xf7   :  { %v193_v49 = vadd.f32 %v235_v42, %v192_v47  ;;  %v209_v50 = vadd.f32 %v235_v42, %v208_v48  ;;  %v302_v51 = vpop.f32.mrb[2].mxu0  ;;  %v306_v52 = vpop.f32.mrb[2].mxu1 }
  0xf8   :  { %225 = vst [vmem:[%s435_s5 + $0x10] sm:$0xff] %v201_v45  ;;  %229 = vst [vmem:[%s435_s5 + $0x30] sm:$0xff] %v217_v46  ;;  %v204_v53 = vadd.f32 %v302_v51, %v235_v42  ;;  %v220_v54 = vadd.f32 %v306_v52, %v235_v42  ;;  %v195_v55 = vpop.f32.mrb[3].mxu0  ;;  %v211_v56 = vpop.f32.mrb[3].mxu1 }
  0xf9   :  { %223 = vst [vmem:[%s435_s5] sm:$0xff] %v193_v49  ;;  %227 = vst [vmem:[%s435_s5 + $0x20] sm:$0xff] %v209_v50  ;;  %v196_v57 = vadd.f32 %v235_v42, %v195_v55  ;;  %v212_v58 = vadd.f32 %v235_v42, %v211_v56 }
  0xfa   :  { %226 = vst [vmem:[%s435_s5 + $0x18] sm:$0xff] %v204_v53  ;;  %230 = vst [vmem:[%s435_s5 + $0x38] sm:$0xff] %v220_v54 }
  0xfb   :  { %224 = vst [vmem:[%s435_s5 + $0x8] sm:$0xff] %v196_v57  ;;  %228 = vst [vmem:[%s435_s5 + $0x28] sm:$0xff] %v212_v58 }

// kernel: blstm2_fc1_forward.7
= control target key start
LH: loop header
LB: loop body
LE: loop exit
PB: predicated region body
PF: predicated region fallthrough
CT: control target
= control target key end

     0   :  { %v735_v1 = vmov 0   ;;  %s979_s3 = inlined_call_operand.vmem [shape: bf16[128,512], index: 3, kind: input, shape index: {}]   ;;  %s980_s0 = inlined_call_operand.vmem [shape: bf16[8,8,128], index: 0, kind: input, shape index: {}]   ;;  %s981_s1 = inlined_call_operand.vmem [shape: f32[8,128], index: 1, kind: input, shape index: {}]   ;;  %s982_s2 = inlined_call_operand.vmem [shape: f32[8,128], index: 2, kind: input, shape index: {}]   ;;  %s983_s4 = inlined_call_operand.vmem [shape: f32[1,512], index: 4, kind: input, shape index: {}]   ;;  %s984_s5 = inlined_call_operand.vmem [shape: bf16[8,8,512], index: 5, kind: output, shape index: {}]  }
   0x1   :  { %v687_v0 = vld [vmem:[%s979_s3 + $0x4] ss:$16 sps:$4 sm:$0xff]   ;;  %333 = vmatprep.mubr.bf16.mxu0 %v735_v1  ;;  %406 = vmatprep.mubr.bf16.mxu1 %v735_v1  ;;  %v689_v2 = vld [vmem:[%s979_s3 + $0xc] ss:$16 sps:$4 sm:$0xff]   ;;  %v691_v3 = vld [vmem:[%s979_s3] ss:$16 sps:$4 sm:$0xff]  }
   0x2   :  { %301 = vmatprep.subr.bf16.mxu0 %v687_v0  ;;  %v692_v4 = vld [vmem:[%s979_s3 + $0x8] ss:$16 sps:$4 sm:$0xff]   ;;  %374 = vmatprep.subr.bf16.mxu1 %v689_v2  ;;  %v693_v5 = vld [vmem:[%s979_s3 + $0x24] ss:$16 sps:$4 sm:$0xff]   ;;  %v695_v6 = vld [vmem:[%s979_s3 + $0x2c] ss:$16 sps:$4 sm:$0xff]  }
   0x3   :  { %302 = vmatpush1.bf16.msra.mxu0 %v691_v3  ;;  %375 = vmatpush1.bf16.msra.mxu1 %v692_v4  ;;  %v697_v7 = vld [vmem:[%s979_s3 + $0x20] ss:$16 sps:$4 sm:$0xff]   ;;  %v698_v8 = vld [vmem:[%s979_s3 + $0x28] ss:$16 sps:$4 sm:$0xff]   ;;  %v699_v9 = vld [vmem:[%s979_s3 + $0x44] ss:$16 sps:$4 sm:$0xff]   ;;  %v97_v4 = vlaneseq }
   0x4   :  { %303 = vmatprep.subr.bf16.mxu0 %v693_v5  ;;  %376 = vmatprep.subr.bf16.mxu1 %v695_v6  ;;  %v701_v10 = vld [vmem:[%s979_s3 + $0x4c] ss:$16 sps:$4 sm:$0xff]   ;;  %v703_v11 = vld [vmem:[%s979_s3 + $0x40] ss:$16 sps:$4 sm:$0xff]   ;;  %v704_v12 = vld [vmem:[%s979_s3 + $0x48] ss:$16 sps:$4 sm:$0xff]  }
   0x5   :  { %v705_v13 = vld [vmem:[%s979_s3 + $0x64] ss:$16 sps:$4 sm:$0xff]   ;;  %v707_v14 = vld [vmem:[%s979_s3 + $0x6c] ss:$16 sps:$4 sm:$0xff]   ;;  %v709_v15 = vld [vmem:[%s979_s3 + $0x60] ss:$16 sps:$4 sm:$0xff]  }
   0x6   :  { %v710_v16 = vld [vmem:[%s979_s3 + $0x68] ss:$16 sps:$4 sm:$0xff]   ;;  %v711_v17 = vld [vmem:[%s979_s3 + $0x84] ss:$16 sps:$4 sm:$0xff]   ;;  %v713_v18 = vld [vmem:[%s979_s3 + $0x8c] ss:$16 sps:$4 sm:$0xff]  }
   0x7   :  { %304 = vmatpush1.bf16.msra.mxu0 %v697_v7  ;;  %377 = vmatpush1.bf16.msra.mxu1 %v698_v8  ;;  %v715_v19 = vld [vmem:[%s979_s3 + $0x80] ss:$16 sps:$4 sm:$0xff]   ;;  %v716_v20 = vld [vmem:[%s979_s3 + $0x88] ss:$16 sps:$4 sm:$0xff]   ;;  %v717_v21 = vld [vmem:[%s979_s3 + $0xa4] ss:$16 sps:$4 sm:$0xff]  }
   0x8   :  { %305 = vmatprep.subr.bf16.mxu0 %v699_v9  ;;  %378 = vmatprep.subr.bf16.mxu1 %v701_v10  ;;  %v719_v22 = vld [vmem:[%s979_s3 + $0xac] ss:$16 sps:$4 sm:$0xff]   ;;  %v721_v23 = vld [vmem:[%s979_s3 + $0xa0] ss:$16 sps:$4 sm:$0xff]   ;;  %v722_v24 = vld [vmem:[%s979_s3 + $0xa8] ss:$16 sps:$4 sm:$0xff]  }
   0x9   :  { %v723_v25 = vld [vmem:[%s979_s3 + $0xc4] ss:$16 sps:$4 sm:$0xff]   ;;  %v725_v26 = vld [vmem:[%s979_s3 + $0xcc] ss:$16 sps:$4 sm:$0xff]   ;;  %v727_v31 = vld [vmem:[%s979_s3 + $0xc0] ss:$16 sps:$4 sm:$0xff]  }
   0xa   :  { %v668_v27 = vld [vmem:[%s980_s0] sm:$0xff]   ;;  %v728_v32 = vld [vmem:[%s979_s3 + $0xc8] ss:$16 sps:$4 sm:$0xff]   ;;  %v731_v38 = vld [vmem:[%s979_s3 + $0xec] ss:$16 sps:$4 sm:$0xff]   ;;  %v98_v5 = vshrl.u32 %v97_v4, 7 }
   0xb   :  { %306 = vmatpush1.bf16.msra.mxu0 %v703_v11  ;;  %379 = vmatpush1.bf16.msra.mxu1 %v704_v12  ;;  %v37_v28 = vld [vmem:[%s981_s1] sm:$0xff]  ;;  %v669_v29 = vunpack.c.l.bf16 %v668_v27  ;;  %v670_v30 = vunpack.c.h.bf16 %v668_v27  ;;  %v683_v36 = vld [vmem:[%s980_s0 + $0x8] sm:$0xff]   ;;  %v684_v48 = vld [vmem:[%s980_s0 + $0x10] sm:$0xff]  }
   0xc   :  { %307 = vmatprep.subr.bf16.mxu0 %v705_v13  ;;  %380 = vmatprep.subr.bf16.mxu1 %v707_v14  ;;  %v46_v35 = vld [vmem:[%s982_s2] sm:$0xff]  ;;  %v673_v41 = vunpack.c.l.bf16 %v683_v36  ;;  %v674_v42 = vunpack.c.h.bf16 %v683_v36  ;;  %v734_v44 = vld [vmem:[%s979_s3 + $0xe8] ss:$16 sps:$4 sm:$0xff]   ;;  %v677_v51 = vunpack.c.l.bf16 %v684_v48  ;;  %v678_v52 = vunpack.c.h.bf16 %v684_v48 }
   0xd   :  { %v38_v33 = vmul.f32 %v669_v29, %v37_v28  ;;  %v39_v34 = vmul.f32 %v670_v30, %v37_v28  ;;  %v729_v37 = vld [vmem:[%s979_s3 + $0xe4] ss:$16 sps:$4 sm:$0xff]   ;;  %v733_v43 = vld [vmem:[%s979_s3 + $0xe0] ss:$16 sps:$4 sm:$0xff]   ;;  %v685_v56 = vld [vmem:[%s980_s0 + $0x18] sm:$0xff]   ;;  %v99_v6 = vsub.s32 0, %v98_v5 }
   0xe   :  { %v40_v46 = vmul.f32 %v673_v41, %v37_v28  ;;  %v41_v47 = vmul.f32 %v674_v42, %v37_v28  ;;  %v42_v54 = vmul.f32 %v677_v51, %v37_v28  ;;  %v43_v55 = vmul.f32 %v678_v52, %v37_v28  ;;  %v95_v8 = vld [vmem:[%s983_s4] sm:$0xf] }
   0xf   :  { %308 = vmatpush1.bf16.msra.mxu0 %v709_v15  ;;  %381 = vmatpush1.bf16.msra.mxu1 %v710_v16  ;;  %v47_v39 = vadd.f32 %v46_v35, %v38_v33  ;;  %v48_v40 = vadd.f32 %v46_v35, %v39_v34  ;;  %v681_v59 = vunpack.c.l.bf16 %v685_v56  ;;  %v682_v60 = vunpack.c.h.bf16 %v685_v56 }
  0x10   :  { %309 = vmatprep.subr.bf16.mxu0 %v711_v17  ;;  %382 = vmatprep.subr.bf16.mxu1 %v713_v18  ;;  %v49_v49 = vadd.f32 %v46_v35, %v40_v46  ;;  %v50_v50 = vadd.f32 %v46_v35, %v41_v47  ;;  %v51_v57 = vadd.f32 %v46_v35, %v42_v54  ;;  %v107_v7 = vsub.s32 2, %v98_v5 }
  0x11   :  { %v647_v45 = vpack.c.bf16 %v48_v40, %v47_v39  ;;  %v52_v58 = vadd.f32 %v46_v35, %v43_v55  ;;  %v44_v62 = vmul.f32 %v681_v59, %v37_v28  ;;  %v45_v63 = vmul.f32 %v682_v60, %v37_v28 }
  0x12   :  { %v648_v53 = vpack.c.bf16 %v50_v50, %v49_v49  ;;  %v103_v9 = vsub.s32 1, %v98_v5  ;;  %v111_v10 = vsub.s32 3, %v98_v5  ;;  %v891_v11 = vrot.slane %v95_v8, %v99_v6 }
  0x13   :  { %310 = vmatpush1.bf16.msra.mxu0 %v715_v19  ;;  %383 = vmatpush1.bf16.msra.mxu1 %v716_v20  ;;  %v649_v61 = vpack.c.bf16 %v52_v58, %v51_v57  ;;  %v53_v0 = vadd.f32 %v46_v35, %v44_v62  ;;  %v54_v2 = vadd.f32 %v46_v35, %v45_v63 }
  0x14   :  { %311 = vmatprep.subr.bf16.mxu0 %v717_v21  ;;  %384 = vmatprep.subr.bf16.mxu1 %v719_v22  ;;  %v893_v12 = vrot.slane %v95_v8, %v107_v7  ;;  %v895_v13 = vrot.slane %v95_v8, %v103_v9 }
  0x15   :  { %v650_v3 = vpack.c.bf16 %v54_v2, %v53_v0 }
  0x17   :  { %312 = vmatpush1.bf16.msra.mxu0 %v721_v23  ;;  %385 = vmatpush1.bf16.msra.mxu1 %v722_v24 }
  0x18   :  { %313 = vmatprep.subr.bf16.mxu0 %v723_v25  ;;  %386 = vmatprep.subr.bf16.mxu1 %v725_v26 }
  0x1b   :  { %314 = vmatpush1.bf16.msra.mxu0 %v727_v31  ;;  %387 = vmatpush1.bf16.msra.mxu1 %v728_v32 }
  0x1c   :  { %315 = vmatprep.subr.bf16.mxu0 %v729_v37  ;;  %388 = vmatprep.subr.bf16.mxu1 %v731_v38 }
  0x1f   :  { %316 = vmatpush1.bf16.msra.mxu0 %v733_v43  ;;  %389 = vmatpush1.bf16.msra.mxu1 %v734_v44 }
  0x22   :  { %334 = vmatmul.mubr.bf16.vlgmr.msra.gmra.mrb[0].mxu0 %v647_v45  ;;  %407 = vmatmul.mubr.bf16.vlgmr.msra.gmra.mrb[0].mxu1 %v647_v45 }
  0x23   :  { %343 = vmatprep.mubr.bf16.mxu0 %v735_v1  ;;  %416 = vmatprep.mubr.bf16.mxu1 %v735_v1 }
  0x2a   :  { %344 = vmatmul.mubr.bf16.gmra.mrb[4].mxu0 %v648_v53  ;;  %417 = vmatmul.mubr.bf16.gmra.mrb[4].mxu1 %v648_v53 }
  0x2b   :  { %353 = vmatprep.mubr.bf16.mxu0 %v735_v1  ;;  %426 = vmatprep.mubr.bf16.mxu1 %v735_v1 }
  0x32   :  { %354 = vmatmul.mubr.bf16.gmra.mrb[8].mxu0 %v649_v61  ;;  %427 = vmatmul.mubr.bf16.gmra.mrb[8].mxu1 %v649_v61 }
  0x33   :  { %363 = vmatprep.mubr.bf16.mxu0 %v735_v1  ;;  %436 = vmatprep.mubr.bf16.mxu1 %v735_v1  ;;  %v897_v1 = vrot.slane %v95_v8, %v111_v10 }
  0x3a   :  { %364 = vmatmul.mubr.bf16.gmra.mrb[12].mxu0 %v650_v3  ;;  %437 = vmatmul.mubr.bf16.gmra.mrb[12].mxu1 %v650_v3 }
  0xf5   :  { %v335_v14 = vpop.f32.mrb[0].mxu0  ;;  %v408_v15 = vpop.f32.mrb[0].mxu1 }
  0xf6   :  { %v336_v16 = vadd.f32 %v335_v14, %v891_v11  ;;  %v409_v17 = vadd.f32 %v408_v15, %v893_v12  ;;  %v337_v18 = vpop.f32.mrb[1].mxu0  ;;  %v410_v19 = vpop.f32.mrb[1].mxu1 }
  0xf7   :  { %v338_v20 = vadd.f32 %v337_v18, %v895_v13  ;;  %v411_v21 = vadd.f32 %v410_v19, %v897_v1  ;;  %v339_v22 = vpop.f32.mrb[2].mxu0  ;;  %v412_v23 = vpop.f32.mrb[2].mxu1 }
  0xf8   :  { %v340_v24 = vadd.f32 %v339_v22, %v891_v11  ;;  %v413_v25 = vadd.f32 %v412_v23, %v893_v12  ;;  %v341_v26 = vpop.f32.mrb[3].mxu0  ;;  %v414_v27 = vpop.f32.mrb[3].mxu1 }
  0xf9   :  { %v651_v28 = vpack.c.bf16 %v338_v20, %v336_v16  ;;  %v652_v29 = vpack.c.bf16 %v411_v21, %v409_v17  ;;  %v342_v30 = vadd.f32 %v341_v26, %v895_v13  ;;  %v415_v31 = vadd.f32 %v414_v27, %v897_v1 }
  0xfb   :  { %575 = vst [vmem:[%s984_s5] sm:$0xff] %v651_v28  ;;  %576 = vst [vmem:[%s984_s5 + $0x8] sm:$0xff] %v652_v29  ;;  %v653_v32 = vpack.c.bf16 %v342_v30, %v340_v24  ;;  %v654_v33 = vpack.c.bf16 %v415_v31, %v413_v25 }
  0xfd   :  { %577 = vst [vmem:[%s984_s5 + $0x10] sm:$0xff] %v653_v32  ;;  %578 = vst [vmem:[%s984_s5 + $0x18] sm:$0xff] %v654_v33  ;;  %v345_v34 = vpop.f32.mrb[4].mxu0  ;;  %v418_v35 = vpop.f32.mrb[4].mxu1 }
  0xfe   :  { %v346_v36 = vadd.f32 %v345_v34, %v891_v11  ;;  %v419_v37 = vadd.f32 %v418_v35, %v893_v12  ;;  %v347_v38 = vpop.f32.mrb[5].mxu0  ;;  %v420_v39 = vpop.f32.mrb[5].mxu1 }
  0xff   :  { %v348_v40 = vadd.f32 %v347_v38, %v895_v13  ;;  %v421_v41 = vadd.f32 %v420_v39, %v897_v1  ;;  %v349_v42 = vpop.f32.mrb[6].mxu0  ;;  %v422_v43 = vpop.f32.mrb[6].mxu1 }
 0x100   :  { %v350_v44 = vadd.f32 %v349_v42, %v891_v11  ;;  %v423_v45 = vadd.f32 %v422_v43, %v893_v12  ;;  %v351_v46 = vpop.f32.mrb[7].mxu0  ;;  %v424_v47 = vpop.f32.mrb[7].mxu1 }
 0x101   :  { %v655_v48 = vpack.c.bf16 %v348_v40, %v346_v36  ;;  %v656_v49 = vpack.c.bf16 %v421_v41, %v419_v37  ;;  %v352_v50 = vadd.f32 %v351_v46, %v895_v13  ;;  %v425_v51 = vadd.f32 %v424_v47, %v897_v1 }
 0x103   :  { %579 = vst [vmem:[%s984_s5 + $0x20] sm:$0xff] %v655_v48  ;;  %580 = vst [vmem:[%s984_s5 + $0x28] sm:$0xff] %v656_v49  ;;  %v657_v52 = vpack.c.bf16 %v352_v50, %v350_v44  ;;  %v658_v53 = vpack.c.bf16 %v425_v51, %v423_v45 }
 0x105   :  { %581 = vst [vmem:[%s984_s5 + $0x30] sm:$0xff] %v657_v52  ;;  %582 = vst [vmem:[%s984_s5 + $0x38] sm:$0xff] %v658_v53  ;;  %v355_v54 = vpop.f32.mrb[8].mxu0  ;;  %v428_v55 = vpop.f32.mrb[8].mxu1 }
 0x106   :  { %v356_v56 = vadd.f32 %v355_v54, %v891_v11  ;;  %v429_v57 = vadd.f32 %v428_v55, %v893_v12  ;;  %v357_v58 = vpop.f32.mrb[9].mxu0  ;;  %v430_v59 = vpop.f32.mrb[9].mxu1 }
 0x107   :  { %v358_v60 = vadd.f32 %v357_v58, %v895_v13  ;;  %v431_v61 = vadd.f32 %v430_v59, %v897_v1  ;;  %v359_v62 = vpop.f32.mrb[10].mxu0  ;;  %v432_v63 = vpop.f32.mrb[10].mxu1 }
 0x108   :  { %v360_v0 = vadd.f32 %v359_v62, %v891_v11  ;;  %v433_v2 = vadd.f32 %v432_v63, %v893_v12  ;;  %v361_v3 = vpop.f32.mrb[11].mxu0  ;;  %v434_v4 = vpop.f32.mrb[11].mxu1 }
 0x109   :  { %v659_v5 = vpack.c.bf16 %v358_v60, %v356_v56  ;;  %v660_v6 = vpack.c.bf16 %v431_v61, %v429_v57  ;;  %v362_v7 = vadd.f32 %v361_v3, %v895_v13  ;;  %v435_v8 = vadd.f32 %v434_v4, %v897_v1 }
 0x10b   :  { %583 = vst [vmem:[%s984_s5 + $0x40] sm:$0xff] %v659_v5  ;;  %584 = vst [vmem:[%s984_s5 + $0x48] sm:$0xff] %v660_v6  ;;  %v661_v9 = vpack.c.bf16 %v362_v7, %v360_v0  ;;  %v662_v10 = vpack.c.bf16 %v435_v8, %v433_v2 }
 0x10d   :  { %585 = vst [vmem:[%s984_s5 + $0x50] sm:$0xff] %v661_v9  ;;  %586 = vst [vmem:[%s984_s5 + $0x58] sm:$0xff] %v662_v10  ;;  %v365_v14 = vpop.f32.mrb[12].mxu0  ;;  %v438_v15 = vpop.f32.mrb[12].mxu1 }
 0x10e   :  { %v366_v16 = vadd.f32 %v365_v14, %v891_v11  ;;  %v439_v17 = vadd.f32 %v438_v15, %v893_v12  ;;  %v367_v18 = vpop.f32.mrb[13].mxu0  ;;  %v440_v19 = vpop.f32.mrb[13].mxu1 }
 0x10f   :  { %v368_v20 = vadd.f32 %v367_v18, %v895_v13  ;;  %v441_v21 = vadd.f32 %v440_v19, %v897_v1  ;;  %v369_v22 = vpop.f32.mrb[14].mxu0  ;;  %v442_v23 = vpop.f32.mrb[14].mxu1 }
 0x110   :  { %v370_v24 = vadd.f32 %v369_v22, %v891_v11  ;;  %v443_v25 = vadd.f32 %v442_v23, %v893_v12  ;;  %v371_v26 = vpop.f32.mrb[15].mxu0  ;;  %v444_v27 = vpop.f32.mrb[15].mxu1 }
 0x111   :  { %v663_v28 = vpack.c.bf16 %v368_v20, %v366_v16  ;;  %v664_v29 = vpack.c.bf16 %v441_v21, %v439_v17  ;;  %v372_v30 = vadd.f32 %v371_v26, %v895_v13  ;;  %v445_v31 = vadd.f32 %v444_v27, %v897_v1 }
 0x113   :  { %587 = vst [vmem:[%s984_s5 + $0x60] sm:$0xff] %v663_v28  ;;  %588 = vst [vmem:[%s984_s5 + $0x68] sm:$0xff] %v664_v29  ;;  %v665_v32 = vpack.c.bf16 %v372_v30, %v370_v24  ;;  %v666_v11 = vpack.c.bf16 %v445_v31, %v443_v25 }
 0x115   :  { %589 = vst [vmem:[%s984_s5 + $0x70] sm:$0xff] %v665_v32  ;;  %590 = vst [vmem:[%s984_s5 + $0x78] sm:$0xff] %v666_v11 }

// kernel: blstm2_fc1_forward.6
= control target key start
LH: loop header
LB: loop body
LE: loop exit
PB: predicated region body
PF: predicated region fallthrough
CT: control target
= control target key end

     0   :  { %v1564_v1 = vmov 0   ;;  %v1565_v33 = vmov 0.0|0.0   ;;  %s2242_s1 = inlined_call_operand.vmem [shape: bf16[128,512], index: 1, kind: input, shape index: {}]   ;;  %s2243_s0 = inlined_call_operand.vmem [shape: bf16[8,8,512], index: 0, kind: input, shape index: {}]   ;;  %s2244_s2 = inlined_call_operand.vmem [shape: bf16[8,8,128], index: 2, kind: output, shape index: {0}]   ;;  %s2245_s3 = inlined_call_operand.vmem [shape: f32[8,128], index: 3, kind: output, shape index: {1}]   ;;  %s2246_s4 = inlined_call_operand.vmem [shape: f32[8,128], index: 4, kind: output, shape index: {2}]  }
   0x1   :  { %v1594_v0 = vld [vmem:[%s2242_s1 + $0x4] ss:$16 sps:$4 sm:$0xff]   ;;  %256 = vmatprep.mubr.bf16.mxu0 %v1564_v1  ;;  %297 = vmatprep.mubr.bf16.mxu1 %v1564_v1  ;;  %v1601_v2 = vld [vmem:[%s2242_s1] ss:$16 sps:$4 sm:$0xff]   ;;  %v1624_v6 = vld [vmem:[%s2242_s1 + $0xc] ss:$16 sps:$4 sm:$0xff]  }
   0x2   :  { %224 = vmatprep.subr.bf16.mxu0 %v1594_v0  ;;  %v1607_v3 = vld [vmem:[%s2242_s1 + $0x24] ss:$16 sps:$4 sm:$0xff]   ;;  %v1613_v4 = vld [vmem:[%s2242_s1 + $0x20] ss:$16 sps:$4 sm:$0xff]   ;;  %v1629_v7 = vld [vmem:[%s2242_s1 + $0x8] ss:$16 sps:$4 sm:$0xff]   ;;  %265 = vmatprep.subr.bf16.mxu1 %v1624_v6 }
   0x3   :  { %225 = vmatpush1.bf16.msra.mxu0 %v1601_v2  ;;  %v1619_v5 = vld [vmem:[%s2242_s1 + $0x44] ss:$16 sps:$4 sm:$0xff]   ;;  %v1635_v8 = vld [vmem:[%s2242_s1 + $0x40] ss:$16 sps:$4 sm:$0xff]   ;;  %266 = vmatpush1.bf16.msra.mxu1 %v1629_v7  ;;  %v1648_v10 = vld [vmem:[%s2242_s1 + $0x2c] ss:$16 sps:$4 sm:$0xff]  }
   0x4   :  { %226 = vmatprep.subr.bf16.mxu0 %v1607_v3  ;;  %v1642_v9 = vld [vmem:[%s2242_s1 + $0x64] ss:$16 sps:$4 sm:$0xff]   ;;  %v1653_v11 = vld [vmem:[%s2242_s1 + $0x28] ss:$16 sps:$4 sm:$0xff]   ;;  %267 = vmatprep.subr.bf16.mxu1 %v1648_v10  ;;  %v1660_v12 = vld [vmem:[%s2242_s1 + $0x60] ss:$16 sps:$4 sm:$0xff]  }
   0x5   :  { %v1665_v13 = vld [vmem:[%s2242_s1 + $0x84] ss:$16 sps:$4 sm:$0xff]   ;;  %v1670_v14 = vld [vmem:[%s2242_s1 + $0x4c] ss:$16 sps:$4 sm:$0xff]   ;;  %v1677_v15 = vld [vmem:[%s2242_s1 + $0x48] ss:$16 sps:$4 sm:$0xff]  }
   0x6   :  { %v1683_v16 = vld [vmem:[%s2242_s1 + $0x6c] ss:$16 sps:$4 sm:$0xff]   ;;  %v1689_v17 = vld [vmem:[%s2242_s1 + $0x80] ss:$16 sps:$4 sm:$0xff]   ;;  %v1695_v18 = vld [vmem:[%s2242_s1 + $0xa4] ss:$16 sps:$4 sm:$0xff]  }
   0x7   :  { %227 = vmatpush1.bf16.msra.mxu0 %v1613_v4  ;;  %268 = vmatpush1.bf16.msra.mxu1 %v1653_v11  ;;  %v1701_v19 = vld [vmem:[%s2242_s1 + $0x68] ss:$16 sps:$4 sm:$0xff]   ;;  %v1707_v20 = vld [vmem:[%s2242_s1 + $0x8c] ss:$16 sps:$4 sm:$0xff]   ;;  %v1713_v21 = vld [vmem:[%s2242_s1 + $0xa0] ss:$16 sps:$4 sm:$0xff]  }
   0x8   :  { %228 = vmatprep.subr.bf16.mxu0 %v1619_v5  ;;  %269 = vmatprep.subr.bf16.mxu1 %v1670_v14  ;;  %v1718_v22 = vld [vmem:[%s2242_s1 + $0xc4] ss:$16 sps:$4 sm:$0xff]   ;;  %v1725_v23 = vld [vmem:[%s2242_s1 + $0x88] ss:$16 sps:$4 sm:$0xff]   ;;  %v1731_v24 = vld [vmem:[%s2242_s1 + $0xac] ss:$16 sps:$4 sm:$0xff]  }
   0x9   :  { %v1737_v25 = vld [vmem:[%s2242_s1 + $0xc0] ss:$16 sps:$4 sm:$0xff]   ;;  %v1743_v26 = vld [vmem:[%s2242_s1 + $0xe4] ss:$16 sps:$4 sm:$0xff]   ;;  %v1749_v27 = vld [vmem:[%s2242_s1 + $0xa8] ss:$16 sps:$4 sm:$0xff]  }
   0xa   :  { %v1755_v28 = vld [vmem:[%s2242_s1 + $0xcc] ss:$16 sps:$4 sm:$0xff]   ;;  %v1761_v29 = vld [vmem:[%s2242_s1 + $0xe0] ss:$16 sps:$4 sm:$0xff]   ;;  %v1768_v30 = vld [vmem:[%s2242_s1 + $0xc8] ss:$16 sps:$4 sm:$0xff]  }
   0xb   :  { %229 = vmatpush1.bf16.msra.mxu0 %v1635_v8  ;;  %270 = vmatpush1.bf16.msra.mxu1 %v1677_v15  ;;  %v1774_v31 = vld [vmem:[%s2242_s1 + $0xec] ss:$16 sps:$4 sm:$0xff]   ;;  %v1781_v32 = vld [vmem:[%s2242_s1 + $0xe8] ss:$16 sps:$4 sm:$0xff]   ;;  %v57_v34 = vld [vmem:[%s2243_s0] sm:$0xff] }
   0xc   :  { %230 = vmatprep.subr.bf16.mxu0 %v1642_v9  ;;  %271 = vmatprep.subr.bf16.mxu1 %v1683_v16  ;;  %v59_v35 = vunpack.c.l.bf16 %v57_v34  ;;  %v60_v36 = vunpack.c.h.bf16 %v57_v34  ;;  %v58_v38 = vld [vmem:[%s2243_s0 + $0x8] sm:$0xff] }
   0xd   :  { %v62_v45 = vunpack.c.h.bf16 %v58_v38  ;;  %v61_v51 = vunpack.c.l.bf16 %v58_v38 }
   0xf   :  { %231 = vmatpush1.bf16.msra.mxu0 %v1660_v12  ;;  %272 = vmatpush1.bf16.msra.mxu1 %v1701_v19 }
  0x10   :  { %232 = vmatprep.subr.bf16.mxu0 %v1665_v13  ;;  %273 = vmatprep.subr.bf16.mxu1 %v1707_v20 }
  0x13   :  { %233 = vmatpush1.bf16.msra.mxu0 %v1689_v17  ;;  %274 = vmatpush1.bf16.msra.mxu1 %v1725_v23 }
  0x14   :  { %234 = vmatprep.subr.bf16.mxu0 %v1695_v18  ;;  %275 = vmatprep.subr.bf16.mxu1 %v1731_v24 }
  0x17   :  { %235 = vmatpush1.bf16.msra.mxu0 %v1713_v21  ;;  %276 = vmatpush1.bf16.msra.mxu1 %v1749_v27 }
  0x18   :  { %236 = vmatprep.subr.bf16.mxu0 %v1718_v22  ;;  %277 = vmatprep.subr.bf16.mxu1 %v1755_v28 }
  0x1b   :  { %237 = vmatpush1.bf16.msra.mxu0 %v1737_v25  ;;  %278 = vmatpush1.bf16.msra.mxu1 %v1768_v30 }
  0x1c   :  { %238 = vmatprep.subr.bf16.mxu0 %v1743_v26  ;;  %279 = vmatprep.subr.bf16.mxu1 %v1774_v31 }
  0x1f   :  { %239 = vmatpush1.bf16.msra.mxu0 %v1761_v29  ;;  %280 = vmatpush1.bf16.msra.mxu1 %v1781_v32 }
  0x20   :  { %353 = vmatprep.subr.bf16.mxu0 %v1594_v0  ;;  %394 = vmatprep.subr.bf16.mxu1 %v1624_v6 }
  0x22   :  { %257 = vmatmul.mubr.bf16.vlgmr.msra.gmra.mrb[0].mxu0 %v1565_v33  ;;  %298 = vmatmul.mubr.bf16.vlgmr.msra.gmra.mrb[0].mxu1 %v1565_v33 }
  0x23   :  { %354 = vmatpush1.bf16.msra.mxu0 %v1601_v2  ;;  %385 = vmatprep.mubr.bf16.mxu0 %v1564_v1 }
  0x24   :  { %355 = vmatprep.subr.bf16.mxu0 %v1607_v3  ;;  %395 = vmatpush1.bf16.msra.mxu1 %v1629_v7 }
  0x25   :  { %396 = vmatprep.subr.bf16.mxu1 %v1648_v10  ;;  %426 = vmatprep.mubr.bf16.mxu1 %v1564_v1 }
  0x27   :  { %356 = vmatpush1.bf16.msra.mxu0 %v1613_v4 }
  0x28   :  { %357 = vmatprep.subr.bf16.mxu0 %v1619_v5  ;;  %397 = vmatpush1.bf16.msra.mxu1 %v1653_v11 }
  0x29   :  { %398 = vmatprep.subr.bf16.mxu1 %v1670_v14 }
  0x2b   :  { %358 = vmatpush1.bf16.msra.mxu0 %v1635_v8 }
  0x2c   :  { %359 = vmatprep.subr.bf16.mxu0 %v1642_v9  ;;  %399 = vmatpush1.bf16.msra.mxu1 %v1677_v15 }
  0x2d   :  { %400 = vmatprep.subr.bf16.mxu1 %v1683_v16 }
  0x2f   :  { %360 = vmatpush1.bf16.msra.mxu0 %v1660_v12 }
  0x30   :  { %361 = vmatprep.subr.bf16.mxu0 %v1665_v13  ;;  %401 = vmatpush1.bf16.msra.mxu1 %v1701_v19 }
  0x31   :  { %402 = vmatprep.subr.bf16.mxu1 %v1707_v20 }
  0x33   :  { %362 = vmatpush1.bf16.msra.mxu0 %v1689_v17 }
  0x34   :  { %363 = vmatprep.subr.bf16.mxu0 %v1695_v18  ;;  %403 = vmatpush1.bf16.msra.mxu1 %v1725_v23 }
  0x35   :  { %404 = vmatprep.subr.bf16.mxu1 %v1731_v24 }
  0x37   :  { %364 = vmatpush1.bf16.msra.mxu0 %v1713_v21 }
  0x38   :  { %365 = vmatprep.subr.bf16.mxu0 %v1718_v22  ;;  %405 = vmatpush1.bf16.msra.mxu1 %v1749_v27 }
  0x39   :  { %406 = vmatprep.subr.bf16.mxu1 %v1755_v28 }
  0x3b   :  { %366 = vmatpush1.bf16.msra.mxu0 %v1737_v25 }
  0x3c   :  { %367 = vmatprep.subr.bf16.mxu0 %v1743_v26  ;;  %407 = vmatpush1.bf16.msra.mxu1 %v1768_v30 }
  0x3d   :  { %408 = vmatprep.subr.bf16.mxu1 %v1774_v31 }
  0x3f   :  { %368 = vmatpush1.bf16.msra.mxu0 %v1761_v29 }
  0x40   :  { %483 = vmatprep.subr.bf16.mxu0 %v1594_v0  ;;  %409 = vmatpush1.bf16.msra.mxu1 %v1781_v32 }
  0x41   :  { %524 = vmatprep.subr.bf16.mxu1 %v1624_v6 }
  0xf5   :  { %v258_v37 = vpop.f32.mrb[0].mxu0  ;;  %v299_v47 = vpop.f32.mrb[0].mxu1 }
  0xf6   :  { %v306_v39 = vadd.f32 %v258_v37, %v59_v35  ;;  %v260_v40 = vpop.f32.mrb[1].mxu0  ;;  %v301_v48 = vpop.f32.mrb[1].mxu1  ;;  %v308_v54 = vadd.f32 %v299_v47, %v61_v51 }
  0xf7   :  { %v307_v41 = vadd.f32 %v260_v40, %v60_v36  ;;  %v262_v42 = vpop.f32.mrb[2].mxu0  ;;  %v309_v49 = vadd.f32 %v301_v48, %v62_v45  ;;  %v303_v50 = vpop.f32.mrb[2].mxu1  ;;  %v1311_v40 = vld [vmem:[%s2243_s0 + $0x10] sm:$0xff] }
  0xf8   :  { %v1308_v43 = vmul.f32 -1.442695, %v306_v39  ;;  %v263_v44 = vpop.f32.mrb[3].mxu0  ;;  %v304_v52 = vpop.f32.mrb[3].mxu1  ;;  %v350_v42 = vunpack.c.h.bf16 %v1311_v40 }
  0xf9   :  { %v1309_v46 = vmul.f32 -1.442695, %v307_v41  ;;  %v1310_v53 = vmul.f32 -1.442695, %v309_v49  ;;  %v349_v41 = vunpack.c.l.bf16 %v1311_v40 }
  0xfa   :  { %1404 = vpow2.f32 %v1308_v43 }
  0xfb   :  { %1406 = vpow2.f32 %v1309_v46  ;;  %v1312_v46 = vld [vmem:[%s2243_s0 + $0x18] sm:$0xff] }
  0xfc   :  { %1408 = vpow2.f32 %v1310_v53 }
  0xfd   :  { %1410 = vtanh.f32 %v308_v54 }
 0x104   :  { %v1405_v55 = vpop.eup %1404 }
 0x105   :  { %v1407_v56 = vpop.eup %1406  ;;  %v313_v57 = vadd.f32 1.0, %v1405_v55 }
 0x106   :  { %v319_v58 = vadd.f32 1.0, %v1407_v56  ;;  %v1409_v59 = vpop.eup %1408  ;;  %v352_v56 = vunpack.c.h.bf16 %v1312_v46 }
 0x107   :  { %1412 = vrcp.f32 %v313_v57  ;;  %v1411_v60 = vpop.eup %1410  ;;  %v326_v62 = vadd.f32 1.0, %v1409_v59 }
 0x108   :  { %1414 = vrcp.f32 %v319_v58  ;;  %v351_v58 = vunpack.c.l.bf16 %v1312_v46 }
 0x109   :  { %1416 = vrcp.f32 %v326_v62 }
 0x111   :  { %v1413_v61 = vpop.eup %1412 }
 0x112   :  { %v1415_v63 = vpop.eup %1414  ;;  %v330_v33 = vmul.f32 %v1413_v61, %v1411_v60 }
 0x113   :  { %v329_v34 = vmul.f32 0.0, %v1415_v63  ;;  %v1417_v36 = vpop.eup %1416 }
 0x115   :  { %v1827_v35 = vadd.f32 %v330_v33, %v329_v34 }
 0x117   :  { %1418 = vtanh.f32 %v1827_v35 }
 0x121   :  { %v1419_v37 = vpop.eup %1418 }
 0x122   :  { %v1830_v38 = vmul.f32 %v1419_v37, %v1417_v36 }
 0x124   :  { %v334_v39 = vpack.c.bf16 %v1830_v38, %v1830_v38 }
 0x126   :  { %335 = vst [vmem:[%s2244_s2] sm:$0xf] %v334_v39  ;;  %386 = vmatmul.mubr.bf16.vlgmr.msra.gmra.mrb[4].mxu0 %v334_v39  ;;  %427 = vmatmul.mubr.bf16.vlgmr.msra.gmra.mrb[4].mxu1 %v334_v39 }
 0x127   :  { %484 = vmatpush1.bf16.msra.mxu0 %v1601_v2  ;;  %525 = vmatpush1.bf16.msra.mxu1 %v1629_v7 }
 0x128   :  { %485 = vmatprep.subr.bf16.mxu0 %v1607_v3  ;;  %526 = vmatprep.subr.bf16.mxu1 %v1648_v10 }
 0x129   :  { %515 = vmatprep.mubr.bf16.mxu0 %v1564_v1  ;;  %556 = vmatprep.mubr.bf16.mxu1 %v1564_v1 }
 0x12b   :  { %486 = vmatpush1.bf16.msra.mxu0 %v1613_v4  ;;  %527 = vmatpush1.bf16.msra.mxu1 %v1653_v11 }
 0x12c   :  { %487 = vmatprep.subr.bf16.mxu0 %v1619_v5  ;;  %528 = vmatprep.subr.bf16.mxu1 %v1670_v14 }
 0x12f   :  { %488 = vmatpush1.bf16.msra.mxu0 %v1635_v8  ;;  %529 = vmatpush1.bf16.msra.mxu1 %v1677_v15 }
 0x130   :  { %489 = vmatprep.subr.bf16.mxu0 %v1642_v9  ;;  %530 = vmatprep.subr.bf16.mxu1 %v1683_v16 }
 0x133   :  { %490 = vmatpush1.bf16.msra.mxu0 %v1660_v12  ;;  %531 = vmatpush1.bf16.msra.mxu1 %v1701_v19 }
 0x134   :  { %491 = vmatprep.subr.bf16.mxu0 %v1665_v13  ;;  %532 = vmatprep.subr.bf16.mxu1 %v1707_v20 }
 0x137   :  { %492 = vmatpush1.bf16.msra.mxu0 %v1689_v17  ;;  %533 = vmatpush1.bf16.msra.mxu1 %v1725_v23 }
 0x138   :  { %493 = vmatprep.subr.bf16.mxu0 %v1695_v18  ;;  %534 = vmatprep.subr.bf16.mxu1 %v1731_v24 }
 0x13b   :  { %494 = vmatpush1.bf16.msra.mxu0 %v1713_v21  ;;  %535 = vmatpush1.bf16.msra.mxu1 %v1749_v27 }
 0x13c   :  { %495 = vmatprep.subr.bf16.mxu0 %v1718_v22  ;;  %536 = vmatprep.subr.bf16.mxu1 %v1755_v28 }
 0x13f   :  { %496 = vmatpush1.bf16.msra.mxu0 %v1737_v25  ;;  %537 = vmatpush1.bf16.msra.mxu1 %v1768_v30 }
 0x140   :  { %497 = vmatprep.subr.bf16.mxu0 %v1743_v26  ;;  %538 = vmatprep.subr.bf16.mxu1 %v1774_v31 }
 0x143   :  { %498 = vmatpush1.bf16.msra.mxu0 %v1761_v29  ;;  %539 = vmatpush1.bf16.msra.mxu1 %v1781_v32 }
 0x144   :  { %613 = vmatprep.subr.bf16.mxu0 %v1594_v0  ;;  %654 = vmatprep.subr.bf16.mxu1 %v1624_v6 }
 0x1f9   :  { %v387_v43 = vpop.f32.mrb[4].mxu0  ;;  %v428_v44 = vpop.f32.mrb[4].mxu1 }
 0x1fa   :  { %v435_v45 = vadd.f32 %v387_v43, %v349_v41  ;;  %v389_v47 = vpop.f32.mrb[5].mxu0  ;;  %v430_v48 = vpop.f32.mrb[5].mxu1  ;;  %v437_v60 = vadd.f32 %v428_v44, %v351_v58 }
 0x1fb   :  { %v436_v49 = vadd.f32 %v389_v47, %v350_v42  ;;  %v391_v50 = vpop.f32.mrb[6].mxu0  ;;  %v432_v51 = vpop.f32.mrb[6].mxu1  ;;  %v438_v57 = vadd.f32 %v430_v48, %v352_v56 }
 0x1fc   :  { %v1313_v52 = vmul.f32 -1.442695, %v435_v45  ;;  %v392_v53 = vpop.f32.mrb[7].mxu0  ;;  %v433_v54 = vpop.f32.mrb[7].mxu1 }
 0x1fd   :  { %v1314_v55 = vmul.f32 -1.442695, %v436_v49  ;;  %v1315_v59 = vmul.f32 -1.442695, %v438_v57  ;;  %v1318_v53 = vld [vmem:[%s2243_s0 + $0x28] sm:$0xff] }
 0x1fe   :  { %1420 = vpow2.f32 %v1313_v52 }
 0x1ff   :  { %1422 = vpow2.f32 %v1314_v55 }
 0x200   :  { %1424 = vpow2.f32 %v1315_v59 }
 0x201   :  { %1426 = vtanh.f32 %v437_v60 }
 0x208   :  { %v1421_v61 = vpop.eup %1420 }
 0x209   :  { %v1423_v62 = vpop.eup %1422  ;;  %v442_v63 = vadd.f32 1.0, %v1421_v61 }
 0x20a   :  { %v448_v33 = vadd.f32 1.0, %v1423_v62  ;;  %v1425_v34 = vpop.eup %1424 }
 0x20b   :  { %1428 = vrcp.f32 %v442_v63  ;;  %v1427_v36 = vpop.eup %1426  ;;  %v455_v41 = vadd.f32 1.0, %v1425_v34  ;;  %v482_v63 = vunpack.c.h.bf16 %v1318_v53  ;;  %v481_v34 = vunpack.c.l.bf16 %v1318_v53 }
 0x20c   :  { %1430 = vrcp.f32 %v448_v33 }
 0x20d   :  { %1432 = vrcp.f32 %v455_v41 }
 0x215   :  { %v1429_v37 = vpop.eup %1428 }
 0x216   :  { %v1431_v39 = vpop.eup %1430  ;;  %v459_v40 = vmul.f32 %v1429_v37, %v1427_v36 }
 0x217   :  { %v458_v42 = vmul.f32 %v1431_v39, %v1827_v35  ;;  %v1433_v44 = vpop.eup %1432  ;;  %v1317_v35 = vld [vmem:[%s2243_s0 + $0x20] sm:$0xff] }
 0x218   :  { %v479_v48 = vunpack.c.l.bf16 %v1317_v35  ;;  %v480_v49 = vunpack.c.h.bf16 %v1317_v35 }
 0x219   :  { %v1878_v43 = vadd.f32 %v459_v40, %v458_v42 }
 0x21b   :  { %1434 = vtanh.f32 %v1878_v43 }
 0x225   :  { %v1435_v45 = vpop.eup %1434 }
 0x226   :  { %v1881_v46 = vmul.f32 %v1435_v45, %v1433_v44 }
 0x228   :  { %v463_v47 = vpack.c.bf16 %v1881_v46, %v1881_v46  ;;  %v473_v53 = vmul.f32 %v1881_v46, %v1881_v46 }
 0x22a   :  { %1316 = vst [vmem:[%s2244_s2 + $0x4] sm:$0xf] %v463_v47  ;;  %516 = vmatmul.mubr.bf16.vlgmr.msra.gmra.mrb[8].mxu0 %v463_v47  ;;  %557 = vmatmul.mubr.bf16.vlgmr.msra.gmra.mrb[8].mxu1 %v463_v47 }
 0x22b   :  { %614 = vmatpush1.bf16.msra.mxu0 %v1601_v2  ;;  %655 = vmatpush1.bf16.msra.mxu1 %v1629_v7 }
 0x22c   :  { %615 = vmatprep.subr.bf16.mxu0 %v1607_v3  ;;  %656 = vmatprep.subr.bf16.mxu1 %v1648_v10 }
 0x22d   :  { %645 = vmatprep.mubr.bf16.mxu0 %v1564_v1  ;;  %686 = vmatprep.mubr.bf16.mxu1 %v1564_v1 }
 0x22f   :  { %616 = vmatpush1.bf16.msra.mxu0 %v1613_v4  ;;  %657 = vmatpush1.bf16.msra.mxu1 %v1653_v11 }
 0x230   :  { %617 = vmatprep.subr.bf16.mxu0 %v1619_v5  ;;  %658 = vmatprep.subr.bf16.mxu1 %v1670_v14 }
 0x233   :  { %618 = vmatpush1.bf16.msra.mxu0 %v1635_v8  ;;  %659 = vmatpush1.bf16.msra.mxu1 %v1677_v15 }
 0x234   :  { %619 = vmatprep.subr.bf16.mxu0 %v1642_v9  ;;  %660 = vmatprep.subr.bf16.mxu1 %v1683_v16 }
 0x237   :  { %620 = vmatpush1.bf16.msra.mxu0 %v1660_v12  ;;  %661 = vmatpush1.bf16.msra.mxu1 %v1701_v19 }
 0x238   :  { %621 = vmatprep.subr.bf16.mxu0 %v1665_v13  ;;  %662 = vmatprep.subr.bf16.mxu1 %v1707_v20 }
 0x23b   :  { %622 = vmatpush1.bf16.msra.mxu0 %v1689_v17  ;;  %663 = vmatpush1.bf16.msra.mxu1 %v1725_v23 }
 0x23c   :  { %623 = vmatprep.subr.bf16.mxu0 %v1695_v18  ;;  %664 = vmatprep.subr.bf16.mxu1 %v1731_v24 }
 0x23f   :  { %624 = vmatpush1.bf16.msra.mxu0 %v1713_v21  ;;  %665 = vmatpush1.bf16.msra.mxu1 %v1749_v27 }
 0x240   :  { %625 = vmatprep.subr.bf16.mxu0 %v1718_v22  ;;  %666 = vmatprep.subr.bf16.mxu1 %v1755_v28 }
 0x243   :  { %626 = vmatpush1.bf16.msra.mxu0 %v1737_v25  ;;  %667 = vmatpush1.bf16.msra.mxu1 %v1768_v30 }
 0x244   :  { %627 = vmatprep.subr.bf16.mxu0 %v1743_v26  ;;  %668 = vmatprep.subr.bf16.mxu1 %v1774_v31 }
 0x247   :  { %628 = vmatpush1.bf16.msra.mxu0 %v1761_v29  ;;  %669 = vmatpush1.bf16.msra.mxu1 %v1781_v32 }
 0x248   :  { %743 = vmatprep.subr.bf16.mxu0 %v1594_v0  ;;  %784 = vmatprep.subr.bf16.mxu1 %v1624_v6 }
 0x2fd   :  { %v517_v50 = vpop.f32.mrb[8].mxu0  ;;  %v558_v51 = vpop.f32.mrb[8].mxu1 }
 0x2fe   :  { %v565_v52 = vadd.f32 %v517_v50, %v479_v48  ;;  %v519_v54 = vpop.f32.mrb[9].mxu0  ;;  %v560_v55 = vpop.f32.mrb[9].mxu1  ;;  %v567_v37 = vadd.f32 %v558_v51, %v481_v34 }
 0x2ff   :  { %v566_v56 = vadd.f32 %v519_v54, %v480_v49  ;;  %v521_v57 = vpop.f32.mrb[10].mxu0  ;;  %v562_v58 = vpop.f32.mrb[10].mxu1  ;;  %v568_v33 = vadd.f32 %v560_v55, %v482_v63  ;;  %v343_v55 = vmul.f32 %v1830_v38, %v1830_v38 }
 0x300   :  { %v1319_v59 = vmul.f32 -1.442695, %v565_v52  ;;  %v522_v60 = vpop.f32.mrb[11].mxu0  ;;  %v563_v61 = vpop.f32.mrb[11].mxu1 }
 0x301   :  { %v1320_v62 = vmul.f32 -1.442695, %v566_v56  ;;  %v1321_v36 = vmul.f32 -1.442695, %v568_v33  ;;  %v472_v56 = vadd.f32 %v1881_v46, %v1830_v38  ;;  %v475_v58 = vadd.f32 %v473_v53, %v343_v55  ;;  %v1323_v38 = vld [vmem:[%s2243_s0 + $0x30] sm:$0xff] }
 0x302   :  { %1436 = vpow2.f32 %v1319_v59  ;;  %v609_v46 = vunpack.c.l.bf16 %v1323_v38 }
 0x303   :  { %1438 = vpow2.f32 %v1320_v62  ;;  %v610_v62 = vunpack.c.h.bf16 %v1323_v38 }
 0x304   :  { %1440 = vpow2.f32 %v1321_v36  ;;  %v1324_v36 = vld [vmem:[%s2243_s0 + $0x38] sm:$0xff] }
 0x305   :  { %1442 = vtanh.f32 %v567_v37 }
 0x30c   :  { %v1437_v39 = vpop.eup %1436 }
 0x30d   :  { %v1439_v40 = vpop.eup %1438  ;;  %v572_v41 = vadd.f32 1.0, %v1437_v39 }
 0x30e   :  { %v578_v42 = vadd.f32 1.0, %v1439_v40  ;;  %v1441_v44 = vpop.eup %1440 }
 0x30f   :  { %1444 = vrcp.f32 %v572_v41  ;;  %v1443_v45 = vpop.eup %1442  ;;  %v585_v49 = vadd.f32 1.0, %v1441_v44 }
 0x310   :  { %1446 = vrcp.f32 %v578_v42 }
 0x311   :  { %1448 = vrcp.f32 %v585_v49 }
 0x319   :  { %v1445_v47 = vpop.eup %1444 }
 0x31a   :  { %v1447_v35 = vpop.eup %1446  ;;  %v589_v48 = vmul.f32 %v1445_v47, %v1443_v45 }
 0x31b   :  { %v588_v50 = vmul.f32 %v1447_v35, %v1878_v43  ;;  %v1449_v51 = vpop.eup %1448 }
 0x31d   :  { %v1929_v52 = vadd.f32 %v589_v48, %v588_v50  ;;  %v612_v48 = vunpack.c.h.bf16 %v1324_v36  ;;  %v611_v50 = vunpack.c.l.bf16 %v1324_v36 }
 0x31f   :  { %1450 = vtanh.f32 %v1929_v52 }
 0x329   :  { %v1451_v54 = vpop.eup %1450 }
 0x32a   :  { %v592_v57 = vmul.f32 %v1451_v54, %v1449_v51 }
 0x32c   :  { %v593_v59 = vpack.c.bf16 %v592_v57, %v592_v57  ;;  %v1938_v43 = vadd.f32 %v592_v57, %v472_v56  ;;  %v603_v60 = vmul.f32 %v592_v57, %v592_v57 }
 0x32e   :  { %1322 = vst [vmem:[%s2244_s2 + $0x8] sm:$0xf] %v593_v59  ;;  %v1943_v61 = vadd.f32 %v603_v60, %v475_v58  ;;  %646 = vmatmul.mubr.bf16.vlgmr.msra.gmra.mrb[12].mxu0 %v593_v59  ;;  %687 = vmatmul.mubr.bf16.vlgmr.msra.gmra.mrb[12].mxu1 %v593_v59 }
 0x32f   :  { %744 = vmatpush1.bf16.msra.mxu0 %v1601_v2  ;;  %785 = vmatpush1.bf16.msra.mxu1 %v1629_v7 }
 0x330   :  { %745 = vmatprep.subr.bf16.mxu0 %v1607_v3  ;;  %786 = vmatprep.subr.bf16.mxu1 %v1648_v10 }
 0x331   :  { %775 = vmatprep.mubr.bf16.mxu0 %v1564_v1  ;;  %816 = vmatprep.mubr.bf16.mxu1 %v1564_v1 }
 0x333   :  { %746 = vmatpush1.bf16.msra.mxu0 %v1613_v4  ;;  %787 = vmatpush1.bf16.msra.mxu1 %v1653_v11 }
 0x334   :  { %747 = vmatprep.subr.bf16.mxu0 %v1619_v5  ;;  %788 = vmatprep.subr.bf16.mxu1 %v1670_v14 }
 0x337   :  { %748 = vmatpush1.bf16.msra.mxu0 %v1635_v8  ;;  %789 = vmatpush1.bf16.msra.mxu1 %v1677_v15 }
 0x338   :  { %749 = vmatprep.subr.bf16.mxu0 %v1642_v9  ;;  %790 = vmatprep.subr.bf16.mxu1 %v1683_v16 }
 0x33b   :  { %750 = vmatpush1.bf16.msra.mxu0 %v1660_v12  ;;  %791 = vmatpush1.bf16.msra.mxu1 %v1701_v19 }
 0x33c   :  { %751 = vmatprep.subr.bf16.mxu0 %v1665_v13  ;;  %792 = vmatprep.subr.bf16.mxu1 %v1707_v20 }
 0x33f   :  { %752 = vmatpush1.bf16.msra.mxu0 %v1689_v17  ;;  %793 = vmatpush1.bf16.msra.mxu1 %v1725_v23 }
 0x340   :  { %753 = vmatprep.subr.bf16.mxu0 %v1695_v18  ;;  %794 = vmatprep.subr.bf16.mxu1 %v1731_v24 }
 0x343   :  { %754 = vmatpush1.bf16.msra.mxu0 %v1713_v21  ;;  %795 = vmatpush1.bf16.msra.mxu1 %v1749_v27 }
 0x344   :  { %755 = vmatprep.subr.bf16.mxu0 %v1718_v22  ;;  %796 = vmatprep.subr.bf16.mxu1 %v1755_v28 }
 0x347   :  { %756 = vmatpush1.bf16.msra.mxu0 %v1737_v25  ;;  %797 = vmatpush1.bf16.msra.mxu1 %v1768_v30 }
 0x348   :  { %757 = vmatprep.subr.bf16.mxu0 %v1743_v26  ;;  %798 = vmatprep.subr.bf16.mxu1 %v1774_v31 }
 0x34b   :  { %758 = vmatpush1.bf16.msra.mxu0 %v1761_v29  ;;  %799 = vmatpush1.bf16.msra.mxu1 %v1781_v32 }
 0x34c   :  { %873 = vmatprep.subr.bf16.mxu0 %v1594_v0  ;;  %914 = vmatprep.subr.bf16.mxu1 %v1624_v6 }
 0x401   :  { %v647_v63 = vpop.f32.mrb[12].mxu0  ;;  %v688_v33 = vpop.f32.mrb[12].mxu1 }
 0x402   :  { %v695_v34 = vadd.f32 %v647_v63, %v609_v46  ;;  %v649_v37 = vpop.f32.mrb[13].mxu0  ;;  %v690_v39 = vpop.f32.mrb[13].mxu1  ;;  %v697_v53 = vadd.f32 %v688_v33, %v611_v50 }
 0x403   :  { %v696_v40 = vadd.f32 %v649_v37, %v610_v62  ;;  %v651_v41 = vpop.f32.mrb[14].mxu0  ;;  %v692_v42 = vpop.f32.mrb[14].mxu1  ;;  %v698_v49 = vadd.f32 %v690_v39, %v612_v48 }
 0x404   :  { %v1325_v44 = vmul.f32 -1.442695, %v695_v34  ;;  %v652_v45 = vpop.f32.mrb[15].mxu0  ;;  %v693_v47 = vpop.f32.mrb[15].mxu1 }
 0x405   :  { %v1326_v35 = vmul.f32 -1.442695, %v696_v40  ;;  %v1327_v51 = vmul.f32 -1.442695, %v698_v49 }
 0x406   :  { %1452 = vpow2.f32 %v1325_v44 }
 0x407   :  { %1454 = vpow2.f32 %v1326_v35 }
 0x408   :  { %1456 = vpow2.f32 %v1327_v51 }
 0x409   :  { %1458 = vtanh.f32 %v697_v53 }
 0x410   :  { %v1453_v54 = vpop.eup %1452 }
 0x411   :  { %v1455_v55 = vpop.eup %1454  ;;  %v702_v56 = vadd.f32 1.0, %v1453_v54 }
 0x412   :  { %v708_v57 = vadd.f32 1.0, %v1455_v55  ;;  %v1457_v58 = vpop.eup %1456 }
 0x413   :  { %1460 = vrcp.f32 %v702_v56  ;;  %v1459_v59 = vpop.eup %1458  ;;  %v715_v62 = vadd.f32 1.0, %v1457_v58 }
 0x414   :  { %1462 = vrcp.f32 %v708_v57 }
 0x415   :  { %1464 = vrcp.f32 %v715_v62 }
 0x41d   :  { %v1461_v60 = vpop.eup %1460 }
 0x41e   :  { %v1463_v38 = vpop.eup %1462  ;;  %v719_v46 = vmul.f32 %v1461_v60, %v1459_v59 }
 0x41f   :  { %v718_v63 = vmul.f32 %v1463_v38, %v1929_v52  ;;  %v1465_v33 = vpop.eup %1464 }
 0x421   :  { %v1986_v34 = vadd.f32 %v719_v46, %v718_v63 }
 0x423   :  { %1466 = vtanh.f32 %v1986_v34 }
 0x42d   :  { %v1467_v36 = vpop.eup %1466 }
 0x42e   :  { %v722_v37 = vmul.f32 %v1467_v36, %v1465_v33 }
 0x430   :  { %v723_v39 = vpack.c.bf16 %v722_v37, %v722_v37  ;;  %v1990_v40 = vadd.f32 %v722_v37, %v1938_v43  ;;  %v733_v41 = vmul.f32 %v722_v37, %v722_v37  ;;  %v1330_v43 = vld [vmem:[%s2243_s0 + $0x48] sm:$0xff] }
 0x431   :  { %v742_v50 = vunpack.c.h.bf16 %v1330_v43  ;;  %v741_v53 = vunpack.c.l.bf16 %v1330_v43 }
 0x432   :  { %1328 = vst [vmem:[%s2244_s2 + $0xc] sm:$0xf] %v723_v39  ;;  %v1996_v42 = vadd.f32 %v733_v41, %v1943_v61  ;;  %776 = vmatmul.mubr.bf16.vlgmr.msra.gmra.mrb[16].mxu0 %v723_v39  ;;  %817 = vmatmul.mubr.bf16.vlgmr.msra.gmra.mrb[16].mxu1 %v723_v39 }
 0x433   :  { %874 = vmatpush1.bf16.msra.mxu0 %v1601_v2  ;;  %915 = vmatpush1.bf16.msra.mxu1 %v1629_v7  ;;  %v1329_v2 = vld [vmem:[%s2243_s0 + $0x40] sm:$0xff] }
 0x434   :  { %875 = vmatprep.subr.bf16.mxu0 %v1607_v3  ;;  %916 = vmatprep.subr.bf16.mxu1 %v1648_v10  ;;  %v739_v3 = vunpack.c.l.bf16 %v1329_v2 }
 0x435   :  { %905 = vmatprep.mubr.bf16.mxu0 %v1564_v1  ;;  %946 = vmatprep.mubr.bf16.mxu1 %v1564_v1 }
 0x437   :  { %876 = vmatpush1.bf16.msra.mxu0 %v1613_v4  ;;  %917 = vmatpush1.bf16.msra.mxu1 %v1653_v11  ;;  %v740_v4 = vunpack.c.h.bf16 %v1329_v2 }
 0x438   :  { %877 = vmatprep.subr.bf16.mxu0 %v1619_v5  ;;  %918 = vmatprep.subr.bf16.mxu1 %v1670_v14 }
 0x43b   :  { %878 = vmatpush1.bf16.msra.mxu0 %v1635_v8  ;;  %919 = vmatpush1.bf16.msra.mxu1 %v1677_v15 }
 0x43c   :  { %879 = vmatprep.subr.bf16.mxu0 %v1642_v9  ;;  %920 = vmatprep.subr.bf16.mxu1 %v1683_v16 }
 0x43f   :  { %880 = vmatpush1.bf16.msra.mxu0 %v1660_v12  ;;  %921 = vmatpush1.bf16.msra.mxu1 %v1701_v19 }
 0x440   :  { %881 = vmatprep.subr.bf16.mxu0 %v1665_v13  ;;  %922 = vmatprep.subr.bf16.mxu1 %v1707_v20 }
 0x443   :  { %882 = vmatpush1.bf16.msra.mxu0 %v1689_v17  ;;  %923 = vmatpush1.bf16.msra.mxu1 %v1725_v23 }
 0x444   :  { %883 = vmatprep.subr.bf16.mxu0 %v1695_v18  ;;  %924 = vmatprep.subr.bf16.mxu1 %v1731_v24 }
 0x447   :  { %884 = vmatpush1.bf16.msra.mxu0 %v1713_v21  ;;  %925 = vmatpush1.bf16.msra.mxu1 %v1749_v27 }
 0x448   :  { %885 = vmatprep.subr.bf16.mxu0 %v1718_v22  ;;  %926 = vmatprep.subr.bf16.mxu1 %v1755_v28 }
 0x44b   :  { %886 = vmatpush1.bf16.msra.mxu0 %v1737_v25  ;;  %927 = vmatpush1.bf16.msra.mxu1 %v1768_v30 }
 0x44c   :  { %887 = vmatprep.subr.bf16.mxu0 %v1743_v26  ;;  %928 = vmatprep.subr.bf16.mxu1 %v1774_v31 }
 0x44f   :  { %888 = vmatpush1.bf16.msra.mxu0 %v1761_v29  ;;  %929 = vmatpush1.bf16.msra.mxu1 %v1781_v32 }
 0x450   :  { %1003 = vmatprep.subr.bf16.mxu0 %v1594_v0  ;;  %1044 = vmatprep.subr.bf16.mxu1 %v1624_v6 }
 0x505   :  { %v777_v5 = vpop.f32.mrb[16].mxu0  ;;  %v818_v8 = vpop.f32.mrb[16].mxu1 }
 0x506   :  { %v825_v52 = vadd.f32 %v777_v5, %v739_v3  ;;  %v779_v61 = vpop.f32.mrb[17].mxu0  ;;  %v820_v44 = vpop.f32.mrb[17].mxu1  ;;  %v827_v55 = vadd.f32 %v818_v8, %v741_v53 }
 0x507   :  { %v826_v45 = vadd.f32 %v779_v61, %v740_v4  ;;  %v781_v47 = vpop.f32.mrb[18].mxu0  ;;  %v822_v0 = vpop.f32.mrb[18].mxu1  ;;  %v828_v51 = vadd.f32 %v820_v44, %v742_v50 }
 0x508   :  { %v1331_v35 = vmul.f32 -1.442695, %v825_v52  ;;  %v782_v6 = vpop.f32.mrb[19].mxu0  ;;  %v823_v48 = vpop.f32.mrb[19].mxu1 }
 0x509   :  { %v1332_v49 = vmul.f32 -1.442695, %v826_v45  ;;  %v1333_v54 = vmul.f32 -1.442695, %v828_v51 }
 0x50a   :  { %1468 = vpow2.f32 %v1331_v35 }
 0x50b   :  { %1470 = vpow2.f32 %v1332_v49 }
 0x50c   :  { %1472 = vpow2.f32 %v1333_v54 }
 0x50d   :  { %1474 = vtanh.f32 %v827_v55 }
 0x514   :  { %v1469_v56 = vpop.eup %1468 }
 0x515   :  { %v1471_v57 = vpop.eup %1470  ;;  %v832_v58 = vadd.f32 1.0, %v1469_v56 }
 0x516   :  { %v838_v59 = vadd.f32 1.0, %v1471_v57  ;;  %v1473_v60 = vpop.eup %1472 }
 0x517   :  { %1476 = vrcp.f32 %v832_v58  ;;  %v1475_v38 = vpop.eup %1474  ;;  %v845_v33 = vadd.f32 1.0, %v1473_v60  ;;  %v1540_v60 = vld [vmem:[%s2242_s1 + $0x2c] ss:$16 sps:$4 sm:$0xff]  }
 0x518   :  { %1478 = vrcp.f32 %v838_v59  ;;  %v1539_v59 = vld [vmem:[%s2242_s1 + $0x8] ss:$16 sps:$4 sm:$0xff]  }
 0x519   :  { %1480 = vrcp.f32 %v845_v33  ;;  %v1546_v33 = vld [vmem:[%s2242_s1 + $0x60] ss:$16 sps:$4 sm:$0xff]  }
 0x521   :  { %v1477_v46 = vpop.eup %1476 }
 0x522   :  { %v1479_v62 = vpop.eup %1478  ;;  %v849_v63 = vmul.f32 %v1477_v46, %v1475_v38  ;;  %v1541_v38 = vld [vmem:[%s2242_s1 + $0x28] ss:$16 sps:$4 sm:$0xff]   ;;  %v1542_v46 = vld [vmem:[%s2242_s1 + $0x4c] ss:$16 sps:$4 sm:$0xff]  }
 0x523   :  { %v848_v36 = vmul.f32 %v1479_v62, %v1986_v34  ;;  %v1481_v39 = vpop.eup %1480  ;;  %v2054_v34 = vld [vmem:[%s2242_s1] ss:$16 sps:$4 sm:$0xff]   ;;  %v1544_v62 = vld [vmem:[%s2242_s1 + $0x64] ss:$16 sps:$4 sm:$0xff]  }
 0x525   :  { %v2039_v37 = vadd.f32 %v849_v63, %v848_v36  ;;  %v1545_v63 = vld [vmem:[%s2242_s1 + $0x6c] ss:$16 sps:$4 sm:$0xff]   ;;  %v1547_v36 = vld [vmem:[%s2242_s1 + $0x68] ss:$16 sps:$4 sm:$0xff]  }
 0x527   :  { %1482 = vtanh.f32 %v2039_v37 }
 0x531   :  { %v1483_v41 = vpop.eup %1482 }
 0x532   :  { %v852_v2 = vmul.f32 %v1483_v41, %v1481_v39  ;;  %v1549_v39 = vld [vmem:[%s2242_s1 + $0x8c] ss:$16 sps:$4 sm:$0xff]   ;;  %v1550_v41 = vld [vmem:[%s2242_s1 + $0x80] ss:$16 sps:$4 sm:$0xff]  }
 0x534   :  { %v853_v3 = vpack.c.bf16 %v852_v2, %v852_v2  ;;  %v2043_v4 = vadd.f32 %v852_v2, %v1990_v40  ;;  %v863_v5 = vmul.f32 %v852_v2, %v852_v2  ;;  %v2061_v40 = vld [vmem:[%s2242_s1 + $0x24] ss:$16 sps:$4 sm:$0xff]   ;;  %v1551_v2 = vld [vmem:[%s2242_s1 + $0x88] ss:$16 sps:$4 sm:$0xff]  }
 0x536   :  { %1334 = vst [vmem:[%s2244_s2 + $0x10] sm:$0xf] %v853_v3  ;;  %v2049_v8 = vadd.f32 %v863_v5, %v1996_v42  ;;  %906 = vmatmul.mubr.bf16.vlgmr.msra.gmra.mrb[20].mxu0 %v853_v3  ;;  %947 = vmatmul.mubr.bf16.vlgmr.msra.gmra.mrb[20].mxu1 %v853_v3  ;;  %v2070_v42 = vld [vmem:[%s2242_s1 + $0x20] ss:$16 sps:$4 sm:$0xff]   ;;  %v1552_v3 = vld [vmem:[%s2242_s1 + $0xa4] ss:$16 sps:$4 sm:$0xff]  }
 0x537   :  { %1004 = vmatpush1.bf16.msra.mxu0 %v2054_v34  ;;  %1045 = vmatpush1.bf16.msra.mxu1 %v1629_v7  ;;  %v2077_v7 = vld [vmem:[%s2242_s1 + $0x44] ss:$16 sps:$4 sm:$0xff]   ;;  %v1554_v5 = vld [vmem:[%s2242_s1 + $0xa0] ss:$16 sps:$4 sm:$0xff]  }
 0x538   :  { %1005 = vmatprep.subr.bf16.mxu0 %v2061_v40  ;;  %1046 = vmatprep.subr.bf16.mxu1 %v1648_v10  ;;  %v2084_v10 = vld [vmem:[%s2242_s1 + $0x40] ss:$16 sps:$4 sm:$0xff]  }
 0x539   :  { %1035 = vmatprep.mubr.bf16.mxu0 %v1564_v1  ;;  %1076 = vmatprep.mubr.bf16.mxu1 %v1564_v1 }
 0x53b   :  { %1006 = vmatpush1.bf16.msra.mxu0 %v2070_v42  ;;  %1047 = vmatpush1.bf16.msra.mxu1 %v1653_v11  ;;  %v1538_v11 = vld [vmem:[%s2242_s1 + $0xc] ss:$16 sps:$4 sm:$0xff]  }
 0x53c   :  { %1007 = vmatprep.subr.bf16.mxu0 %v2077_v7  ;;  %1048 = vmatprep.subr.bf16.mxu1 %v1670_v14 }
 0x53f   :  { %1008 = vmatpush1.bf16.msra.mxu0 %v2084_v10  ;;  %1049 = vmatpush1.bf16.msra.mxu1 %v1677_v15 }
 0x540   :  { %1009 = vmatprep.subr.bf16.mxu0 %v1642_v9  ;;  %1050 = vmatprep.subr.bf16.mxu1 %v1683_v16  ;;  %v1537_v9 = vld [vmem:[%s2242_s1 + $0x4] ss:$16 sps:$4 sm:$0xff]  }
 0x543   :  { %1010 = vmatpush1.bf16.msra.mxu0 %v1660_v12  ;;  %1051 = vmatpush1.bf16.msra.mxu1 %v1701_v19  ;;  %v1335_v12 = vld [vmem:[%s2243_s0 + $0x50] sm:$0xff] }
 0x544   :  { %1011 = vmatprep.subr.bf16.mxu0 %v1665_v13  ;;  %1052 = vmatprep.subr.bf16.mxu1 %v1707_v20  ;;  %v869_v13 = vunpack.c.l.bf16 %v1335_v12  ;;  %v870_v14 = vunpack.c.h.bf16 %v1335_v12  ;;  %v1563_v12 = vld [vmem:[%s2242_s1 + $0xe8] ss:$16 sps:$4 sm:$0xff]  }
 0x547   :  { %1012 = vmatpush1.bf16.msra.mxu0 %v1689_v17  ;;  %1053 = vmatpush1.bf16.msra.mxu1 %v1725_v23 }
 0x548   :  { %1013 = vmatprep.subr.bf16.mxu0 %v1695_v18  ;;  %1054 = vmatprep.subr.bf16.mxu1 %v1731_v24  ;;  %v1336_v18 = vld [vmem:[%s2243_s0 + $0x58] sm:$0xff] }
 0x54b   :  { %1014 = vmatpush1.bf16.msra.mxu0 %v1713_v21  ;;  %1055 = vmatpush1.bf16.msra.mxu1 %v1749_v27 }
 0x54c   :  { %1015 = vmatprep.subr.bf16.mxu0 %v1718_v22  ;;  %1056 = vmatprep.subr.bf16.mxu1 %v1755_v28  ;;  %v872_v28 = vunpack.c.h.bf16 %v1336_v18 }
 0x54f   :  { %1016 = vmatpush1.bf16.msra.mxu0 %v1737_v25  ;;  %1057 = vmatpush1.bf16.msra.mxu1 %v1768_v30  ;;  %v871_v30 = vunpack.c.l.bf16 %v1336_v18 }
 0x550   :  { %1017 = vmatprep.subr.bf16.mxu0 %v1743_v26  ;;  %1058 = vmatprep.subr.bf16.mxu1 %v1774_v31 }
 0x553   :  { %1018 = vmatpush1.bf16.msra.mxu0 %v1761_v29  ;;  %1059 = vmatpush1.bf16.msra.mxu1 %v1781_v32 }
 0x554   :  { %1133 = vmatprep.subr.bf16.mxu0 %v1537_v9  ;;  %1174 = vmatprep.subr.bf16.mxu1 %v1538_v11  ;;  %v1561_v9 = vld [vmem:[%s2242_s1 + $0xec] ss:$16 sps:$4 sm:$0xff]   ;;  %v1562_v11 = vld [vmem:[%s2242_s1 + $0xe0] ss:$16 sps:$4 sm:$0xff]  }
 0x609   :  { %v907_v15 = vpop.f32.mrb[20].mxu0  ;;  %v948_v16 = vpop.f32.mrb[20].mxu1 }
 0x60a   :  { %v955_v17 = vadd.f32 %v907_v15, %v869_v13  ;;  %v909_v19 = vpop.f32.mrb[21].mxu0  ;;  %v950_v20 = vpop.f32.mrb[21].mxu1  ;;  %v957_v32 = vadd.f32 %v948_v16, %v871_v30  ;;  %v1341_v13 = vld [vmem:[%s2243_s0 + $0x60] sm:$0xff] }
 0x60b   :  { %v956_v21 = vadd.f32 %v909_v19, %v870_v14  ;;  %v911_v22 = vpop.f32.mrb[22].mxu0  ;;  %v952_v23 = vpop.f32.mrb[22].mxu1  ;;  %v958_v29 = vadd.f32 %v950_v20, %v872_v28  ;;  %v999_v14 = vunpack.c.l.bf16 %v1341_v13  ;;  %v1000_v15 = vunpack.c.h.bf16 %v1341_v13  ;;  %v1342_v19 = vld [vmem:[%s2243_s0 + $0x68] sm:$0xff] }
 0x60c   :  { %v1337_v24 = vmul.f32 -1.442695, %v955_v17  ;;  %v912_v25 = vpop.f32.mrb[23].mxu0  ;;  %v953_v26 = vpop.f32.mrb[23].mxu1 }
 0x60d   :  { %v1338_v27 = vmul.f32 -1.442695, %v956_v21  ;;  %v1339_v31 = vmul.f32 -1.442695, %v958_v29  ;;  %v1002_v29 = vunpack.c.h.bf16 %v1342_v19 }
 0x60e   :  { %1484 = vpow2.f32 %v1337_v24 }
 0x60f   :  { %1486 = vpow2.f32 %v1338_v27 }
 0x610   :  { %1488 = vpow2.f32 %v1339_v31  ;;  %v1001_v31 = vunpack.c.l.bf16 %v1342_v19 }
 0x611   :  { %1490 = vtanh.f32 %v957_v32 }
 0x618   :  { %v1485_v52 = vpop.eup %1484 }
 0x619   :  { %v1487_v43 = vpop.eup %1486  ;;  %v962_v61 = vadd.f32 1.0, %v1485_v52 }
 0x61a   :  { %v968_v44 = vadd.f32 1.0, %v1487_v43  ;;  %v1489_v45 = vpop.eup %1488 }
 0x61b   :  { %1492 = vrcp.f32 %v962_v61  ;;  %v1491_v47 = vpop.eup %1490  ;;  %v975_v48 = vadd.f32 1.0, %v1489_v45 }
 0x61c   :  { %1494 = vrcp.f32 %v968_v44 }
 0x61d   :  { %1496 = vrcp.f32 %v975_v48 }
 0x625   :  { %v1493_v0 = vpop.eup %1492 }
 0x626   :  { %v1495_v35 = vpop.eup %1494  ;;  %v979_v6 = vmul.f32 %v1493_v0, %v1491_v47 }
 0x627   :  { %v978_v49 = vmul.f32 %v1495_v35, %v2039_v37  ;;  %v1497_v51 = vpop.eup %1496  ;;  %v1548_v37 = vld [vmem:[%s2242_s1 + $0x84] ss:$16 sps:$4 sm:$0xff]  }
 0x629   :  { %v2121_v50 = vadd.f32 %v979_v6, %v978_v49 }
 0x62b   :  { %1498 = vtanh.f32 %v2121_v50 }
 0x635   :  { %v1499_v53 = vpop.eup %1498 }
 0x636   :  { %v982_v54 = vmul.f32 %v1499_v53, %v1497_v51 }
 0x638   :  { %v983_v55 = vpack.c.bf16 %v982_v54, %v982_v54  ;;  %v2125_v56 = vadd.f32 %v982_v54, %v2043_v4  ;;  %v993_v57 = vmul.f32 %v982_v54, %v982_v54  ;;  %v1553_v4 = vld [vmem:[%s2242_s1 + $0xac] ss:$16 sps:$4 sm:$0xff]  }
 0x63a   :  { %1340 = vst [vmem:[%s2244_s2 + $0x14] sm:$0xf] %v983_v55  ;;  %v2131_v58 = vadd.f32 %v993_v57, %v2049_v8  ;;  %1036 = vmatmul.mubr.bf16.vlgmr.msra.gmra.mrb[24].mxu0 %v983_v55  ;;  %1077 = vmatmul.mubr.bf16.vlgmr.msra.gmra.mrb[24].mxu1 %v983_v55  ;;  %v1555_v8 = vld [vmem:[%s2242_s1 + $0xa8] ss:$16 sps:$4 sm:$0xff]  }
 0x63b   :  { %1134 = vmatpush1.bf16.msra.mxu0 %v2054_v34  ;;  %1175 = vmatpush1.bf16.msra.mxu1 %v1539_v59  ;;  %v1556_v34 = vld [vmem:[%s2242_s1 + $0xc4] ss:$16 sps:$4 sm:$0xff]  }
 0x63c   :  { %1135 = vmatprep.subr.bf16.mxu0 %v2061_v40  ;;  %1176 = vmatprep.subr.bf16.mxu1 %v1540_v60  ;;  %v1557_v40 = vld [vmem:[%s2242_s1 + $0xcc] ss:$16 sps:$4 sm:$0xff]  }
 0x63d   :  { %1165 = vmatprep.mubr.bf16.mxu0 %v1564_v1  ;;  %1206 = vmatprep.mubr.bf16.mxu1 %v1564_v1  ;;  %v1543_v1 = vld [vmem:[%s2242_s1 + $0x48] ss:$16 sps:$4 sm:$0xff]  }
 0x63f   :  { %1136 = vmatpush1.bf16.msra.mxu0 %v2070_v42  ;;  %1177 = vmatpush1.bf16.msra.mxu1 %v1541_v38  ;;  %v1558_v42 = vld [vmem:[%s2242_s1 + $0xc0] ss:$16 sps:$4 sm:$0xff]  }
 0x640   :  { %1137 = vmatprep.subr.bf16.mxu0 %v2077_v7  ;;  %1178 = vmatprep.subr.bf16.mxu1 %v1542_v46  ;;  %v1559_v7 = vld [vmem:[%s2242_s1 + $0xc8] ss:$16 sps:$4 sm:$0xff]  }
 0x643   :  { %1138 = vmatpush1.bf16.msra.mxu0 %v2084_v10  ;;  %1179 = vmatpush1.bf16.msra.mxu1 %v1543_v1  ;;  %v1560_v10 = vld [vmem:[%s2242_s1 + $0xe4] ss:$16 sps:$4 sm:$0xff]  }
 0x644   :  { %1139 = vmatprep.subr.bf16.mxu0 %v1544_v62  ;;  %1180 = vmatprep.subr.bf16.mxu1 %v1545_v63 }
 0x647   :  { %1140 = vmatpush1.bf16.msra.mxu0 %v1546_v33  ;;  %1181 = vmatpush1.bf16.msra.mxu1 %v1547_v36 }
 0x648   :  { %1141 = vmatprep.subr.bf16.mxu0 %v1548_v37  ;;  %1182 = vmatprep.subr.bf16.mxu1 %v1549_v39 }
 0x64b   :  { %1142 = vmatpush1.bf16.msra.mxu0 %v1550_v41  ;;  %1183 = vmatpush1.bf16.msra.mxu1 %v1551_v2 }
 0x64c   :  { %1143 = vmatprep.subr.bf16.mxu0 %v1552_v3  ;;  %1184 = vmatprep.subr.bf16.mxu1 %v1553_v4 }
 0x64f   :  { %1144 = vmatpush1.bf16.msra.mxu0 %v1554_v5  ;;  %1185 = vmatpush1.bf16.msra.mxu1 %v1555_v8 }
 0x650   :  { %1145 = vmatprep.subr.bf16.mxu0 %v1556_v34  ;;  %1186 = vmatprep.subr.bf16.mxu1 %v1557_v40 }
 0x653   :  { %1146 = vmatpush1.bf16.msra.mxu0 %v1558_v42  ;;  %1187 = vmatpush1.bf16.msra.mxu1 %v1559_v7 }
 0x654   :  { %1147 = vmatprep.subr.bf16.mxu0 %v1560_v10  ;;  %1188 = vmatprep.subr.bf16.mxu1 %v1561_v9 }
 0x657   :  { %1148 = vmatpush1.bf16.msra.mxu0 %v1562_v11  ;;  %1189 = vmatpush1.bf16.msra.mxu1 %v1563_v12 }
 0x70d   :  { %v1037_v16 = vpop.f32.mrb[24].mxu0  ;;  %v1078_v17 = vpop.f32.mrb[24].mxu1 }
 0x70e   :  { %v1085_v18 = vadd.f32 %v1037_v16, %v999_v14  ;;  %v1039_v20 = vpop.f32.mrb[25].mxu0  ;;  %v1080_v21 = vpop.f32.mrb[25].mxu1  ;;  %v1087_v52 = vadd.f32 %v1078_v17, %v1001_v31 }
 0x70f   :  { %v1086_v22 = vadd.f32 %v1039_v20, %v1000_v15  ;;  %v1041_v23 = vpop.f32.mrb[26].mxu0  ;;  %v1082_v24 = vpop.f32.mrb[26].mxu1  ;;  %v1088_v30 = vadd.f32 %v1080_v21, %v1002_v29 }
 0x710   :  { %v1343_v25 = vmul.f32 -1.442695, %v1085_v18  ;;  %v1042_v26 = vpop.f32.mrb[27].mxu0  ;;  %v1083_v27 = vpop.f32.mrb[27].mxu1 }
 0x711   :  { %v1344_v28 = vmul.f32 -1.442695, %v1086_v22  ;;  %v1345_v32 = vmul.f32 -1.442695, %v1088_v30 }
 0x712   :  { %1500 = vpow2.f32 %v1343_v25 }
 0x713   :  { %1502 = vpow2.f32 %v1344_v28 }
 0x714   :  { %1504 = vpow2.f32 %v1345_v32 }
 0x715   :  { %1506 = vtanh.f32 %v1087_v52 }
 0x71c   :  { %v1501_v43 = vpop.eup %1500 }
 0x71d   :  { %v1503_v61 = vpop.eup %1502  ;;  %v1092_v44 = vadd.f32 1.0, %v1501_v43 }
 0x71e   :  { %v1098_v45 = vadd.f32 1.0, %v1503_v61  ;;  %v1505_v47 = vpop.eup %1504 }
 0x71f   :  { %1508 = vrcp.f32 %v1092_v44  ;;  %v1507_v0 = vpop.eup %1506  ;;  %v1105_v49 = vadd.f32 1.0, %v1505_v47 }
 0x720   :  { %1510 = vrcp.f32 %v1098_v45 }
 0x721   :  { %1512 = vrcp.f32 %v1105_v49 }
 0x729   :  { %v1509_v35 = vpop.eup %1508 }
 0x72a   :  { %v1511_v6 = vpop.eup %1510  ;;  %v1109_v48 = vmul.f32 %v1509_v35, %v1507_v0 }
 0x72b   :  { %v1108_v51 = vmul.f32 %v1511_v6, %v2121_v50  ;;  %v1513_v54 = vpop.eup %1512  ;;  %v1347_v50 = vld [vmem:[%s2243_s0 + $0x70] sm:$0xff] }
 0x72c   :  { %v1129_v1 = vunpack.c.l.bf16 %v1347_v50  ;;  %v1130_v62 = vunpack.c.h.bf16 %v1347_v50 }
 0x72d   :  { %v1110_v53 = vadd.f32 %v1109_v48, %v1108_v51 }
 0x72f   :  { %1514 = vtanh.f32 %v1110_v53 }
 0x739   :  { %v1515_v55 = vpop.eup %1514 }
 0x73a   :  { %v1112_v57 = vmul.f32 %v1515_v55, %v1513_v54 }
 0x73c   :  { %v1113_v59 = vpack.c.bf16 %v1112_v57, %v1112_v57  ;;  %v1122_v60 = vadd.f32 %v1112_v57, %v2125_v56  ;;  %v1123_v38 = vmul.f32 %v1112_v57, %v1112_v57  ;;  %v1348_v56 = vld [vmem:[%s2243_s0 + $0x78] sm:$0xff] }
 0x73d   :  { %v1132_v34 = vunpack.c.h.bf16 %v1348_v56  ;;  %v1131_v42 = vunpack.c.l.bf16 %v1348_v56 }
 0x73e   :  { %1346 = vst [vmem:[%s2244_s2 + $0x18] sm:$0xf] %v1113_v59  ;;  %v1125_v46 = vadd.f32 %v1123_v38, %v2131_v58  ;;  %1166 = vmatmul.mubr.bf16.vlgmr.msra.gmra.mrb[28].mxu0 %v1113_v59  ;;  %1207 = vmatmul.mubr.bf16.vlgmr.msra.gmra.mrb[28].mxu1 %v1113_v59 }
 0x811   :  { %v1167_v63 = vpop.f32.mrb[28].mxu0  ;;  %v1208_v33 = vpop.f32.mrb[28].mxu1 }
 0x812   :  { %v1215_v36 = vadd.f32 %v1167_v63, %v1129_v1  ;;  %v1169_v37 = vpop.f32.mrb[29].mxu0  ;;  %v1210_v39 = vpop.f32.mrb[29].mxu1  ;;  %v1217_v10 = vadd.f32 %v1208_v33, %v1131_v42 }
 0x813   :  { %v1216_v41 = vadd.f32 %v1169_v37, %v1130_v62  ;;  %v1171_v2 = vpop.f32.mrb[30].mxu0  ;;  %v1212_v58 = vpop.f32.mrb[30].mxu1  ;;  %v1218_v40 = vadd.f32 %v1210_v39, %v1132_v34 }
 0x814   :  { %v1349_v3 = vmul.f32 -1.442695, %v1215_v36  ;;  %v1172_v4 = vpop.f32.mrb[31].mxu0  ;;  %v1213_v5 = vpop.f32.mrb[31].mxu1 }
 0x815   :  { %v1350_v8 = vmul.f32 -1.442695, %v1216_v41  ;;  %v1351_v7 = vmul.f32 -1.442695, %v1218_v40 }
 0x816   :  { %1516 = vpow2.f32 %v1349_v3 }
 0x817   :  { %1518 = vpow2.f32 %v1350_v8 }
 0x818   :  { %1520 = vpow2.f32 %v1351_v7 }
 0x819   :  { %1522 = vtanh.f32 %v1217_v10 }
 0x820   :  { %v1517_v9 = vpop.eup %1516 }
 0x821   :  { %v1519_v11 = vpop.eup %1518  ;;  %v1222_v12 = vadd.f32 1.0, %v1517_v9 }
 0x822   :  { %v1228_v13 = vadd.f32 1.0, %v1519_v11  ;;  %v1521_v14 = vpop.eup %1520 }
 0x823   :  { %1524 = vrcp.f32 %v1222_v12  ;;  %v1523_v15 = vpop.eup %1522  ;;  %v1235_v19 = vadd.f32 1.0, %v1521_v14 }
 0x824   :  { %1526 = vrcp.f32 %v1228_v13 }
 0x825   :  { %1528 = vrcp.f32 %v1235_v19 }
 0x82d   :  { %v1525_v16 = vpop.eup %1524 }
 0x82e   :  { %v1527_v17 = vpop.eup %1526  ;;  %v1239_v18 = vmul.f32 %v1525_v16, %v1523_v15 }
 0x82f   :  { %v1238_v20 = vmul.f32 %v1527_v17, %v1110_v53  ;;  %v1529_v22 = vpop.eup %1528 }
 0x831   :  { %v1240_v21 = vadd.f32 %v1239_v18, %v1238_v20 }
 0x833   :  { %1530 = vtanh.f32 %v1240_v21 }
 0x83d   :  { %v1531_v23 = vpop.eup %1530 }
 0x83e   :  { %v1242_v24 = vmul.f32 %v1531_v23, %v1529_v22 }
 0x840   :  { %v1243_v25 = vpack.c.bf16 %v1242_v24, %v1242_v24  ;;  %v1252_v26 = vadd.f32 %v1242_v24, %v1122_v60  ;;  %v1253_v27 = vmul.f32 %v1242_v24, %v1242_v24 }
 0x842   :  { %1352 = vst [vmem:[%s2244_s2 + $0x1c] sm:$0xf] %v1243_v25  ;;  %v1255_v28 = vadd.f32 %v1253_v27, %v1125_v46  ;;  %1260 = vst [vmem:[%s2245_s3] sm:$0xff] %v1252_v26 }
 0x844   :  { %1263 = vst [vmem:[%s2246_s4] sm:$0xff] %v1255_v28 }

</bundles_post_ra>
